<compile_context>
chip_gen: v7x
topology: tpu7x:2x2x1
jax: 0.10.0
libtpu: 0.0.40
codegen_flags: <defaults>
</compile_context>

<pallas_src>
import functools

import jax
import jax.numpy as jnp
from jax.experimental import pallas as pl

# ---------------- config (small synthetic shapes) ----------------
B = 2          # batch
K = 8          # number of visual regions
DV = 32        # visual feature dim
T = 8          # question length
NTOKEN = 50    # vocab size
EMB = 16       # word embedding dim
H = 32         # num_hid
NUM_ANS = 10   # answer classes
MAX_LEN = 6    # generator max length

LANE = 128
PAD_ANS = LANE      # classifier logits padded to a lane-dense width
PAD_VOCAB = LANE    # generator vocab logits padded to a lane-dense width


# ================= the fused Pallas kernel =================

def _vqae_kernel(
    # data
    qx_ref,         # (T*B, EMB)      time-major question embeddings
    v2d_ref,        # (B*K, DV)       visual features, batch-major flattened
    gtx_ref,        # ((L-1)*B, EMB)  time-major gt embeddings (teacher forcing)
    # GRU question encoder (gates stacked on leading axis, PyTorch order r, z, n)
    g_wih_ref, g_whh_ref, g_bih_ref, g_bhh_ref,
    # attention (NewAttention)
    a_wv_ref, a_bv_ref, a_wq_ref, a_bq_ref, a_wl_ref, a_bl_ref,
    # FC nets
    qn_w_ref, qn_b_ref, vn_w_ref, vn_b_ref,
    # classifier
    c_w1_ref, c_b1_ref, c_w2_ref, c_b2_ref,
    # generator input projection (joint feature -> EMB)
    gf_w_ref, gf_b_ref,
    # LSTM generator (gates stacked on leading axis, PyTorch order i, f, g, o)
    l_wih_ref, l_whh_ref, l_bih_ref, l_bhh_ref,
    # fused vocab projection (padded to 128 lanes)
    go_w_ref, go_b_ref,
    # outputs
    vqa_ref,        # (B, PAD_ANS)
    vqe_ref,        # (MAX_LEN, B, PAD_VOCAB)   time-major
    *, batch, t_steps, max_len, n_regions, hid):

    f32 = jnp.float32
    dot = functools.partial(jnp.dot, preferred_element_type=f32)

    # ---------- GRU question encoder (take last hidden) ----------
    # Input-to-hidden contributions hoisted out of the recurrence: one matmul per gate over
    # all timesteps at once.
    x_all = qx_ref[...]                                        # (T*B, EMB)
    gi_r = dot(x_all, g_wih_ref[0]) + g_bih_ref[0]             # (T*B, H)
    gi_z = dot(x_all, g_wih_ref[1]) + g_bih_ref[1]
    gi_n = dot(x_all, g_wih_ref[2]) + g_bih_ref[2]

    h = jnp.zeros((batch, hid), f32)
    for t in range(t_steps):                                   # fully unrolled (T is small)
        lo = t * batch
        gh_r = dot(h, g_whh_ref[0]) + g_bhh_ref[0]
        gh_z = dot(h, g_whh_ref[1]) + g_bhh_ref[1]
        gh_n = dot(h, g_whh_ref[2]) + g_bhh_ref[2]
        r = jax.nn.sigmoid(gi_r[lo:lo + batch] + gh_r)
        z = jax.nn.sigmoid(gi_z[lo:lo + batch] + gh_z)
        n = jnp.tanh(gi_n[lo:lo + batch] + r * gh_n)           # r * (Whh.h + bhh) as in PyTorch
        h = (1.0 - z) * n + z * h
    q_emb = h                                                  # (B, H)

    # ---------- attention pooling over K regions ----------
    v2d = v2d_ref[...]                                                      # (B*K, DV)
    v_proj = jnp.maximum(dot(v2d, a_wv_ref[...]) + a_bv_ref[...], 0.0)      # (B*K, H)
    q_proj = jnp.maximum(dot(q_emb, a_wq_ref[...]) + a_bq_ref[...], 0.0)    # (B, H)
    v_emb_rows = []
    for b in range(batch):                                     # B=2, unrolled; stays in vregs
        sl = slice(b * n_regions, (b + 1) * n_regions)
        joint_b = v_proj[sl] * q_proj[b:b + 1]                 # (K, H)  sublane-broadcast of q
        logit_b = dot(joint_b, a_wl_ref[...]) + a_bl_ref[...]  # (K, 1)
        m = jnp.max(logit_b, axis=0, keepdims=True)
        e = jnp.exp(logit_b - m)
        att_b = e / jnp.sum(e, axis=0, keepdims=True)          # softmax over the K regions
        v_emb_rows.append(jnp.sum(att_b * v2d[sl], axis=0, keepdims=True))  # (1, DV)
    v_emb = jnp.concatenate(v_emb_rows, axis=0)                # (B, DV)

    # ---------- FCNets, joint feature, classifier, generator feature ----------
    q_repr = jnp.maximum(dot(q_emb, qn_w_ref[...]) + qn_b_ref[...], 0.0)    # (B, H)
    v_repr = jnp.maximum(dot(v_emb, vn_w_ref[...]) + vn_b_ref[...], 0.0)    # (B, H)
    joint_repr = q_repr * v_repr                                            # (B, H)
    h1 = jnp.maximum(dot(joint_repr, c_w1_ref[...]) + c_b1_ref[...], 0.0)   # (B, 2H)
    vqa_ref[...] = (dot(h1, c_w2_ref[...]) + c_b2_ref[...]).astype(vqa_ref.dtype)  # (B, 128)
    feat = dot(joint_repr, gf_w_ref[...]) + gf_b_ref[...]                   # (B, EMB)

    # ---------- generator: LSTM over [feat, emb(gt[:, :L-1])] + fused vocab projection ----------
    gtx = gtx_ref[...]                                                       # ((L-1)*B, EMB)
    gix = [dot(gtx, l_wih_ref[g]) + l_bih_ref[g] for g in range(4)]          # hoisted, ((L-1)*B, H)
    gi0 = [dot(feat, l_wih_ref[g]) + l_bih_ref[g] for g in range(4)]         # step-0 input, (B, H)

    hh = jnp.zeros((batch, hid), f32)
    cc = jnp.zeros((batch, hid), f32)
    for t in range(max_len):                                   # fully unrolled (L is small)
        if t == 0:
            gx = gi0
        else:
            lo = (t - 1) * batch
            gx = [g[lo:lo + batch] for g in gix]
        gh = [dot(hh, l_whh_ref[g]) + l_bhh_ref[g] for g in range(4)]
        i_g = jax.nn.sigmoid(gx[0] + gh[0])
        f_g = jax.nn.sigmoid(gx[1] + gh[1])
        g_g = jnp.tanh(gx[2] + gh[2])
        o_g = jax.nn.sigmoid(gx[3] + gh[3])
        cc = f_g * cc + i_g * g_g
        hh = o_g * jnp.tanh(cc)
        # fused vocab projection, lane-dense (128) store per step
        vqe_ref[t] = (dot(hh, go_w_ref[...]) + go_b_ref[...]).astype(vqe_ref.dtype)


# ================= parameter init (deterministic, synthetic) =================

def init_params(key):
    ks = jax.random.split(key, 32)
    n = lambda i, shape: (0.1 * jax.random.normal(ks[i], shape)).astype(jnp.float32)
    pad_cols = lambda w, width: jnp.pad(w, ((0, 0), (0, width - w.shape[-1])))
    params = {
        "w_emb": n(0, (NTOKEN, EMB)),
        # GRU weights: gates stacked on the leading axis (PyTorch order r, z, n)
        "gru_wih": n(1, (3, EMB, H)), "gru_whh": n(2, (3, H, H)),
        "gru_bih": n(3, (3, 1, H)), "gru_bhh": n(4, (3, 1, H)),
        # NewAttention
        "att_wv": n(5, (DV, H)), "att_bv": n(6, (1, H)),
        "att_wq": n(7, (H, H)), "att_bq": n(8, (1, H)),
        "att_wl": n(9, (H, 1)), "att_bl": n(10, (1, 1)),
        # FCNets
        "q_net_w": n(11, (H, H)), "q_net_b": n(12, (1, H)),
        "v_net_w": n(13, (DV, H)), "v_net_b": n(14, (1, H)),
        # classifier (second layer zero-padded to 128 lanes; wrapper slices back)
        "cls_w1": n(15, (H, 2 * H)), "cls_b1": n(16, (1, 2 * H)),
        "cls_w2": pad_cols(n(17, (2 * H, NUM_ANS)), PAD_ANS),
        "cls_b2": pad_cols(n(18, (1, NUM_ANS)), PAD_ANS),
        # generator
        "gen_emb": n(19, (NTOKEN, EMB)),
        "gen_feat_w": n(20, (H, EMB)), "gen_feat_b": n(21, (1, EMB)),
        # LSTM weights: gates stacked on the leading axis (PyTorch order i, f, g, o)
        "lstm_wih": n(22, (4, EMB, H)), "lstm_whh": n(23, (4, H, H)),
        "lstm_bih": n(24, (4, 1, H)), "lstm_bhh": n(25, (4, 1, H)),
        # vocab projection zero-padded to 128 lanes; wrapper slices back
        "gen_out_w": pad_cols(n(26, (H, NTOKEN)), PAD_VOCAB),
        "gen_out_b": pad_cols(n(27, (1, NTOKEN)), PAD_VOCAB),
    }
    return params


# ================= VQAE forward =================

def vqae_forward(params, v, q, gt, lengths, max_len):
    # TODO(synk): pack_padded_sequence(lengths) packing is not replicated; full max_len
    #             per-step logits are returned (lengths only affect loss masking).
    del lengths
    b_, t_ = q.shape
    k_, dv = v.shape[1], v.shape[2]

    # Embedding gathers (XLA glue) + free layout plumbing into time-major 2D slabs so the
    # kernel can do one input-to-hidden matmul per gate for all timesteps.
    w_emb = params["w_emb"][q]                                        # (B, T, EMB)
    qx = jnp.transpose(w_emb, (1, 0, 2)).reshape(t_ * b_, -1)         # (T*B, EMB)
    gt_emb = params["gen_emb"][gt[:, :max_len - 1]]                   # (B, L-1, EMB)
    gtx = jnp.transpose(gt_emb, (1, 0, 2)).reshape((max_len - 1) * b_, -1)
    v2d = v.reshape(b_ * k_, dv)                                      # (B*K, DV)

    p = params
    vqa_pad, vqe_pad = pl.pallas_call(
        functools.partial(_vqae_kernel, batch=b_, t_steps=t_, max_len=max_len,
                          n_regions=k_, hid=H),
        out_shape=(jax.ShapeDtypeStruct((b_, PAD_ANS), jnp.float32),
                   jax.ShapeDtypeStruct((max_len, b_, PAD_VOCAB), jnp.float32)),
    )(qx, v2d, gtx,
      p["gru_wih"], p["gru_whh"], p["gru_bih"], p["gru_bhh"],
      p["att_wv"], p["att_bv"], p["att_wq"], p["att_bq"], p["att_wl"], p["att_bl"],
      p["q_net_w"], p["q_net_b"], p["v_net_w"], p["v_net_b"],
      p["cls_w1"], p["cls_b1"], p["cls_w2"], p["cls_b2"],
      p["gen_feat_w"], p["gen_feat_b"],
      p["lstm_wih"], p["lstm_whh"], p["lstm_bih"], p["lstm_bhh"],
      p["gen_out_w"], p["gen_out_b"])

    vqa_logits = vqa_pad[:, :NUM_ANS]                                  # (B, NUM_ANS)
    vqe_logits = jnp.transpose(vqe_pad, (1, 0, 2))[:, :, :NTOKEN]      # (B, L, NTOKEN)
    return vqa_logits, vqe_logits


# ================= main =================

if __name__ == "__main__":
    key = jax.random.PRNGKey(0)
    k_param, k_v, k_q, k_gt = jax.random.split(key, 4)

    params = init_params(k_param)

    v = jax.random.normal(k_v, (B, K, DV), dtype=jnp.float32)
    q = jax.random.randint(k_q, (B, T), 0, NTOKEN, dtype=jnp.int32)
    gt = jax.random.randint(k_gt, (B, MAX_LEN), 0, NTOKEN, dtype=jnp.int32)
    lengths = jnp.array([MAX_LEN, MAX_LEN - 2], dtype=jnp.int32)

    fwd = jax.jit(functools.partial(vqae_forward, max_len=MAX_LEN))
    vqa_logits, vqe_logits = fwd(params, v, q, gt, lengths)
    jax.block_until_ready((vqa_logits, vqe_logits))

    assert vqa_logits.shape == (B, NUM_ANS)
    assert vqe_logits.shape == (B, MAX_LEN, NTOKEN)
    assert bool(jnp.all(jnp.isfinite(vqa_logits))) and bool(jnp.all(jnp.isfinite(vqe_logits)))
    print("KERNEL_OK")
</pallas_src>

<mosaic_0001>
module attributes {stable_mosaic.version = 11 : i64} {
  func.func @_vqae_kernel(%arg0: memref<16x16xf32, #tpu.memory_space<vmem>>, %arg1: memref<16x32xf32, #tpu.memory_space<vmem>>, %arg2: memref<10x16xf32, #tpu.memory_space<vmem>>, %arg3: memref<3x16x32xf32, #tpu.memory_space<vmem>>, %arg4: memref<3x32x32xf32, #tpu.memory_space<vmem>>, %arg5: memref<3x1x32xf32, #tpu.memory_space<vmem>>, %arg6: memref<3x1x32xf32, #tpu.memory_space<vmem>>, %arg7: memref<32x32xf32, #tpu.memory_space<vmem>>, %arg8: memref<1x32xf32, #tpu.memory_space<vmem>>, %arg9: memref<32x32xf32, #tpu.memory_space<vmem>>, %arg10: memref<1x32xf32, #tpu.memory_space<vmem>>, %arg11: memref<32x1xf32, #tpu.memory_space<vmem>>, %arg12: memref<1x1xf32, #tpu.memory_space<vmem>>, %arg13: memref<32x32xf32, #tpu.memory_space<vmem>>, %arg14: memref<1x32xf32, #tpu.memory_space<vmem>>, %arg15: memref<32x32xf32, #tpu.memory_space<vmem>>, %arg16: memref<1x32xf32, #tpu.memory_space<vmem>>, %arg17: memref<32x64xf32, #tpu.memory_space<vmem>>, %arg18: memref<1x64xf32, #tpu.memory_space<vmem>>, %arg19: memref<64x128xf32, #tpu.memory_space<vmem>>, %arg20: memref<1x128xf32, #tpu.memory_space<vmem>>, %arg21: memref<32x16xf32, #tpu.memory_space<vmem>>, %arg22: memref<1x16xf32, #tpu.memory_space<vmem>>, %arg23: memref<4x16x32xf32, #tpu.memory_space<vmem>>, %arg24: memref<4x32x32xf32, #tpu.memory_space<vmem>>, %arg25: memref<4x1x32xf32, #tpu.memory_space<vmem>>, %arg26: memref<4x1x32xf32, #tpu.memory_space<vmem>>, %arg27: memref<32x128xf32, #tpu.memory_space<vmem>>, %arg28: memref<1x128xf32, #tpu.memory_space<vmem>>, %arg29: memref<2x128xf32, #tpu.memory_space<vmem>>, %arg30: memref<6x2x128xf32, #tpu.memory_space<vmem>>) attributes {dimension_semantics = [], scalar_prefetch = 0 : i64, scratch_operands = 0 : i64, tpu.core_type = #tpu.core_type<tc>} {
    %c0 = arith.constant 0 : index
    %c0_0 = arith.constant 0 : index
    %0 = vector.load %arg0[%c0, %c0_0] : memref<16x16xf32, #tpu.memory_space<vmem>>, vector<16x16xf32>
    %c0_1 = arith.constant 0 : index
    %c0_2 = arith.constant 0 : index
    %c0_3 = arith.constant 0 : index
    %1 = vector.load %arg3[%c0_1, %c0_2, %c0_3] : memref<3x16x32xf32, #tpu.memory_space<vmem>>, vector<1x16x32xf32>
    %2 = vector.shape_cast %1 : vector<1x16x32xf32> to vector<16x32xf32>
    %cst = arith.constant dense<0.000000e+00> : vector<16x32xf32>
    %3 = tpu.matmul %0, %2, %cst {dimension_numbers = #tpu.dot_dimension_numbers<[1], [0], [0], [1], [0, 0, 1, 1], [], []>} : vector<16x16xf32>, vector<16x32xf32>, vector<16x32xf32> -> vector<16x32xf32>
    %c0_4 = arith.constant 0 : index
    %c0_5 = arith.constant 0 : index
    %c0_6 = arith.constant 0 : index
    %4 = vector.load %arg5[%c0_4, %c0_5, %c0_6] : memref<3x1x32xf32, #tpu.memory_space<vmem>>, vector<1x1x32xf32>
    %5 = vector.shape_cast %4 : vector<1x1x32xf32> to vector<1x32xf32>
    %6 = vector.broadcast %5 : vector<1x32xf32> to vector<16x32xf32>
    %7 = arith.addf %3, %6 : vector<16x32xf32>
    %c1 = arith.constant 1 : index
    %c0_7 = arith.constant 0 : index
    %c0_8 = arith.constant 0 : index
    %8 = vector.load %arg3[%c1, %c0_7, %c0_8] : memref<3x16x32xf32, #tpu.memory_space<vmem>>, vector<1x16x32xf32>
    %9 = vector.shape_cast %8 : vector<1x16x32xf32> to vector<16x32xf32>
    %cst_9 = arith.constant dense<0.000000e+00> : vector<16x32xf32>
    %10 = tpu.matmul %0, %9, %cst_9 {dimension_numbers = #tpu.dot_dimension_numbers<[1], [0], [0], [1], [0, 0, 1, 1], [], []>} : vector<16x16xf32>, vector<16x32xf32>, vector<16x32xf32> -> vector<16x32xf32>
    %c1_10 = arith.constant 1 : index
    %c0_11 = arith.constant 0 : index
    %c0_12 = arith.constant 0 : index
    %11 = vector.load %arg5[%c1_10, %c0_11, %c0_12] : memref<3x1x32xf32, #tpu.memory_space<vmem>>, vector<1x1x32xf32>
    %12 = vector.shape_cast %11 : vector<1x1x32xf32> to vector<1x32xf32>
    %13 = vector.broadcast %12 : vector<1x32xf32> to vector<16x32xf32>
    %14 = arith.addf %10, %13 : vector<16x32xf32>
    %c2 = arith.constant 2 : index
    %c0_13 = arith.constant 0 : index
    %c0_14 = arith.constant 0 : index
    %15 = vector.load %arg3[%c2, %c0_13, %c0_14] : memref<3x16x32xf32, #tpu.memory_space<vmem>>, vector<1x16x32xf32>
    %16 = vector.shape_cast %15 : vector<1x16x32xf32> to vector<16x32xf32>
    %cst_15 = arith.constant dense<0.000000e+00> : vector<16x32xf32>
    %17 = tpu.matmul %0, %16, %cst_15 {dimension_numbers = #tpu.dot_dimension_numbers<[1], [0], [0], [1], [0, 0, 1, 1], [], []>} : vector<16x16xf32>, vector<16x32xf32>, vector<16x32xf32> -> vector<16x32xf32>
    %c2_16 = arith.constant 2 : index
    %c0_17 = arith.constant 0 : index
    %c0_18 = arith.constant 0 : index
    %18 = vector.load %arg5[%c2_16, %c0_17, %c0_18] : memref<3x1x32xf32, #tpu.memory_space<vmem>>, vector<1x1x32xf32>
    %19 = vector.shape_cast %18 : vector<1x1x32xf32> to vector<1x32xf32>
    %20 = vector.broadcast %19 : vector<1x32xf32> to vector<16x32xf32>
    %21 = arith.addf %17, %20 : vector<16x32xf32>
    %cst_19 = arith.constant 0.000000e+00 : f32
    %22 = vector.broadcast %cst_19 : f32 to vector<2x32xf32>
    %c0_20 = arith.constant 0 : index
    %c0_21 = arith.constant 0 : index
    %c0_22 = arith.constant 0 : index
    %23 = vector.load %arg4[%c0_20, %c0_21, %c0_22] : memref<3x32x32xf32, #tpu.memory_space<vmem>>, vector<1x32x32xf32>
    %24 = vector.shape_cast %23 : vector<1x32x32xf32> to vector<32x32xf32>
    %cst_23 = arith.constant dense<0.000000e+00> : vector<2x32xf32>
    %25 = tpu.matmul %22, %24, %cst_23 {dimension_numbers = #tpu.dot_dimension_numbers<[1], [0], [0], [1], [0, 0, 1, 1], [], []>} : vector<2x32xf32>, vector<32x32xf32>, vector<2x32xf32> -> vector<2x32xf32>
    %c0_24 = arith.constant 0 : index
    %c0_25 = arith.constant 0 : index
    %c0_26 = arith.constant 0 : index
    %26 = vector.load %arg6[%c0_24, %c0_25, %c0_26] : memref<3x1x32xf32, #tpu.memory_space<vmem>>, vector<1x1x32xf32>
    %27 = vector.shape_cast %26 : vector<1x1x32xf32> to vector<1x32xf32>
    %28 = vector.broadcast %27 : vector<1x32xf32> to vector<2x32xf32>
    %29 = arith.addf %25, %28 : vector<2x32xf32>
    %c1_27 = arith.constant 1 : index
    %c0_28 = arith.constant 0 : index
    %c0_29 = arith.constant 0 : index
    %30 = vector.load %arg4[%c1_27, %c0_28, %c0_29] : memref<3x32x32xf32, #tpu.memory_space<vmem>>, vector<1x32x32xf32>
    %31 = vector.shape_cast %30 : vector<1x32x32xf32> to vector<32x32xf32>
    %cst_30 = arith.constant dense<0.000000e+00> : vector<2x32xf32>
    %32 = tpu.matmul %22, %31, %cst_30 {dimension_numbers = #tpu.dot_dimension_numbers<[1], [0], [0], [1], [0, 0, 1, 1], [], []>} : vector<2x32xf32>, vector<32x32xf32>, vector<2x32xf32> -> vector<2x32xf32>
    %c1_31 = arith.constant 1 : index
    %c0_32 = arith.constant 0 : index
    %c0_33 = arith.constant 0 : index
    %33 = vector.load %arg6[%c1_31, %c0_32, %c0_33] : memref<3x1x32xf32, #tpu.memory_space<vmem>>, vector<1x1x32xf32>
    %34 = vector.shape_cast %33 : vector<1x1x32xf32> to vector<1x32xf32>
    %35 = vector.broadcast %34 : vector<1x32xf32> to vector<2x32xf32>
    %36 = arith.addf %32, %35 : vector<2x32xf32>
    %c2_34 = arith.constant 2 : index
    %c0_35 = arith.constant 0 : index
    %c0_36 = arith.constant 0 : index
    %37 = vector.load %arg4[%c2_34, %c0_35, %c0_36] : memref<3x32x32xf32, #tpu.memory_space<vmem>>, vector<1x32x32xf32>
    %38 = vector.shape_cast %37 : vector<1x32x32xf32> to vector<32x32xf32>
    %cst_37 = arith.constant dense<0.000000e+00> : vector<2x32xf32>
    %39 = tpu.matmul %22, %38, %cst_37 {dimension_numbers = #tpu.dot_dimension_numbers<[1], [0], [0], [1], [0, 0, 1, 1], [], []>} : vector<2x32xf32>, vector<32x32xf32>, vector<2x32xf32> -> vector<2x32xf32>
    %c2_38 = arith.constant 2 : index
    %c0_39 = arith.constant 0 : index
    %c0_40 = arith.constant 0 : index
    %40 = vector.load %arg6[%c2_38, %c0_39, %c0_40] : memref<3x1x32xf32, #tpu.memory_space<vmem>>, vector<1x1x32xf32>
    %41 = vector.shape_cast %40 : vector<1x1x32xf32> to vector<1x32xf32>
    %42 = vector.broadcast %41 : vector<1x32xf32> to vector<2x32xf32>
    %43 = arith.addf %39, %42 : vector<2x32xf32>
    %44 = vector.extract_strided_slice %7 {offsets = [0, 0], sizes = [2, 32], strides = [1, 1]} : vector<16x32xf32> to vector<2x32xf32>
    %45 = arith.addf %44, %29 : vector<2x32xf32>
    %46 = arith.negf %45 : vector<2x32xf32>
    %47 = math.exp %46 : vector<2x32xf32>
    %cst_41 = arith.constant 1.000000e+00 : f32
    %48 = vector.broadcast %cst_41 : f32 to vector<2x32xf32>
    %49 = arith.addf %48, %47 : vector<2x32xf32>
    %50 = arith.divf %48, %49 : vector<2x32xf32>
    %51 = vector.extract_strided_slice %14 {offsets = [0, 0], sizes = [2, 32], strides = [1, 1]} : vector<16x32xf32> to vector<2x32xf32>
    %52 = arith.addf %51, %36 : vector<2x32xf32>
    %53 = arith.negf %52 : vector<2x32xf32>
    %54 = math.exp %53 : vector<2x32xf32>
    %cst_42 = arith.constant 1.000000e+00 : f32
    %55 = vector.broadcast %cst_42 : f32 to vector<2x32xf32>
    %56 = arith.addf %55, %54 : vector<2x32xf32>
    %57 = arith.divf %55, %56 : vector<2x32xf32>
    %58 = vector.extract_strided_slice %21 {offsets = [0, 0], sizes = [2, 32], strides = [1, 1]} : vector<16x32xf32> to vector<2x32xf32>
    %59 = arith.mulf %50, %43 : vector<2x32xf32>
    %60 = arith.addf %58, %59 : vector<2x32xf32>
    %61 = math.tanh %60 : vector<2x32xf32>
    %cst_43 = arith.constant 1.000000e+00 : f32
    %62 = vector.broadcast %cst_43 : f32 to vector<2x32xf32>
    %63 = arith.subf %62, %57 : vector<2x32xf32>
    %64 = arith.mulf %63, %61 : vector<2x32xf32>
    %65 = arith.mulf %57, %22 : vector<2x32xf32>
    %66 = arith.addf %64, %65 : vector<2x32xf32>
    %c0_44 = arith.constant 0 : index
    %c0_45 = arith.constant 0 : index
    %c0_46 = arith.constant 0 : index
    %67 = vector.load %arg4[%c0_44, %c0_45, %c0_46] : memref<3x32x32xf32, #tpu.memory_space<vmem>>, vector<1x32x32xf32>
    %68 = vector.shape_cast %67 : vector<1x32x32xf32> to vector<32x32xf32>
    %cst_47 = arith.constant dense<0.000000e+00> : vector<2x32xf32>
    %69 = tpu.matmul %66, %68, %cst_47 {dimension_numbers = #tpu.dot_dimension_numbers<[1], [0], [0], [1], [0, 0, 1, 1], [], []>} : vector<2x32xf32>, vector<32x32xf32>, vector<2x32xf32> -> vector<2x32xf32>
    %c0_48 = arith.constant 0 : index
    %c0_49 = arith.constant 0 : index
    %c0_50 = arith.constant 0 : index
    %70 = vector.load %arg6[%c0_48, %c0_49, %c0_50] : memref<3x1x32xf32, #tpu.memory_space<vmem>>, vector<1x1x32xf32>
    %71 = vector.shape_cast %70 : vector<1x1x32xf32> to vector<1x32xf32>
    %72 = vector.broadcast %71 : vector<1x32xf32> to vector<2x32xf32>
    %73 = arith.addf %69, %72 : vector<2x32xf32>
    %c1_51 = arith.constant 1 : index
    %c0_52 = arith.constant 0 : index
    %c0_53 = arith.constant 0 : index
    %74 = vector.load %arg4[%c1_51, %c0_52, %c0_53] : memref<3x32x32xf32, #tpu.memory_space<vmem>>, vector<1x32x32xf32>
    %75 = vector.shape_cast %74 : vector<1x32x32xf32> to vector<32x32xf32>
    %cst_54 = arith.constant dense<0.000000e+00> : vector<2x32xf32>
    %76 = tpu.matmul %66, %75, %cst_54 {dimension_numbers = #tpu.dot_dimension_numbers<[1], [0], [0], [1], [0, 0, 1, 1], [], []>} : vector<2x32xf32>, vector<32x32xf32>, vector<2x32xf32> -> vector<2x32xf32>
    %c1_55 = arith.constant 1 : index
    %c0_56 = arith.constant 0 : index
    %c0_57 = arith.constant 0 : index
    %77 = vector.load %arg6[%c1_55, %c0_56, %c0_57] : memref<3x1x32xf32, #tpu.memory_space<vmem>>, vector<1x1x32xf32>
    %78 = vector.shape_cast %77 : vector<1x1x32xf32> to vector<1x32xf32>
    %79 = vector.broadcast %78 : vector<1x32xf32> to vector<2x32xf32>
    %80 = arith.addf %76, %79 : vector<2x32xf32>
    %c2_58 = arith.constant 2 : index
    %c0_59 = arith.constant 0 : index
    %c0_60 = arith.constant 0 : index
    %81 = vector.load %arg4[%c2_58, %c0_59, %c0_60] : memref<3x32x32xf32, #tpu.memory_space<vmem>>, vector<1x32x32xf32>
    %82 = vector.shape_cast %81 : vector<1x32x32xf32> to vector<32x32xf32>
    %cst_61 = arith.constant dense<0.000000e+00> : vector<2x32xf32>
    %83 = tpu.matmul %66, %82, %cst_61 {dimension_numbers = #tpu.dot_dimension_numbers<[1], [0], [0], [1], [0, 0, 1, 1], [], []>} : vector<2x32xf32>, vector<32x32xf32>, vector<2x32xf32> -> vector<2x32xf32>
    %c2_62 = arith.constant 2 : index
    %c0_63 = arith.constant 0 : index
    %c0_64 = arith.constant 0 : index
    %84 = vector.load %arg6[%c2_62, %c0_63, %c0_64] : memref<3x1x32xf32, #tpu.memory_space<vmem>>, vector<1x1x32xf32>
    %85 = vector.shape_cast %84 : vector<1x1x32xf32> to vector<1x32xf32>
    %86 = vector.broadcast %85 : vector<1x32xf32> to vector<2x32xf32>
    %87 = arith.addf %83, %86 : vector<2x32xf32>
    %88 = vector.extract_strided_slice %7 {offsets = [2, 0], sizes = [2, 32], strides = [1, 1]} : vector<16x32xf32> to vector<2x32xf32>
    %89 = arith.addf %88, %73 : vector<2x32xf32>
    %90 = arith.negf %89 : vector<2x32xf32>
    %91 = math.exp %90 : vector<2x32xf32>
    %cst_65 = arith.constant 1.000000e+00 : f32
    %92 = vector.broadcast %cst_65 : f32 to vector<2x32xf32>
    %93 = arith.addf %92, %91 : vector<2x32xf32>
    %94 = arith.divf %92, %93 : vector<2x32xf32>
    %95 = vector.extract_strided_slice %14 {offsets = [2, 0], sizes = [2, 32], strides = [1, 1]} : vector<16x32xf32> to vector<2x32xf32>
    %96 = arith.addf %95, %80 : vector<2x32xf32>
    %97 = arith.negf %96 : vector<2x32xf32>
    %98 = math.exp %97 : vector<2x32xf32>
    %cst_66 = arith.constant 1.000000e+00 : f32
    %99 = vector.broadcast %cst_66 : f32 to vector<2x32xf32>
    %100 = arith.addf %99, %98 : vector<2x32xf32>
    %101 = arith.divf %99, %100 : vector<2x32xf32>
    %102 = vector.extract_strided_slice %21 {offsets = [2, 0], sizes = [2, 32], strides = [1, 1]} : vector<16x32xf32> to vector<2x32xf32>
    %103 = arith.mulf %94, %87 : vector<2x32xf32>
    %104 = arith.addf %102, %103 : vector<2x32xf32>
    %105 = math.tanh %104 : vector<2x32xf32>
    %cst_67 = arith.constant 1.000000e+00 : f32
    %106 = vector.broadcast %cst_67 : f32 to vector<2x32xf32>
    %107 = arith.subf %106, %101 : vector<2x32xf32>
    %108 = arith.mulf %107, %105 : vector<2x32xf32>
    %109 = arith.mulf %101, %66 : vector<2x32xf32>
    %110 = arith.addf %108, %109 : vector<2x32xf32>
    %c0_68 = arith.constant 0 : index
    %c0_69 = arith.constant 0 : index
    %c0_70 = arith.constant 0 : index
    %111 = vector.load %arg4[%c0_68, %c0_69, %c0_70] : memref<3x32x32xf32, #tpu.memory_space<vmem>>, vector<1x32x32xf32>
    %112 = vector.shape_cast %111 : vector<1x32x32xf32> to vector<32x32xf32>
    %cst_71 = arith.constant dense<0.000000e+00> : vector<2x32xf32>
    %113 = tpu.matmul %110, %112, %cst_71 {dimension_numbers = #tpu.dot_dimension_numbers<[1], [0], [0], [1], [0, 0, 1, 1], [], []>} : vector<2x32xf32>, vector<32x32xf32>, vector<2x32xf32> -> vector<2x32xf32>
    %c0_72 = arith.constant 0 : index
    %c0_73 = arith.constant 0 : index
    %c0_74 = arith.constant 0 : index
    %114 = vector.load %arg6[%c0_72, %c0_73, %c0_74] : memref<3x1x32xf32, #tpu.memory_space<vmem>>, vector<1x1x32xf32>
    %115 = vector.shape_cast %114 : vector<1x1x32xf32> to vector<1x32xf32>
    %116 = vector.broadcast %115 : vector<1x32xf32> to vector<2x32xf32>
    %117 = arith.addf %113, %116 : vector<2x32xf32>
    %c1_75 = arith.constant 1 : index
    %c0_76 = arith.constant 0 : index
    %c0_77 = arith.constant 0 : index
    %118 = vector.load %arg4[%c1_75, %c0_76, %c0_77] : memref<3x32x32xf32, #tpu.memory_space<vmem>>, vector<1x32x32xf32>
    %119 = vector.shape_cast %118 : vector<1x32x32xf32> to vector<32x32xf32>
    %cst_78 = arith.constant dense<0.000000e+00> : vector<2x32xf32>
    %120 = tpu.matmul %110, %119, %cst_78 {dimension_numbers = #tpu.dot_dimension_numbers<[1], [0], [0], [1], [0, 0, 1, 1], [], []>} : vector<2x32xf32>, vector<32x32xf32>, vector<2x32xf32> -> vector<2x32xf32>
    %c1_79 = arith.constant 1 : index
    %c0_80 = arith.constant 0 : index
    %c0_81 = arith.constant 0 : index
    %121 = vector.load %arg6[%c1_79, %c0_80, %c0_81] : memref<3x1x32xf32, #tpu.memory_space<vmem>>, vector<1x1x32xf32>
    %122 = vector.shape_cast %121 : vector<1x1x32xf32> to vector<1x32xf32>
    %123 = vector.broadcast %122 : vector<1x32xf32> to vector<2x32xf32>
    %124 = arith.addf %120, %123 : vector<2x32xf32>
    %c2_82 = arith.constant 2 : index
    %c0_83 = arith.constant 0 : index
    %c0_84 = arith.constant 0 : index
    %125 = vector.load %arg4[%c2_82, %c0_83, %c0_84] : memref<3x32x32xf32, #tpu.memory_space<vmem>>, vector<1x32x32xf32>
    %126 = vector.shape_cast %125 : vector<1x32x32xf32> to vector<32x32xf32>
    %cst_85 = arith.constant dense<0.000000e+00> : vector<2x32xf32>
    %127 = tpu.matmul %110, %126, %cst_85 {dimension_numbers = #tpu.dot_dimension_numbers<[1], [0], [0], [1], [0, 0, 1, 1], [], []>} : vector<2x32xf32>, vector<32x32xf32>, vector<2x32xf32> -> vector<2x32xf32>
    %c2_86 = arith.constant 2 : index
    %c0_87 = arith.constant 0 : index
    %c0_88 = arith.constant 0 : index
    %128 = vector.load %arg6[%c2_86, %c0_87, %c0_88] : memref<3x1x32xf32, #tpu.memory_space<vmem>>, vector<1x1x32xf32>
    %129 = vector.shape_cast %128 : vector<1x1x32xf32> to vector<1x32xf32>
    %130 = vector.broadcast %129 : vector<1x32xf32> to vector<2x32xf32>
    %131 = arith.addf %127, %130 : vector<2x32xf32>
    %132 = vector.extract_strided_slice %7 {offsets = [4, 0], sizes = [2, 32], strides = [1, 1]} : vector<16x32xf32> to vector<2x32xf32>
    %133 = arith.addf %132, %117 : vector<2x32xf32>
    %134 = arith.negf %133 : vector<2x32xf32>
    %135 = math.exp %134 : vector<2x32xf32>
    %cst_89 = arith.constant 1.000000e+00 : f32
    %136 = vector.broadcast %cst_89 : f32 to vector<2x32xf32>
    %137 = arith.addf %136, %135 : vector<2x32xf32>
    %138 = arith.divf %136, %137 : vector<2x32xf32>
    %139 = vector.extract_strided_slice %14 {offsets = [4, 0], sizes = [2, 32], strides = [1, 1]} : vector<16x32xf32> to vector<2x32xf32>
    %140 = arith.addf %139, %124 : vector<2x32xf32>
    %141 = arith.negf %140 : vector<2x32xf32>
    %142 = math.exp %141 : vector<2x32xf32>
    %cst_90 = arith.constant 1.000000e+00 : f32
    %143 = vector.broadcast %cst_90 : f32 to vector<2x32xf32>
    %144 = arith.addf %143, %142 : vector<2x32xf32>
    %145 = arith.divf %143, %144 : vector<2x32xf32>
    %146 = vector.extract_strided_slice %21 {offsets = [4, 0], sizes = [2, 32], strides = [1, 1]} : vector<16x32xf32> to vector<2x32xf32>
    %147 = arith.mulf %138, %131 : vector<2x32xf32>
    %148 = arith.addf %146, %147 : vector<2x32xf32>
    %149 = math.tanh %148 : vector<2x32xf32>
    %cst_91 = arith.constant 1.000000e+00 : f32
    %150 = vector.broadcast %cst_91 : f32 to vector<2x32xf32>
    %151 = arith.subf %150, %145 : vector<2x32xf32>
    %152 = arith.mulf %151, %149 : vector<2x32xf32>
    %153 = arith.mulf %145, %110 : vector<2x32xf32>
    %154 = arith.addf %152, %153 : vector<2x32xf32>
    %c0_92 = arith.constant 0 : index
    %c0_93 = arith.constant 0 : index
    %c0_94 = arith.constant 0 : index
    %155 = vector.load %arg4[%c0_92, %c0_93, %c0_94] : memref<3x32x32xf32, #tpu.memory_space<vmem>>, vector<1x32x32xf32>
    %156 = vector.shape_cast %155 : vector<1x32x32xf32> to vector<32x32xf32>
    %cst_95 = arith.constant dense<0.000000e+00> : vector<2x32xf32>
    %157 = tpu.matmul %154, %156, %cst_95 {dimension_numbers = #tpu.dot_dimension_numbers<[1], [0], [0], [1], [0, 0, 1, 1], [], []>} : vector<2x32xf32>, vector<32x32xf32>, vector<2x32xf32> -> vector<2x32xf32>
    %c0_96 = arith.constant 0 : index
    %c0_97 = arith.constant 0 : index
    %c0_98 = arith.constant 0 : index
    %158 = vector.load %arg6[%c0_96, %c0_97, %c0_98] : memref<3x1x32xf32, #tpu.memory_space<vmem>>, vector<1x1x32xf32>
    %159 = vector.shape_cast %158 : vector<1x1x32xf32> to vector<1x32xf32>
    %160 = vector.broadcast %159 : vector<1x32xf32> to vector<2x32xf32>
    %161 = arith.addf %157, %160 : vector<2x32xf32>
    %c1_99 = arith.constant 1 : index
    %c0_100 = arith.constant 0 : index
    %c0_101 = arith.constant 0 : index
    %162 = vector.load %arg4[%c1_99, %c0_100, %c0_101] : memref<3x32x32xf32, #tpu.memory_space<vmem>>, vector<1x32x32xf32>
    %163 = vector.shape_cast %162 : vector<1x32x32xf32> to vector<32x32xf32>
    %cst_102 = arith.constant dense<0.000000e+00> : vector<2x32xf32>
    %164 = tpu.matmul %154, %163, %cst_102 {dimension_numbers = #tpu.dot_dimension_numbers<[1], [0], [0], [1], [0, 0, 1, 1], [], []>} : vector<2x32xf32>, vector<32x32xf32>, vector<2x32xf32> -> vector<2x32xf32>
    %c1_103 = arith.constant 1 : index
    %c0_104 = arith.constant 0 : index
    %c0_105 = arith.constant 0 : index
    %165 = vector.load %arg6[%c1_103, %c0_104, %c0_105] : memref<3x1x32xf32, #tpu.memory_space<vmem>>, vector<1x1x32xf32>
    %166 = vector.shape_cast %165 : vector<1x1x32xf32> to vector<1x32xf32>
    %167 = vector.broadcast %166 : vector<1x32xf32> to vector<2x32xf32>
    %168 = arith.addf %164, %167 : vector<2x32xf32>
    %c2_106 = arith.constant 2 : index
    %c0_107 = arith.constant 0 : index
    %c0_108 = arith.constant 0 : index
    %169 = vector.load %arg4[%c2_106, %c0_107, %c0_108] : memref<3x32x32xf32, #tpu.memory_space<vmem>>, vector<1x32x32xf32>
    %170 = vector.shape_cast %169 : vector<1x32x32xf32> to vector<32x32xf32>
    %cst_109 = arith.constant dense<0.000000e+00> : vector<2x32xf32>
    %171 = tpu.matmul %154, %170, %cst_109 {dimension_numbers = #tpu.dot_dimension_numbers<[1], [0], [0], [1], [0, 0, 1, 1], [], []>} : vector<2x32xf32>, vector<32x32xf32>, vector<2x32xf32> -> vector<2x32xf32>
    %c2_110 = arith.constant 2 : index
    %c0_111 = arith.constant 0 : index
    %c0_112 = arith.constant 0 : index
    %172 = vector.load %arg6[%c2_110, %c0_111, %c0_112] : memref<3x1x32xf32, #tpu.memory_space<vmem>>, vector<1x1x32xf32>
    %173 = vector.shape_cast %172 : vector<1x1x32xf32> to vector<1x32xf32>
    %174 = vector.broadcast %173 : vector<1x32xf32> to vector<2x32xf32>
    %175 = arith.addf %171, %174 : vector<2x32xf32>
    %176 = vector.extract_strided_slice %7 {offsets = [6, 0], sizes = [2, 32], strides = [1, 1]} : vector<16x32xf32> to vector<2x32xf32>
    %177 = arith.addf %176, %161 : vector<2x32xf32>
    %178 = arith.negf %177 : vector<2x32xf32>
    %179 = math.exp %178 : vector<2x32xf32>
    %cst_113 = arith.constant 1.000000e+00 : f32
    %180 = vector.broadcast %cst_113 : f32 to vector<2x32xf32>
    %181 = arith.addf %180, %179 : vector<2x32xf32>
    %182 = arith.divf %180, %181 : vector<2x32xf32>
    %183 = vector.extract_strided_slice %14 {offsets = [6, 0], sizes = [2, 32], strides = [1, 1]} : vector<16x32xf32> to vector<2x32xf32>
    %184 = arith.addf %183, %168 : vector<2x32xf32>
    %185 = arith.negf %184 : vector<2x32xf32>
    %186 = math.exp %185 : vector<2x32xf32>
    %cst_114 = arith.constant 1.000000e+00 : f32
    %187 = vector.broadcast %cst_114 : f32 to vector<2x32xf32>
    %188 = arith.addf %187, %186 : vector<2x32xf32>
    %189 = arith.divf %187, %188 : vector<2x32xf32>
    %190 = vector.extract_strided_slice %21 {offsets = [6, 0], sizes = [2, 32], strides = [1, 1]} : vector<16x32xf32> to vector<2x32xf32>
    %191 = arith.mulf %182, %175 : vector<2x32xf32>
    %192 = arith.addf %190, %191 : vector<2x32xf32>
    %193 = math.tanh %192 : vector<2x32xf32>
    %cst_115 = arith.constant 1.000000e+00 : f32
    %194 = vector.broadcast %cst_115 : f32 to vector<2x32xf32>
    %195 = arith.subf %194, %189 : vector<2x32xf32>
    %196 = arith.mulf %195, %193 : vector<2x32xf32>
    %197 = arith.mulf %189, %154 : vector<2x32xf32>
    %198 = arith.addf %196, %197 : vector<2x32xf32>
    %c0_116 = arith.constant 0 : index
    %c0_117 = arith.constant 0 : index
    %c0_118 = arith.constant 0 : index
    %199 = vector.load %arg4[%c0_116, %c0_117, %c0_118] : memref<3x32x32xf32, #tpu.memory_space<vmem>>, vector<1x32x32xf32>
    %200 = vector.shape_cast %199 : vector<1x32x32xf32> to vector<32x32xf32>
    %cst_119 = arith.constant dense<0.000000e+00> : vector<2x32xf32>
    %201 = tpu.matmul %198, %200, %cst_119 {dimension_numbers = #tpu.dot_dimension_numbers<[1], [0], [0], [1], [0, 0, 1, 1], [], []>} : vector<2x32xf32>, vector<32x32xf32>, vector<2x32xf32> -> vector<2x32xf32>
    %c0_120 = arith.constant 0 : index
    %c0_121 = arith.constant 0 : index
    %c0_122 = arith.constant 0 : index
    %202 = vector.load %arg6[%c0_120, %c0_121, %c0_122] : memref<3x1x32xf32, #tpu.memory_space<vmem>>, vector<1x1x32xf32>
    %203 = vector.shape_cast %202 : vector<1x1x32xf32> to vector<1x32xf32>
    %204 = vector.broadcast %203 : vector<1x32xf32> to vector<2x32xf32>
    %205 = arith.addf %201, %204 : vector<2x32xf32>
    %c1_123 = arith.constant 1 : index
    %c0_124 = arith.constant 0 : index
    %c0_125 = arith.constant 0 : index
    %206 = vector.load %arg4[%c1_123, %c0_124, %c0_125] : memref<3x32x32xf32, #tpu.memory_space<vmem>>, vector<1x32x32xf32>
    %207 = vector.shape_cast %206 : vector<1x32x32xf32> to vector<32x32xf32>
    %cst_126 = arith.constant dense<0.000000e+00> : vector<2x32xf32>
    %208 = tpu.matmul %198, %207, %cst_126 {dimension_numbers = #tpu.dot_dimension_numbers<[1], [0], [0], [1], [0, 0, 1, 1], [], []>} : vector<2x32xf32>, vector<32x32xf32>, vector<2x32xf32> -> vector<2x32xf32>
    %c1_127 = arith.constant 1 : index
    %c0_128 = arith.constant 0 : index
    %c0_129 = arith.constant 0 : index
    %209 = vector.load %arg6[%c1_127, %c0_128, %c0_129] : memref<3x1x32xf32, #tpu.memory_space<vmem>>, vector<1x1x32xf32>
    %210 = vector.shape_cast %209 : vector<1x1x32xf32> to vector<1x32xf32>
    %211 = vector.broadcast %210 : vector<1x32xf32> to vector<2x32xf32>
    %212 = arith.addf %208, %211 : vector<2x32xf32>
    %c2_130 = arith.constant 2 : index
    %c0_131 = arith.constant 0 : index
    %c0_132 = arith.constant 0 : index
    %213 = vector.load %arg4[%c2_130, %c0_131, %c0_132] : memref<3x32x32xf32, #tpu.memory_space<vmem>>, vector<1x32x32xf32>
    %214 = vector.shape_cast %213 : vector<1x32x32xf32> to vector<32x32xf32>
    %cst_133 = arith.constant dense<0.000000e+00> : vector<2x32xf32>
    %215 = tpu.matmul %198, %214, %cst_133 {dimension_numbers = #tpu.dot_dimension_numbers<[1], [0], [0], [1], [0, 0, 1, 1], [], []>} : vector<2x32xf32>, vector<32x32xf32>, vector<2x32xf32> -> vector<2x32xf32>
    %c2_134 = arith.constant 2 : index
    %c0_135 = arith.constant 0 : index
    %c0_136 = arith.constant 0 : index
    %216 = vector.load %arg6[%c2_134, %c0_135, %c0_136] : memref<3x1x32xf32, #tpu.memory_space<vmem>>, vector<1x1x32xf32>
    %217 = vector.shape_cast %216 : vector<1x1x32xf32> to vector<1x32xf32>
    %218 = vector.broadcast %217 : vector<1x32xf32> to vector<2x32xf32>
    %219 = arith.addf %215, %218 : vector<2x32xf32>
    %220 = vector.extract_strided_slice %7 {offsets = [8, 0], sizes = [2, 32], strides = [1, 1]} : vector<16x32xf32> to vector<2x32xf32>
    %221 = arith.addf %220, %205 : vector<2x32xf32>
    %222 = arith.negf %221 : vector<2x32xf32>
    %223 = math.exp %222 : vector<2x32xf32>
    %cst_137 = arith.constant 1.000000e+00 : f32
    %224 = vector.broadcast %cst_137 : f32 to vector<2x32xf32>
    %225 = arith.addf %224, %223 : vector<2x32xf32>
    %226 = arith.divf %224, %225 : vector<2x32xf32>
    %227 = vector.extract_strided_slice %14 {offsets = [8, 0], sizes = [2, 32], strides = [1, 1]} : vector<16x32xf32> to vector<2x32xf32>
    %228 = arith.addf %227, %212 : vector<2x32xf32>
    %229 = arith.negf %228 : vector<2x32xf32>
    %230 = math.exp %229 : vector<2x32xf32>
    %cst_138 = arith.constant 1.000000e+00 : f32
    %231 = vector.broadcast %cst_138 : f32 to vector<2x32xf32>
    %232 = arith.addf %231, %230 : vector<2x32xf32>
    %233 = arith.divf %231, %232 : vector<2x32xf32>
    %234 = vector.extract_strided_slice %21 {offsets = [8, 0], sizes = [2, 32], strides = [1, 1]} : vector<16x32xf32> to vector<2x32xf32>
    %235 = arith.mulf %226, %219 : vector<2x32xf32>
    %236 = arith.addf %234, %235 : vector<2x32xf32>
    %237 = math.tanh %236 : vector<2x32xf32>
    %cst_139 = arith.constant 1.000000e+00 : f32
    %238 = vector.broadcast %cst_139 : f32 to vector<2x32xf32>
    %239 = arith.subf %238, %233 : vector<2x32xf32>
    %240 = arith.mulf %239, %237 : vector<2x32xf32>
    %241 = arith.mulf %233, %198 : vector<2x32xf32>
    %242 = arith.addf %240, %241 : vector<2x32xf32>
    %c0_140 = arith.constant 0 : index
    %c0_141 = arith.constant 0 : index
    %c0_142 = arith.constant 0 : index
    %243 = vector.load %arg4[%c0_140, %c0_141, %c0_142] : memref<3x32x32xf32, #tpu.memory_space<vmem>>, vector<1x32x32xf32>
    %244 = vector.shape_cast %243 : vector<1x32x32xf32> to vector<32x32xf32>
    %cst_143 = arith.constant dense<0.000000e+00> : vector<2x32xf32>
    %245 = tpu.matmul %242, %244, %cst_143 {dimension_numbers = #tpu.dot_dimension_numbers<[1], [0], [0], [1], [0, 0, 1, 1], [], []>} : vector<2x32xf32>, vector<32x32xf32>, vector<2x32xf32> -> vector<2x32xf32>
    %c0_144 = arith.constant 0 : index
    %c0_145 = arith.constant 0 : index
    %c0_146 = arith.constant 0 : index
    %246 = vector.load %arg6[%c0_144, %c0_145, %c0_146] : memref<3x1x32xf32, #tpu.memory_space<vmem>>, vector<1x1x32xf32>
    %247 = vector.shape_cast %246 : vector<1x1x32xf32> to vector<1x32xf32>
    %248 = vector.broadcast %247 : vector<1x32xf32> to vector<2x32xf32>
    %249 = arith.addf %245, %248 : vector<2x32xf32>
    %c1_147 = arith.constant 1 : index
    %c0_148 = arith.constant 0 : index
    %c0_149 = arith.constant 0 : index
    %250 = vector.load %arg4[%c1_147, %c0_148, %c0_149] : memref<3x32x32xf32, #tpu.memory_space<vmem>>, vector<1x32x32xf32>
    %251 = vector.shape_cast %250 : vector<1x32x32xf32> to vector<32x32xf32>
    %cst_150 = arith.constant dense<0.000000e+00> : vector<2x32xf32>
    %252 = tpu.matmul %242, %251, %cst_150 {dimension_numbers = #tpu.dot_dimension_numbers<[1], [0], [0], [1], [0, 0, 1, 1], [], []>} : vector<2x32xf32>, vector<32x32xf32>, vector<2x32xf32> -> vector<2x32xf32>
    %c1_151 = arith.constant 1 : index
    %c0_152 = arith.constant 0 : index
    %c0_153 = arith.constant 0 : index
    %253 = vector.load %arg6[%c1_151, %c0_152, %c0_153] : memref<3x1x32xf32, #tpu.memory_space<vmem>>, vector<1x1x32xf32>
    %254 = vector.shape_cast %253 : vector<1x1x32xf32> to vector<1x32xf32>
    %255 = vector.broadcast %254 : vector<1x32xf32> to vector<2x32xf32>
    %256 = arith.addf %252, %255 : vector<2x32xf32>
    %c2_154 = arith.constant 2 : index
    %c0_155 = arith.constant 0 : index
    %c0_156 = arith.constant 0 : index
    %257 = vector.load %arg4[%c2_154, %c0_155, %c0_156] : memref<3x32x32xf32, #tpu.memory_space<vmem>>, vector<1x32x32xf32>
    %258 = vector.shape_cast %257 : vector<1x32x32xf32> to vector<32x32xf32>
    %cst_157 = arith.constant dense<0.000000e+00> : vector<2x32xf32>
    %259 = tpu.matmul %242, %258, %cst_157 {dimension_numbers = #tpu.dot_dimension_numbers<[1], [0], [0], [1], [0, 0, 1, 1], [], []>} : vector<2x32xf32>, vector<32x32xf32>, vector<2x32xf32> -> vector<2x32xf32>
    %c2_158 = arith.constant 2 : index
    %c0_159 = arith.constant 0 : index
    %c0_160 = arith.constant 0 : index
    %260 = vector.load %arg6[%c2_158, %c0_159, %c0_160] : memref<3x1x32xf32, #tpu.memory_space<vmem>>, vector<1x1x32xf32>
    %261 = vector.shape_cast %260 : vector<1x1x32xf32> to vector<1x32xf32>
    %262 = vector.broadcast %261 : vector<1x32xf32> to vector<2x32xf32>
    %263 = arith.addf %259, %262 : vector<2x32xf32>
    %264 = vector.extract_strided_slice %7 {offsets = [10, 0], sizes = [2, 32], strides = [1, 1]} : vector<16x32xf32> to vector<2x32xf32>
    %265 = arith.addf %264, %249 : vector<2x32xf32>
    %266 = arith.negf %265 : vector<2x32xf32>
    %267 = math.exp %266 : vector<2x32xf32>
    %cst_161 = arith.constant 1.000000e+00 : f32
    %268 = vector.broadcast %cst_161 : f32 to vector<2x32xf32>
    %269 = arith.addf %268, %267 : vector<2x32xf32>
    %270 = arith.divf %268, %269 : vector<2x32xf32>
    %271 = vector.extract_strided_slice %14 {offsets = [10, 0], sizes = [2, 32], strides = [1, 1]} : vector<16x32xf32> to vector<2x32xf32>
    %272 = arith.addf %271, %256 : vector<2x32xf32>
    %273 = arith.negf %272 : vector<2x32xf32>
    %274 = math.exp %273 : vector<2x32xf32>
    %cst_162 = arith.constant 1.000000e+00 : f32
    %275 = vector.broadcast %cst_162 : f32 to vector<2x32xf32>
    %276 = arith.addf %275, %274 : vector<2x32xf32>
    %277 = arith.divf %275, %276 : vector<2x32xf32>
    %278 = vector.extract_strided_slice %21 {offsets = [10, 0], sizes = [2, 32], strides = [1, 1]} : vector<16x32xf32> to vector<2x32xf32>
    %279 = arith.mulf %270, %263 : vector<2x32xf32>
    %280 = arith.addf %278, %279 : vector<2x32xf32>
    %281 = math.tanh %280 : vector<2x32xf32>
    %cst_163 = arith.constant 1.000000e+00 : f32
    %282 = vector.broadcast %cst_163 : f32 to vector<2x32xf32>
    %283 = arith.subf %282, %277 : vector<2x32xf32>
    %284 = arith.mulf %283, %281 : vector<2x32xf32>
    %285 = arith.mulf %277, %242 : vector<2x32xf32>
    %286 = arith.addf %284, %285 : vector<2x32xf32>
    %c0_164 = arith.constant 0 : index
    %c0_165 = arith.constant 0 : index
    %c0_166 = arith.constant 0 : index
    %287 = vector.load %arg4[%c0_164, %c0_165, %c0_166] : memref<3x32x32xf32, #tpu.memory_space<vmem>>, vector<1x32x32xf32>
    %288 = vector.shape_cast %287 : vector<1x32x32xf32> to vector<32x32xf32>
    %cst_167 = arith.constant dense<0.000000e+00> : vector<2x32xf32>
    %289 = tpu.matmul %286, %288, %cst_167 {dimension_numbers = #tpu.dot_dimension_numbers<[1], [0], [0], [1], [0, 0, 1, 1], [], []>} : vector<2x32xf32>, vector<32x32xf32>, vector<2x32xf32> -> vector<2x32xf32>
    %c0_168 = arith.constant 0 : index
    %c0_169 = arith.constant 0 : index
    %c0_170 = arith.constant 0 : index
    %290 = vector.load %arg6[%c0_168, %c0_169, %c0_170] : memref<3x1x32xf32, #tpu.memory_space<vmem>>, vector<1x1x32xf32>
    %291 = vector.shape_cast %290 : vector<1x1x32xf32> to vector<1x32xf32>
    %292 = vector.broadcast %291 : vector<1x32xf32> to vector<2x32xf32>
    %293 = arith.addf %289, %292 : vector<2x32xf32>
    %c1_171 = arith.constant 1 : index
    %c0_172 = arith.constant 0 : index
    %c0_173 = arith.constant 0 : index
    %294 = vector.load %arg4[%c1_171, %c0_172, %c0_173] : memref<3x32x32xf32, #tpu.memory_space<vmem>>, vector<1x32x32xf32>
    %295 = vector.shape_cast %294 : vector<1x32x32xf32> to vector<32x32xf32>
    %cst_174 = arith.constant dense<0.000000e+00> : vector<2x32xf32>
    %296 = tpu.matmul %286, %295, %cst_174 {dimension_numbers = #tpu.dot_dimension_numbers<[1], [0], [0], [1], [0, 0, 1, 1], [], []>} : vector<2x32xf32>, vector<32x32xf32>, vector<2x32xf32> -> vector<2x32xf32>
    %c1_175 = arith.constant 1 : index
    %c0_176 = arith.constant 0 : index
    %c0_177 = arith.constant 0 : index
    %297 = vector.load %arg6[%c1_175, %c0_176, %c0_177] : memref<3x1x32xf32, #tpu.memory_space<vmem>>, vector<1x1x32xf32>
    %298 = vector.shape_cast %297 : vector<1x1x32xf32> to vector<1x32xf32>
    %299 = vector.broadcast %298 : vector<1x32xf32> to vector<2x32xf32>
    %300 = arith.addf %296, %299 : vector<2x32xf32>
    %c2_178 = arith.constant 2 : index
    %c0_179 = arith.constant 0 : index
    %c0_180 = arith.constant 0 : index
    %301 = vector.load %arg4[%c2_178, %c0_179, %c0_180] : memref<3x32x32xf32, #tpu.memory_space<vmem>>, vector<1x32x32xf32>
    %302 = vector.shape_cast %301 : vector<1x32x32xf32> to vector<32x32xf32>
    %cst_181 = arith.constant dense<0.000000e+00> : vector<2x32xf32>
    %303 = tpu.matmul %286, %302, %cst_181 {dimension_numbers = #tpu.dot_dimension_numbers<[1], [0], [0], [1], [0, 0, 1, 1], [], []>} : vector<2x32xf32>, vector<32x32xf32>, vector<2x32xf32> -> vector<2x32xf32>
    %c2_182 = arith.constant 2 : index
    %c0_183 = arith.constant 0 : index
    %c0_184 = arith.constant 0 : index
    %304 = vector.load %arg6[%c2_182, %c0_183, %c0_184] : memref<3x1x32xf32, #tpu.memory_space<vmem>>, vector<1x1x32xf32>
    %305 = vector.shape_cast %304 : vector<1x1x32xf32> to vector<1x32xf32>
    %306 = vector.broadcast %305 : vector<1x32xf32> to vector<2x32xf32>
    %307 = arith.addf %303, %306 : vector<2x32xf32>
    %308 = vector.extract_strided_slice %7 {offsets = [12, 0], sizes = [2, 32], strides = [1, 1]} : vector<16x32xf32> to vector<2x32xf32>
    %309 = arith.addf %308, %293 : vector<2x32xf32>
    %310 = arith.negf %309 : vector<2x32xf32>
    %311 = math.exp %310 : vector<2x32xf32>
    %cst_185 = arith.constant 1.000000e+00 : f32
    %312 = vector.broadcast %cst_185 : f32 to vector<2x32xf32>
    %313 = arith.addf %312, %311 : vector<2x32xf32>
    %314 = arith.divf %312, %313 : vector<2x32xf32>
    %315 = vector.extract_strided_slice %14 {offsets = [12, 0], sizes = [2, 32], strides = [1, 1]} : vector<16x32xf32> to vector<2x32xf32>
    %316 = arith.addf %315, %300 : vector<2x32xf32>
    %317 = arith.negf %316 : vector<2x32xf32>
    %318 = math.exp %317 : vector<2x32xf32>
    %cst_186 = arith.constant 1.000000e+00 : f32
    %319 = vector.broadcast %cst_186 : f32 to vector<2x32xf32>
    %320 = arith.addf %319, %318 : vector<2x32xf32>
    %321 = arith.divf %319, %320 : vector<2x32xf32>
    %322 = vector.extract_strided_slice %21 {offsets = [12, 0], sizes = [2, 32], strides = [1, 1]} : vector<16x32xf32> to vector<2x32xf32>
    %323 = arith.mulf %314, %307 : vector<2x32xf32>
    %324 = arith.addf %322, %323 : vector<2x32xf32>
    %325 = math.tanh %324 : vector<2x32xf32>
    %cst_187 = arith.constant 1.000000e+00 : f32
    %326 = vector.broadcast %cst_187 : f32 to vector<2x32xf32>
    %327 = arith.subf %326, %321 : vector<2x32xf32>
    %328 = arith.mulf %327, %325 : vector<2x32xf32>
    %329 = arith.mulf %321, %286 : vector<2x32xf32>
    %330 = arith.addf %328, %329 : vector<2x32xf32>
    %c0_188 = arith.constant 0 : index
    %c0_189 = arith.constant 0 : index
    %c0_190 = arith.constant 0 : index
    %331 = vector.load %arg4[%c0_188, %c0_189, %c0_190] : memref<3x32x32xf32, #tpu.memory_space<vmem>>, vector<1x32x32xf32>
    %332 = vector.shape_cast %331 : vector<1x32x32xf32> to vector<32x32xf32>
    %cst_191 = arith.constant dense<0.000000e+00> : vector<2x32xf32>
    %333 = tpu.matmul %330, %332, %cst_191 {dimension_numbers = #tpu.dot_dimension_numbers<[1], [0], [0], [1], [0, 0, 1, 1], [], []>} : vector<2x32xf32>, vector<32x32xf32>, vector<2x32xf32> -> vector<2x32xf32>
    %c0_192 = arith.constant 0 : index
    %c0_193 = arith.constant 0 : index
    %c0_194 = arith.constant 0 : index
    %334 = vector.load %arg6[%c0_192, %c0_193, %c0_194] : memref<3x1x32xf32, #tpu.memory_space<vmem>>, vector<1x1x32xf32>
    %335 = vector.shape_cast %334 : vector<1x1x32xf32> to vector<1x32xf32>
    %336 = vector.broadcast %335 : vector<1x32xf32> to vector<2x32xf32>
    %337 = arith.addf %333, %336 : vector<2x32xf32>
    %c1_195 = arith.constant 1 : index
    %c0_196 = arith.constant 0 : index
    %c0_197 = arith.constant 0 : index
    %338 = vector.load %arg4[%c1_195, %c0_196, %c0_197] : memref<3x32x32xf32, #tpu.memory_space<vmem>>, vector<1x32x32xf32>
    %339 = vector.shape_cast %338 : vector<1x32x32xf32> to vector<32x32xf32>
    %cst_198 = arith.constant dense<0.000000e+00> : vector<2x32xf32>
    %340 = tpu.matmul %330, %339, %cst_198 {dimension_numbers = #tpu.dot_dimension_numbers<[1], [0], [0], [1], [0, 0, 1, 1], [], []>} : vector<2x32xf32>, vector<32x32xf32>, vector<2x32xf32> -> vector<2x32xf32>
    %c1_199 = arith.constant 1 : index
    %c0_200 = arith.constant 0 : index
    %c0_201 = arith.constant 0 : index
    %341 = vector.load %arg6[%c1_199, %c0_200, %c0_201] : memref<3x1x32xf32, #tpu.memory_space<vmem>>, vector<1x1x32xf32>
    %342 = vector.shape_cast %341 : vector<1x1x32xf32> to vector<1x32xf32>
    %343 = vector.broadcast %342 : vector<1x32xf32> to vector<2x32xf32>
    %344 = arith.addf %340, %343 : vector<2x32xf32>
    %c2_202 = arith.constant 2 : index
    %c0_203 = arith.constant 0 : index
    %c0_204 = arith.constant 0 : index
    %345 = vector.load %arg4[%c2_202, %c0_203, %c0_204] : memref<3x32x32xf32, #tpu.memory_space<vmem>>, vector<1x32x32xf32>
    %346 = vector.shape_cast %345 : vector<1x32x32xf32> to vector<32x32xf32>
    %cst_205 = arith.constant dense<0.000000e+00> : vector<2x32xf32>
    %347 = tpu.matmul %330, %346, %cst_205 {dimension_numbers = #tpu.dot_dimension_numbers<[1], [0], [0], [1], [0, 0, 1, 1], [], []>} : vector<2x32xf32>, vector<32x32xf32>, vector<2x32xf32> -> vector<2x32xf32>
    %c2_206 = arith.constant 2 : index
    %c0_207 = arith.constant 0 : index
    %c0_208 = arith.constant 0 : index
    %348 = vector.load %arg6[%c2_206, %c0_207, %c0_208] : memref<3x1x32xf32, #tpu.memory_space<vmem>>, vector<1x1x32xf32>
    %349 = vector.shape_cast %348 : vector<1x1x32xf32> to vector<1x32xf32>
    %350 = vector.broadcast %349 : vector<1x32xf32> to vector<2x32xf32>
    %351 = arith.addf %347, %350 : vector<2x32xf32>
    %352 = vector.extract_strided_slice %7 {offsets = [14, 0], sizes = [2, 32], strides = [1, 1]} : vector<16x32xf32> to vector<2x32xf32>
    %353 = arith.addf %352, %337 : vector<2x32xf32>
    %354 = arith.negf %353 : vector<2x32xf32>
    %355 = math.exp %354 : vector<2x32xf32>
    %cst_209 = arith.constant 1.000000e+00 : f32
    %356 = vector.broadcast %cst_209 : f32 to vector<2x32xf32>
    %357 = arith.addf %356, %355 : vector<2x32xf32>
    %358 = arith.divf %356, %357 : vector<2x32xf32>
    %359 = vector.extract_strided_slice %14 {offsets = [14, 0], sizes = [2, 32], strides = [1, 1]} : vector<16x32xf32> to vector<2x32xf32>
    %360 = arith.addf %359, %344 : vector<2x32xf32>
    %361 = arith.negf %360 : vector<2x32xf32>
    %362 = math.exp %361 : vector<2x32xf32>
    %cst_210 = arith.constant 1.000000e+00 : f32
    %363 = vector.broadcast %cst_210 : f32 to vector<2x32xf32>
    %364 = arith.addf %363, %362 : vector<2x32xf32>
    %365 = arith.divf %363, %364 : vector<2x32xf32>
    %366 = vector.extract_strided_slice %21 {offsets = [14, 0], sizes = [2, 32], strides = [1, 1]} : vector<16x32xf32> to vector<2x32xf32>
    %367 = arith.mulf %358, %351 : vector<2x32xf32>
    %368 = arith.addf %366, %367 : vector<2x32xf32>
    %369 = math.tanh %368 : vector<2x32xf32>
    %cst_211 = arith.constant 1.000000e+00 : f32
    %370 = vector.broadcast %cst_211 : f32 to vector<2x32xf32>
    %371 = arith.subf %370, %365 : vector<2x32xf32>
    %372 = arith.mulf %371, %369 : vector<2x32xf32>
    %373 = arith.mulf %365, %330 : vector<2x32xf32>
    %374 = arith.addf %372, %373 : vector<2x32xf32>
    %c0_212 = arith.constant 0 : index
    %c0_213 = arith.constant 0 : index
    %375 = vector.load %arg1[%c0_212, %c0_213] : memref<16x32xf32, #tpu.memory_space<vmem>>, vector<16x32xf32>
    %c0_214 = arith.constant 0 : index
    %c0_215 = arith.constant 0 : index
    %376 = vector.load %arg7[%c0_214, %c0_215] : memref<32x32xf32, #tpu.memory_space<vmem>>, vector<32x32xf32>
    %cst_216 = arith.constant dense<0.000000e+00> : vector<16x32xf32>
    %377 = tpu.matmul %375, %376, %cst_216 {dimension_numbers = #tpu.dot_dimension_numbers<[1], [0], [0], [1], [0, 0, 1, 1], [], []>} : vector<16x32xf32>, vector<32x32xf32>, vector<16x32xf32> -> vector<16x32xf32>
    %c0_217 = arith.constant 0 : index
    %c0_218 = arith.constant 0 : index
    %378 = vector.load %arg8[%c0_217, %c0_218] : memref<1x32xf32, #tpu.memory_space<vmem>>, vector<1x32xf32>
    %379 = vector.broadcast %378 : vector<1x32xf32> to vector<16x32xf32>
    %380 = arith.addf %377, %379 : vector<16x32xf32>
    %cst_219 = arith.constant 0.000000e+00 : f32
    %381 = vector.broadcast %cst_219 : f32 to vector<16x32xf32>
    %382 = arith.maximumf %380, %381 : vector<16x32xf32>
    %c0_220 = arith.constant 0 : index
    %c0_221 = arith.constant 0 : index
    %383 = vector.load %arg9[%c0_220, %c0_221] : memref<32x32xf32, #tpu.memory_space<vmem>>, vector<32x32xf32>
    %cst_222 = arith.constant dense<0.000000e+00> : vector<2x32xf32>
    %384 = tpu.matmul %374, %383, %cst_222 {dimension_numbers = #tpu.dot_dimension_numbers<[1], [0], [0], [1], [0, 0, 1, 1], [], []>} : vector<2x32xf32>, vector<32x32xf32>, vector<2x32xf32> -> vector<2x32xf32>
    %c0_223 = arith.constant 0 : index
    %c0_224 = arith.constant 0 : index
    %385 = vector.load %arg10[%c0_223, %c0_224] : memref<1x32xf32, #tpu.memory_space<vmem>>, vector<1x32xf32>
    %386 = vector.broadcast %385 : vector<1x32xf32> to vector<2x32xf32>
    %387 = arith.addf %384, %386 : vector<2x32xf32>
    %cst_225 = arith.constant 0.000000e+00 : f32
    %388 = vector.broadcast %cst_225 : f32 to vector<2x32xf32>
    %389 = arith.maximumf %387, %388 : vector<2x32xf32>
    %390 = vector.extract_strided_slice %382 {offsets = [0, 0], sizes = [8, 32], strides = [1, 1]} : vector<16x32xf32> to vector<8x32xf32>
    %391 = vector.extract_strided_slice %389 {offsets = [0, 0], sizes = [1, 32], strides = [1, 1]} : vector<2x32xf32> to vector<1x32xf32>
    %392 = vector.broadcast %391 : vector<1x32xf32> to vector<8x32xf32>
    %393 = arith.mulf %390, %392 : vector<8x32xf32>
    %c0_226 = arith.constant 0 : index
    %c0_227 = arith.constant 0 : index
    %394 = vector.load %arg11[%c0_226, %c0_227] : memref<32x1xf32, #tpu.memory_space<vmem>>, vector<32x1xf32>
    %cst_228 = arith.constant dense<0.000000e+00> : vector<8x1xf32>
    %395 = tpu.matmul %393, %394, %cst_228 {dimension_numbers = #tpu.dot_dimension_numbers<[1], [0], [0], [1], [0, 0, 1, 1], [], []>} : vector<8x32xf32>, vector<32x1xf32>, vector<8x1xf32> -> vector<8x1xf32>
    %c0_229 = arith.constant 0 : index
    %c0_230 = arith.constant 0 : index
    %396 = vector.load %arg12[%c0_229, %c0_230] : memref<1x1xf32, #tpu.memory_space<vmem>>, vector<1x1xf32>
    %397 = vector.broadcast %396 : vector<1x1xf32> to vector<8x1xf32>
    %398 = arith.addf %395, %397 : vector<8x1xf32>
    %cst_231 = arith.constant dense<0xFF800000> : vector<1xf32>
    %399 = vector.multi_reduction <maximumf>, %398, %cst_231 [0] : vector<8x1xf32> to vector<1xf32>
    %400 = vector.shape_cast %399 : vector<1xf32> to vector<1x1xf32>
    %401 = vector.broadcast %400 : vector<1x1xf32> to vector<8x1xf32>
    %402 = arith.subf %398, %401 : vector<8x1xf32>
    %403 = math.exp %402 : vector<8x1xf32>
    %cst_232 = arith.constant dense<0.000000e+00> : vector<1xf32>
    %404 = vector.multi_reduction <add>, %403, %cst_232 [0] : vector<8x1xf32> to vector<1xf32>
    %405 = vector.shape_cast %404 : vector<1xf32> to vector<1x1xf32>
    %406 = vector.broadcast %405 : vector<1x1xf32> to vector<8x1xf32>
    %407 = arith.divf %403, %406 : vector<8x1xf32>
    %408 = vector.extract_strided_slice %375 {offsets = [0, 0], sizes = [8, 32], strides = [1, 1]} : vector<16x32xf32> to vector<8x32xf32>
    %409 = vector.broadcast %407 : vector<8x1xf32> to vector<8x32xf32>
    %410 = arith.mulf %409, %408 : vector<8x32xf32>
    %cst_233 = arith.constant dense<0.000000e+00> : vector<32xf32>
    %411 = vector.multi_reduction <add>, %410, %cst_233 [0] : vector<8x32xf32> to vector<32xf32>
    %412 = vector.shape_cast %411 : vector<32xf32> to vector<1x32xf32>
    %413 = vector.extract_strided_slice %382 {offsets = [8, 0], sizes = [8, 32], strides = [1, 1]} : vector<16x32xf32> to vector<8x32xf32>
    %414 = vector.extract_strided_slice %389 {offsets = [1, 0], sizes = [1, 32], strides = [1, 1]} : vector<2x32xf32> to vector<1x32xf32>
    %415 = vector.broadcast %414 : vector<1x32xf32> to vector<8x32xf32>
    %416 = arith.mulf %413, %415 : vector<8x32xf32>
    %c0_234 = arith.constant 0 : index
    %c0_235 = arith.constant 0 : index
    %417 = vector.load %arg11[%c0_234, %c0_235] : memref<32x1xf32, #tpu.memory_space<vmem>>, vector<32x1xf32>
    %cst_236 = arith.constant dense<0.000000e+00> : vector<8x1xf32>
    %418 = tpu.matmul %416, %417, %cst_236 {dimension_numbers = #tpu.dot_dimension_numbers<[1], [0], [0], [1], [0, 0, 1, 1], [], []>} : vector<8x32xf32>, vector<32x1xf32>, vector<8x1xf32> -> vector<8x1xf32>
    %c0_237 = arith.constant 0 : index
    %c0_238 = arith.constant 0 : index
    %419 = vector.load %arg12[%c0_237, %c0_238] : memref<1x1xf32, #tpu.memory_space<vmem>>, vector<1x1xf32>
    %420 = vector.broadcast %419 : vector<1x1xf32> to vector<8x1xf32>
    %421 = arith.addf %418, %420 : vector<8x1xf32>
    %cst_239 = arith.constant dense<0xFF800000> : vector<1xf32>
    %422 = vector.multi_reduction <maximumf>, %421, %cst_239 [0] : vector<8x1xf32> to vector<1xf32>
    %423 = vector.shape_cast %422 : vector<1xf32> to vector<1x1xf32>
    %424 = vector.broadcast %423 : vector<1x1xf32> to vector<8x1xf32>
    %425 = arith.subf %421, %424 : vector<8x1xf32>
    %426 = math.exp %425 : vector<8x1xf32>
    %cst_240 = arith.constant dense<0.000000e+00> : vector<1xf32>
    %427 = vector.multi_reduction <add>, %426, %cst_240 [0] : vector<8x1xf32> to vector<1xf32>
    %428 = vector.shape_cast %427 : vector<1xf32> to vector<1x1xf32>
    %429 = vector.broadcast %428 : vector<1x1xf32> to vector<8x1xf32>
    %430 = arith.divf %426, %429 : vector<8x1xf32>
    %431 = vector.extract_strided_slice %375 {offsets = [8, 0], sizes = [8, 32], strides = [1, 1]} : vector<16x32xf32> to vector<8x32xf32>
    %432 = vector.broadcast %430 : vector<8x1xf32> to vector<8x32xf32>
    %433 = arith.mulf %432, %431 : vector<8x32xf32>
    %cst_241 = arith.constant dense<0.000000e+00> : vector<32xf32>
    %434 = vector.multi_reduction <add>, %433, %cst_241 [0] : vector<8x32xf32> to vector<32xf32>
    %435 = vector.shape_cast %434 : vector<32xf32> to vector<1x32xf32>
    %436 = tpu.concatenate %412, %435 in 0 : vector<1x32xf32>, vector<1x32xf32> -> vector<2x32xf32>
    %c0_242 = arith.constant 0 : index
    %c0_243 = arith.constant 0 : index
    %437 = vector.load %arg13[%c0_242, %c0_243] : memref<32x32xf32, #tpu.memory_space<vmem>>, vector<32x32xf32>
    %cst_244 = arith.constant dense<0.000000e+00> : vector<2x32xf32>
    %438 = tpu.matmul %374, %437, %cst_244 {dimension_numbers = #tpu.dot_dimension_numbers<[1], [0], [0], [1], [0, 0, 1, 1], [], []>} : vector<2x32xf32>, vector<32x32xf32>, vector<2x32xf32> -> vector<2x32xf32>
    %c0_245 = arith.constant 0 : index
    %c0_246 = arith.constant 0 : index
    %439 = vector.load %arg14[%c0_245, %c0_246] : memref<1x32xf32, #tpu.memory_space<vmem>>, vector<1x32xf32>
    %440 = vector.broadcast %439 : vector<1x32xf32> to vector<2x32xf32>
    %441 = arith.addf %438, %440 : vector<2x32xf32>
    %cst_247 = arith.constant 0.000000e+00 : f32
    %442 = vector.broadcast %cst_247 : f32 to vector<2x32xf32>
    %443 = arith.maximumf %441, %442 : vector<2x32xf32>
    %c0_248 = arith.constant 0 : index
    %c0_249 = arith.constant 0 : index
    %444 = vector.load %arg15[%c0_248, %c0_249] : memref<32x32xf32, #tpu.memory_space<vmem>>, vector<32x32xf32>
    %cst_250 = arith.constant dense<0.000000e+00> : vector<2x32xf32>
    %445 = tpu.matmul %436, %444, %cst_250 {dimension_numbers = #tpu.dot_dimension_numbers<[1], [0], [0], [1], [0, 0, 1, 1], [], []>} : vector<2x32xf32>, vector<32x32xf32>, vector<2x32xf32> -> vector<2x32xf32>
    %c0_251 = arith.constant 0 : index
    %c0_252 = arith.constant 0 : index
    %446 = vector.load %arg16[%c0_251, %c0_252] : memref<1x32xf32, #tpu.memory_space<vmem>>, vector<1x32xf32>
    %447 = vector.broadcast %446 : vector<1x32xf32> to vector<2x32xf32>
    %448 = arith.addf %445, %447 : vector<2x32xf32>
    %cst_253 = arith.constant 0.000000e+00 : f32
    %449 = vector.broadcast %cst_253 : f32 to vector<2x32xf32>
    %450 = arith.maximumf %448, %449 : vector<2x32xf32>
    %451 = arith.mulf %443, %450 : vector<2x32xf32>
    %c0_254 = arith.constant 0 : index
    %c0_255 = arith.constant 0 : index
    %452 = vector.load %arg17[%c0_254, %c0_255] : memref<32x64xf32, #tpu.memory_space<vmem>>, vector<32x64xf32>
    %cst_256 = arith.constant dense<0.000000e+00> : vector<2x64xf32>
    %453 = tpu.matmul %451, %452, %cst_256 {dimension_numbers = #tpu.dot_dimension_numbers<[1], [0], [0], [1], [0, 0, 1, 1], [], []>} : vector<2x32xf32>, vector<32x64xf32>, vector<2x64xf32> -> vector<2x64xf32>
    %c0_257 = arith.constant 0 : index
    %c0_258 = arith.constant 0 : index
    %454 = vector.load %arg18[%c0_257, %c0_258] : memref<1x64xf32, #tpu.memory_space<vmem>>, vector<1x64xf32>
    %455 = vector.broadcast %454 : vector<1x64xf32> to vector<2x64xf32>
    %456 = arith.addf %453, %455 : vector<2x64xf32>
    %cst_259 = arith.constant 0.000000e+00 : f32
    %457 = vector.broadcast %cst_259 : f32 to vector<2x64xf32>
    %458 = arith.maximumf %456, %457 : vector<2x64xf32>
    %c0_260 = arith.constant 0 : index
    %c0_261 = arith.constant 0 : index
    %459 = vector.load %arg19[%c0_260, %c0_261] : memref<64x128xf32, #tpu.memory_space<vmem>>, vector<64x128xf32>
    %cst_262 = arith.constant dense<0.000000e+00> : vector<2x128xf32>
    %460 = tpu.matmul %458, %459, %cst_262 {dimension_numbers = #tpu.dot_dimension_numbers<[1], [0], [0], [1], [0, 0, 1, 1], [], []>} : vector<2x64xf32>, vector<64x128xf32>, vector<2x128xf32> -> vector<2x128xf32>
    %c0_263 = arith.constant 0 : index
    %c0_264 = arith.constant 0 : index
    %461 = vector.load %arg20[%c0_263, %c0_264] : memref<1x128xf32, #tpu.memory_space<vmem>>, vector<1x128xf32>
    %462 = vector.broadcast %461 : vector<1x128xf32> to vector<2x128xf32>
    %463 = arith.addf %460, %462 : vector<2x128xf32>
    %c0_265 = arith.constant 0 : index
    %c0_266 = arith.constant 0 : index
    %464 = vector.load %arg29[%c0_265, %c0_266] : memref<2x128xf32, #tpu.memory_space<vmem>>, vector<2x128xf32>
    tpu.vector_store %arg29[%c0_265, %c0_266], %463 {strides = array<i32>} : memref<2x128xf32, #tpu.memory_space<vmem>>, vector<2x128xf32>,
    %c0_267 = arith.constant 0 : index
    %c0_268 = arith.constant 0 : index
    %465 = vector.load %arg21[%c0_267, %c0_268] : memref<32x16xf32, #tpu.memory_space<vmem>>, vector<32x16xf32>
    %cst_269 = arith.constant dense<0.000000e+00> : vector<2x16xf32>
    %466 = tpu.matmul %451, %465, %cst_269 {dimension_numbers = #tpu.dot_dimension_numbers<[1], [0], [0], [1], [0, 0, 1, 1], [], []>} : vector<2x32xf32>, vector<32x16xf32>, vector<2x16xf32> -> vector<2x16xf32>
    %c0_270 = arith.constant 0 : index
    %c0_271 = arith.constant 0 : index
    %467 = vector.load %arg22[%c0_270, %c0_271] : memref<1x16xf32, #tpu.memory_space<vmem>>, vector<1x16xf32>
    %468 = vector.broadcast %467 : vector<1x16xf32> to vector<2x16xf32>
    %469 = arith.addf %466, %468 : vector<2x16xf32>
    %c0_272 = arith.constant 0 : index
    %c0_273 = arith.constant 0 : index
    %470 = vector.load %arg2[%c0_272, %c0_273] : memref<10x16xf32, #tpu.memory_space<vmem>>, vector<10x16xf32>
    %c0_274 = arith.constant 0 : index
    %c0_275 = arith.constant 0 : index
    %c0_276 = arith.constant 0 : index
    %471 = vector.load %arg23[%c0_274, %c0_275, %c0_276] : memref<4x16x32xf32, #tpu.memory_space<vmem>>, vector<1x16x32xf32>
    %472 = vector.shape_cast %471 : vector<1x16x32xf32> to vector<16x32xf32>
    %cst_277 = arith.constant dense<0.000000e+00> : vector<10x32xf32>
    %473 = tpu.matmul %470, %472, %cst_277 {dimension_numbers = #tpu.dot_dimension_numbers<[1], [0], [0], [1], [0, 0, 1, 1], [], []>} : vector<10x16xf32>, vector<16x32xf32>, vector<10x32xf32> -> vector<10x32xf32>
    %c0_278 = arith.constant 0 : index
    %c0_279 = arith.constant 0 : index
    %c0_280 = arith.constant 0 : index
    %474 = vector.load %arg25[%c0_278, %c0_279, %c0_280] : memref<4x1x32xf32, #tpu.memory_space<vmem>>, vector<1x1x32xf32>
    %475 = vector.shape_cast %474 : vector<1x1x32xf32> to vector<1x32xf32>
    %476 = vector.broadcast %475 : vector<1x32xf32> to vector<10x32xf32>
    %477 = arith.addf %473, %476 : vector<10x32xf32>
    %c1_281 = arith.constant 1 : index
    %c0_282 = arith.constant 0 : index
    %c0_283 = arith.constant 0 : index
    %478 = vector.load %arg23[%c1_281, %c0_282, %c0_283] : memref<4x16x32xf32, #tpu.memory_space<vmem>>, vector<1x16x32xf32>
    %479 = vector.shape_cast %478 : vector<1x16x32xf32> to vector<16x32xf32>
    %cst_284 = arith.constant dense<0.000000e+00> : vector<10x32xf32>
    %480 = tpu.matmul %470, %479, %cst_284 {dimension_numbers = #tpu.dot_dimension_numbers<[1], [0], [0], [1], [0, 0, 1, 1], [], []>} : vector<10x16xf32>, vector<16x32xf32>, vector<10x32xf32> -> vector<10x32xf32>
    %c1_285 = arith.constant 1 : index
    %c0_286 = arith.constant 0 : index
    %c0_287 = arith.constant 0 : index
    %481 = vector.load %arg25[%c1_285, %c0_286, %c0_287] : memref<4x1x32xf32, #tpu.memory_space<vmem>>, vector<1x1x32xf32>
    %482 = vector.shape_cast %481 : vector<1x1x32xf32> to vector<1x32xf32>
    %483 = vector.broadcast %482 : vector<1x32xf32> to vector<10x32xf32>
    %484 = arith.addf %480, %483 : vector<10x32xf32>
    %c2_288 = arith.constant 2 : index
    %c0_289 = arith.constant 0 : index
    %c0_290 = arith.constant 0 : index
    %485 = vector.load %arg23[%c2_288, %c0_289, %c0_290] : memref<4x16x32xf32, #tpu.memory_space<vmem>>, vector<1x16x32xf32>
    %486 = vector.shape_cast %485 : vector<1x16x32xf32> to vector<16x32xf32>
    %cst_291 = arith.constant dense<0.000000e+00> : vector<10x32xf32>
    %487 = tpu.matmul %470, %486, %cst_291 {dimension_numbers = #tpu.dot_dimension_numbers<[1], [0], [0], [1], [0, 0, 1, 1], [], []>} : vector<10x16xf32>, vector<16x32xf32>, vector<10x32xf32> -> vector<10x32xf32>
    %c2_292 = arith.constant 2 : index
    %c0_293 = arith.constant 0 : index
    %c0_294 = arith.constant 0 : index
    %488 = vector.load %arg25[%c2_292, %c0_293, %c0_294] : memref<4x1x32xf32, #tpu.memory_space<vmem>>, vector<1x1x32xf32>
    %489 = vector.shape_cast %488 : vector<1x1x32xf32> to vector<1x32xf32>
    %490 = vector.broadcast %489 : vector<1x32xf32> to vector<10x32xf32>
    %491 = arith.addf %487, %490 : vector<10x32xf32>
    %c3 = arith.constant 3 : index
    %c0_295 = arith.constant 0 : index
    %c0_296 = arith.constant 0 : index
    %492 = vector.load %arg23[%c3, %c0_295, %c0_296] : memref<4x16x32xf32, #tpu.memory_space<vmem>>, vector<1x16x32xf32>
    %493 = vector.shape_cast %492 : vector<1x16x32xf32> to vector<16x32xf32>
    %cst_297 = arith.constant dense<0.000000e+00> : vector<10x32xf32>
    %494 = tpu.matmul %470, %493, %cst_297 {dimension_numbers = #tpu.dot_dimension_numbers<[1], [0], [0], [1], [0, 0, 1, 1], [], []>} : vector<10x16xf32>, vector<16x32xf32>, vector<10x32xf32> -> vector<10x32xf32>
    %c3_298 = arith.constant 3 : index
    %c0_299 = arith.constant 0 : index
    %c0_300 = arith.constant 0 : index
    %495 = vector.load %arg25[%c3_298, %c0_299, %c0_300] : memref<4x1x32xf32, #tpu.memory_space<vmem>>, vector<1x1x32xf32>
    %496 = vector.shape_cast %495 : vector<1x1x32xf32> to vector<1x32xf32>
    %497 = vector.broadcast %496 : vector<1x32xf32> to vector<10x32xf32>
    %498 = arith.addf %494, %497 : vector<10x32xf32>
    %c0_301 = arith.constant 0 : index
    %c0_302 = arith.constant 0 : index
    %c0_303 = arith.constant 0 : index
    %499 = vector.load %arg23[%c0_301, %c0_302, %c0_303] : memref<4x16x32xf32, #tpu.memory_space<vmem>>, vector<1x16x32xf32>
    %500 = vector.shape_cast %499 : vector<1x16x32xf32> to vector<16x32xf32>
    %cst_304 = arith.constant dense<0.000000e+00> : vector<2x32xf32>
    %501 = tpu.matmul %469, %500, %cst_304 {dimension_numbers = #tpu.dot_dimension_numbers<[1], [0], [0], [1], [0, 0, 1, 1], [], []>} : vector<2x16xf32>, vector<16x32xf32>, vector<2x32xf32> -> vector<2x32xf32>
    %c0_305 = arith.constant 0 : index
    %c0_306 = arith.constant 0 : index
    %c0_307 = arith.constant 0 : index
    %502 = vector.load %arg25[%c0_305, %c0_306, %c0_307] : memref<4x1x32xf32, #tpu.memory_space<vmem>>, vector<1x1x32xf32>
    %503 = vector.shape_cast %502 : vector<1x1x32xf32> to vector<1x32xf32>
    %504 = vector.broadcast %503 : vector<1x32xf32> to vector<2x32xf32>
    %505 = arith.addf %501, %504 : vector<2x32xf32>
    %c1_308 = arith.constant 1 : index
    %c0_309 = arith.constant 0 : index
    %c0_310 = arith.constant 0 : index
    %506 = vector.load %arg23[%c1_308, %c0_309, %c0_310] : memref<4x16x32xf32, #tpu.memory_space<vmem>>, vector<1x16x32xf32>
    %507 = vector.shape_cast %506 : vector<1x16x32xf32> to vector<16x32xf32>
    %cst_311 = arith.constant dense<0.000000e+00> : vector<2x32xf32>
    %508 = tpu.matmul %469, %507, %cst_311 {dimension_numbers = #tpu.dot_dimension_numbers<[1], [0], [0], [1], [0, 0, 1, 1], [], []>} : vector<2x16xf32>, vector<16x32xf32>, vector<2x32xf32> -> vector<2x32xf32>
    %c1_312 = arith.constant 1 : index
    %c0_313 = arith.constant 0 : index
    %c0_314 = arith.constant 0 : index
    %509 = vector.load %arg25[%c1_312, %c0_313, %c0_314] : memref<4x1x32xf32, #tpu.memory_space<vmem>>, vector<1x1x32xf32>
    %510 = vector.shape_cast %509 : vector<1x1x32xf32> to vector<1x32xf32>
    %511 = vector.broadcast %510 : vector<1x32xf32> to vector<2x32xf32>
    %512 = arith.addf %508, %511 : vector<2x32xf32>
    %c2_315 = arith.constant 2 : index
    %c0_316 = arith.constant 0 : index
    %c0_317 = arith.constant 0 : index
    %513 = vector.load %arg23[%c2_315, %c0_316, %c0_317] : memref<4x16x32xf32, #tpu.memory_space<vmem>>, vector<1x16x32xf32>
    %514 = vector.shape_cast %513 : vector<1x16x32xf32> to vector<16x32xf32>
    %cst_318 = arith.constant dense<0.000000e+00> : vector<2x32xf32>
    %515 = tpu.matmul %469, %514, %cst_318 {dimension_numbers = #tpu.dot_dimension_numbers<[1], [0], [0], [1], [0, 0, 1, 1], [], []>} : vector<2x16xf32>, vector<16x32xf32>, vector<2x32xf32> -> vector<2x32xf32>
    %c2_319 = arith.constant 2 : index
    %c0_320 = arith.constant 0 : index
    %c0_321 = arith.constant 0 : index
    %516 = vector.load %arg25[%c2_319, %c0_320, %c0_321] : memref<4x1x32xf32, #tpu.memory_space<vmem>>, vector<1x1x32xf32>
    %517 = vector.shape_cast %516 : vector<1x1x32xf32> to vector<1x32xf32>
    %518 = vector.broadcast %517 : vector<1x32xf32> to vector<2x32xf32>
    %519 = arith.addf %515, %518 : vector<2x32xf32>
    %c3_322 = arith.constant 3 : index
    %c0_323 = arith.constant 0 : index
    %c0_324 = arith.constant 0 : index
    %520 = vector.load %arg23[%c3_322, %c0_323, %c0_324] : memref<4x16x32xf32, #tpu.memory_space<vmem>>, vector<1x16x32xf32>
    %521 = vector.shape_cast %520 : vector<1x16x32xf32> to vector<16x32xf32>
    %cst_325 = arith.constant dense<0.000000e+00> : vector<2x32xf32>
    %522 = tpu.matmul %469, %521, %cst_325 {dimension_numbers = #tpu.dot_dimension_numbers<[1], [0], [0], [1], [0, 0, 1, 1], [], []>} : vector<2x16xf32>, vector<16x32xf32>, vector<2x32xf32> -> vector<2x32xf32>
    %c3_326 = arith.constant 3 : index
    %c0_327 = arith.constant 0 : index
    %c0_328 = arith.constant 0 : index
    %523 = vector.load %arg25[%c3_326, %c0_327, %c0_328] : memref<4x1x32xf32, #tpu.memory_space<vmem>>, vector<1x1x32xf32>
    %524 = vector.shape_cast %523 : vector<1x1x32xf32> to vector<1x32xf32>
    %525 = vector.broadcast %524 : vector<1x32xf32> to vector<2x32xf32>
    %526 = arith.addf %522, %525 : vector<2x32xf32>
    %cst_329 = arith.constant 0.000000e+00 : f32
    %527 = vector.broadcast %cst_329 : f32 to vector<2x32xf32>
    %cst_330 = arith.constant 0.000000e+00 : f32
    %528 = vector.broadcast %cst_330 : f32 to vector<2x32xf32>
    %c0_331 = arith.constant 0 : index
    %c0_332 = arith.constant 0 : index
    %c0_333 = arith.constant 0 : index
    %529 = vector.load %arg24[%c0_331, %c0_332, %c0_333] : memref<4x32x32xf32, #tpu.memory_space<vmem>>, vector<1x32x32xf32>
    %530 = vector.shape_cast %529 : vector<1x32x32xf32> to vector<32x32xf32>
    %cst_334 = arith.constant dense<0.000000e+00> : vector<2x32xf32>
    %531 = tpu.matmul %527, %530, %cst_334 {dimension_numbers = #tpu.dot_dimension_numbers<[1], [0], [0], [1], [0, 0, 1, 1], [], []>} : vector<2x32xf32>, vector<32x32xf32>, vector<2x32xf32> -> vector<2x32xf32>
    %c0_335 = arith.constant 0 : index
    %c0_336 = arith.constant 0 : index
    %c0_337 = arith.constant 0 : index
    %532 = vector.load %arg26[%c0_335, %c0_336, %c0_337] : memref<4x1x32xf32, #tpu.memory_space<vmem>>, vector<1x1x32xf32>
    %533 = vector.shape_cast %532 : vector<1x1x32xf32> to vector<1x32xf32>
    %534 = vector.broadcast %533 : vector<1x32xf32> to vector<2x32xf32>
    %535 = arith.addf %531, %534 : vector<2x32xf32>
    %c1_338 = arith.constant 1 : index
    %c0_339 = arith.constant 0 : index
    %c0_340 = arith.constant 0 : index
    %536 = vector.load %arg24[%c1_338, %c0_339, %c0_340] : memref<4x32x32xf32, #tpu.memory_space<vmem>>, vector<1x32x32xf32>
    %537 = vector.shape_cast %536 : vector<1x32x32xf32> to vector<32x32xf32>
    %cst_341 = arith.constant dense<0.000000e+00> : vector<2x32xf32>
    %538 = tpu.matmul %527, %537, %cst_341 {dimension_numbers = #tpu.dot_dimension_numbers<[1], [0], [0], [1], [0, 0, 1, 1], [], []>} : vector<2x32xf32>, vector<32x32xf32>, vector<2x32xf32> -> vector<2x32xf32>
    %c1_342 = arith.constant 1 : index
    %c0_343 = arith.constant 0 : index
    %c0_344 = arith.constant 0 : index
    %539 = vector.load %arg26[%c1_342, %c0_343, %c0_344] : memref<4x1x32xf32, #tpu.memory_space<vmem>>, vector<1x1x32xf32>
    %540 = vector.shape_cast %539 : vector<1x1x32xf32> to vector<1x32xf32>
    %541 = vector.broadcast %540 : vector<1x32xf32> to vector<2x32xf32>
    %542 = arith.addf %538, %541 : vector<2x32xf32>
    %c2_345 = arith.constant 2 : index
    %c0_346 = arith.constant 0 : index
    %c0_347 = arith.constant 0 : index
    %543 = vector.load %arg24[%c2_345, %c0_346, %c0_347] : memref<4x32x32xf32, #tpu.memory_space<vmem>>, vector<1x32x32xf32>
    %544 = vector.shape_cast %543 : vector<1x32x32xf32> to vector<32x32xf32>
    %cst_348 = arith.constant dense<0.000000e+00> : vector<2x32xf32>
    %545 = tpu.matmul %527, %544, %cst_348 {dimension_numbers = #tpu.dot_dimension_numbers<[1], [0], [0], [1], [0, 0, 1, 1], [], []>} : vector<2x32xf32>, vector<32x32xf32>, vector<2x32xf32> -> vector<2x32xf32>
    %c2_349 = arith.constant 2 : index
    %c0_350 = arith.constant 0 : index
    %c0_351 = arith.constant 0 : index
    %546 = vector.load %arg26[%c2_349, %c0_350, %c0_351] : memref<4x1x32xf32, #tpu.memory_space<vmem>>, vector<1x1x32xf32>
    %547 = vector.shape_cast %546 : vector<1x1x32xf32> to vector<1x32xf32>
    %548 = vector.broadcast %547 : vector<1x32xf32> to vector<2x32xf32>
    %549 = arith.addf %545, %548 : vector<2x32xf32>
    %c3_352 = arith.constant 3 : index
    %c0_353 = arith.constant 0 : index
    %c0_354 = arith.constant 0 : index
    %550 = vector.load %arg24[%c3_352, %c0_353, %c0_354] : memref<4x32x32xf32, #tpu.memory_space<vmem>>, vector<1x32x32xf32>
    %551 = vector.shape_cast %550 : vector<1x32x32xf32> to vector<32x32xf32>
    %cst_355 = arith.constant dense<0.000000e+00> : vector<2x32xf32>
    %552 = tpu.matmul %527, %551, %cst_355 {dimension_numbers = #tpu.dot_dimension_numbers<[1], [0], [0], [1], [0, 0, 1, 1], [], []>} : vector<2x32xf32>, vector<32x32xf32>, vector<2x32xf32> -> vector<2x32xf32>
    %c3_356 = arith.constant 3 : index
    %c0_357 = arith.constant 0 : index
    %c0_358 = arith.constant 0 : index
    %553 = vector.load %arg26[%c3_356, %c0_357, %c0_358] : memref<4x1x32xf32, #tpu.memory_space<vmem>>, vector<1x1x32xf32>
    %554 = vector.shape_cast %553 : vector<1x1x32xf32> to vector<1x32xf32>
    %555 = vector.broadcast %554 : vector<1x32xf32> to vector<2x32xf32>
    %556 = arith.addf %552, %555 : vector<2x32xf32>
    %557 = arith.addf %505, %535 : vector<2x32xf32>
    %558 = arith.negf %557 : vector<2x32xf32>
    %559 = math.exp %558 : vector<2x32xf32>
    %cst_359 = arith.constant 1.000000e+00 : f32
    %560 = vector.broadcast %cst_359 : f32 to vector<2x32xf32>
    %561 = arith.addf %560, %559 : vector<2x32xf32>
    %562 = arith.divf %560, %561 : vector<2x32xf32>
    %563 = arith.addf %512, %542 : vector<2x32xf32>
    %564 = arith.negf %563 : vector<2x32xf32>
    %565 = math.exp %564 : vector<2x32xf32>
    %cst_360 = arith.constant 1.000000e+00 : f32
    %566 = vector.broadcast %cst_360 : f32 to vector<2x32xf32>
    %567 = arith.addf %566, %565 : vector<2x32xf32>
    %568 = arith.divf %566, %567 : vector<2x32xf32>
    %569 = arith.addf %519, %549 : vector<2x32xf32>
    %570 = math.tanh %569 : vector<2x32xf32>
    %571 = arith.addf %526, %556 : vector<2x32xf32>
    %572 = arith.negf %571 : vector<2x32xf32>
    %573 = math.exp %572 : vector<2x32xf32>
    %cst_361 = arith.constant 1.000000e+00 : f32
    %574 = vector.broadcast %cst_361 : f32 to vector<2x32xf32>
    %575 = arith.addf %574, %573 : vector<2x32xf32>
    %576 = arith.divf %574, %575 : vector<2x32xf32>
    %577 = arith.mulf %568, %528 : vector<2x32xf32>
    %578 = arith.mulf %562, %570 : vector<2x32xf32>
    %579 = arith.addf %577, %578 : vector<2x32xf32>
    %580 = math.tanh %579 : vector<2x32xf32>
    %581 = arith.mulf %576, %580 : vector<2x32xf32>
    %c0_362 = arith.constant 0 : index
    %c0_363 = arith.constant 0 : index
    %582 = vector.load %arg27[%c0_362, %c0_363] : memref<32x128xf32, #tpu.memory_space<vmem>>, vector<32x128xf32>
    %cst_364 = arith.constant dense<0.000000e+00> : vector<2x128xf32>
    %583 = tpu.matmul %581, %582, %cst_364 {dimension_numbers = #tpu.dot_dimension_numbers<[1], [0], [0], [1], [0, 0, 1, 1], [], []>} : vector<2x32xf32>, vector<32x128xf32>, vector<2x128xf32> -> vector<2x128xf32>
    %c0_365 = arith.constant 0 : index
    %c0_366 = arith.constant 0 : index
    %584 = vector.load %arg28[%c0_365, %c0_366] : memref<1x128xf32, #tpu.memory_space<vmem>>, vector<1x128xf32>
    %585 = vector.broadcast %584 : vector<1x128xf32> to vector<2x128xf32>
    %586 = arith.addf %583, %585 : vector<2x128xf32>
    %c0_367 = arith.constant 0 : index
    %c0_368 = arith.constant 0 : index
    %c0_369 = arith.constant 0 : index
    %587 = vector.load %arg30[%c0_367, %c0_368, %c0_369] : memref<6x2x128xf32, #tpu.memory_space<vmem>>, vector<1x2x128xf32>
    %588 = vector.shape_cast %587 : vector<1x2x128xf32> to vector<2x128xf32>
    %589 = vector.shape_cast %586 : vector<2x128xf32> to vector<1x2x128xf32>
    tpu.vector_store %arg30[%c0_367, %c0_368, %c0_369], %589 {strides = array<i32>} : memref<6x2x128xf32, #tpu.memory_space<vmem>>, vector<1x2x128xf32>,
    %590 = vector.extract_strided_slice %477 {offsets = [0, 0], sizes = [2, 32], strides = [1, 1]} : vector<10x32xf32> to vector<2x32xf32>
    %591 = vector.extract_strided_slice %484 {offsets = [0, 0], sizes = [2, 32], strides = [1, 1]} : vector<10x32xf32> to vector<2x32xf32>
    %592 = vector.extract_strided_slice %491 {offsets = [0, 0], sizes = [2, 32], strides = [1, 1]} : vector<10x32xf32> to vector<2x32xf32>
    %593 = vector.extract_strided_slice %498 {offsets = [0, 0], sizes = [2, 32], strides = [1, 1]} : vector<10x32xf32> to vector<2x32xf32>
    %c0_370 = arith.constant 0 : index
    %c0_371 = arith.constant 0 : index
    %c0_372 = arith.constant 0 : index
    %594 = vector.load %arg24[%c0_370, %c0_371, %c0_372] : memref<4x32x32xf32, #tpu.memory_space<vmem>>, vector<1x32x32xf32>
    %595 = vector.shape_cast %594 : vector<1x32x32xf32> to vector<32x32xf32>
    %cst_373 = arith.constant dense<0.000000e+00> : vector<2x32xf32>
    %596 = tpu.matmul %581, %595, %cst_373 {dimension_numbers = #tpu.dot_dimension_numbers<[1], [0], [0], [1], [0, 0, 1, 1], [], []>} : vector<2x32xf32>, vector<32x32xf32>, vector<2x32xf32> -> vector<2x32xf32>
    %c0_374 = arith.constant 0 : index
    %c0_375 = arith.constant 0 : index
    %c0_376 = arith.constant 0 : index
    %597 = vector.load %arg26[%c0_374, %c0_375, %c0_376] : memref<4x1x32xf32, #tpu.memory_space<vmem>>, vector<1x1x32xf32>
    %598 = vector.shape_cast %597 : vector<1x1x32xf32> to vector<1x32xf32>
    %599 = vector.broadcast %598 : vector<1x32xf32> to vector<2x32xf32>
    %600 = arith.addf %596, %599 : vector<2x32xf32>
    %c1_377 = arith.constant 1 : index
    %c0_378 = arith.constant 0 : index
    %c0_379 = arith.constant 0 : index
    %601 = vector.load %arg24[%c1_377, %c0_378, %c0_379] : memref<4x32x32xf32, #tpu.memory_space<vmem>>, vector<1x32x32xf32>
    %602 = vector.shape_cast %601 : vector<1x32x32xf32> to vector<32x32xf32>
    %cst_380 = arith.constant dense<0.000000e+00> : vector<2x32xf32>
    %603 = tpu.matmul %581, %602, %cst_380 {dimension_numbers = #tpu.dot_dimension_numbers<[1], [0], [0], [1], [0, 0, 1, 1], [], []>} : vector<2x32xf32>, vector<32x32xf32>, vector<2x32xf32> -> vector<2x32xf32>
    %c1_381 = arith.constant 1 : index
    %c0_382 = arith.constant 0 : index
    %c0_383 = arith.constant 0 : index
    %604 = vector.load %arg26[%c1_381, %c0_382, %c0_383] : memref<4x1x32xf32, #tpu.memory_space<vmem>>, vector<1x1x32xf32>
    %605 = vector.shape_cast %604 : vector<1x1x32xf32> to vector<1x32xf32>
    %606 = vector.broadcast %605 : vector<1x32xf32> to vector<2x32xf32>
    %607 = arith.addf %603, %606 : vector<2x32xf32>
    %c2_384 = arith.constant 2 : index
    %c0_385 = arith.constant 0 : index
    %c0_386 = arith.constant 0 : index
    %608 = vector.load %arg24[%c2_384, %c0_385, %c0_386] : memref<4x32x32xf32, #tpu.memory_space<vmem>>, vector<1x32x32xf32>
    %609 = vector.shape_cast %608 : vector<1x32x32xf32> to vector<32x32xf32>
    %cst_387 = arith.constant dense<0.000000e+00> : vector<2x32xf32>
    %610 = tpu.matmul %581, %609, %cst_387 {dimension_numbers = #tpu.dot_dimension_numbers<[1], [0], [0], [1], [0, 0, 1, 1], [], []>} : vector<2x32xf32>, vector<32x32xf32>, vector<2x32xf32> -> vector<2x32xf32>
    %c2_388 = arith.constant 2 : index
    %c0_389 = arith.constant 0 : index
    %c0_390 = arith.constant 0 : index
    %611 = vector.load %arg26[%c2_388, %c0_389, %c0_390] : memref<4x1x32xf32, #tpu.memory_space<vmem>>, vector<1x1x32xf32>
    %612 = vector.shape_cast %611 : vector<1x1x32xf32> to vector<1x32xf32>
    %613 = vector.broadcast %612 : vector<1x32xf32> to vector<2x32xf32>
    %614 = arith.addf %610, %613 : vector<2x32xf32>
    %c3_391 = arith.constant 3 : index
    %c0_392 = arith.constant 0 : index
    %c0_393 = arith.constant 0 : index
    %615 = vector.load %arg24[%c3_391, %c0_392, %c0_393] : memref<4x32x32xf32, #tpu.memory_space<vmem>>, vector<1x32x32xf32>
    %616 = vector.shape_cast %615 : vector<1x32x32xf32> to vector<32x32xf32>
    %cst_394 = arith.constant dense<0.000000e+00> : vector<2x32xf32>
    %617 = tpu.matmul %581, %616, %cst_394 {dimension_numbers = #tpu.dot_dimension_numbers<[1], [0], [0], [1], [0, 0, 1, 1], [], []>} : vector<2x32xf32>, vector<32x32xf32>, vector<2x32xf32> -> vector<2x32xf32>
    %c3_395 = arith.constant 3 : index
    %c0_396 = arith.constant 0 : index
    %c0_397 = arith.constant 0 : index
    %618 = vector.load %arg26[%c3_395, %c0_396, %c0_397] : memref<4x1x32xf32, #tpu.memory_space<vmem>>, vector<1x1x32xf32>
    %619 = vector.shape_cast %618 : vector<1x1x32xf32> to vector<1x32xf32>
    %620 = vector.broadcast %619 : vector<1x32xf32> to vector<2x32xf32>
    %621 = arith.addf %617, %620 : vector<2x32xf32>
    %622 = arith.addf %590, %600 : vector<2x32xf32>
    %623 = arith.negf %622 : vector<2x32xf32>
    %624 = math.exp %623 : vector<2x32xf32>
    %cst_398 = arith.constant 1.000000e+00 : f32
    %625 = vector.broadcast %cst_398 : f32 to vector<2x32xf32>
    %626 = arith.addf %625, %624 : vector<2x32xf32>
    %627 = arith.divf %625, %626 : vector<2x32xf32>
    %628 = arith.addf %591, %607 : vector<2x32xf32>
    %629 = arith.negf %628 : vector<2x32xf32>
    %630 = math.exp %629 : vector<2x32xf32>
    %cst_399 = arith.constant 1.000000e+00 : f32
    %631 = vector.broadcast %cst_399 : f32 to vector<2x32xf32>
    %632 = arith.addf %631, %630 : vector<2x32xf32>
    %633 = arith.divf %631, %632 : vector<2x32xf32>
    %634 = arith.addf %592, %614 : vector<2x32xf32>
    %635 = math.tanh %634 : vector<2x32xf32>
    %636 = arith.addf %593, %621 : vector<2x32xf32>
    %637 = arith.negf %636 : vector<2x32xf32>
    %638 = math.exp %637 : vector<2x32xf32>
    %cst_400 = arith.constant 1.000000e+00 : f32
    %639 = vector.broadcast %cst_400 : f32 to vector<2x32xf32>
    %640 = arith.addf %639, %638 : vector<2x32xf32>
    %641 = arith.divf %639, %640 : vector<2x32xf32>
    %642 = arith.mulf %633, %579 : vector<2x32xf32>
    %643 = arith.mulf %627, %635 : vector<2x32xf32>
    %644 = arith.addf %642, %643 : vector<2x32xf32>
    %645 = math.tanh %644 : vector<2x32xf32>
    %646 = arith.mulf %641, %645 : vector<2x32xf32>
    %c0_401 = arith.constant 0 : index
    %c0_402 = arith.constant 0 : index
    %647 = vector.load %arg27[%c0_401, %c0_402] : memref<32x128xf32, #tpu.memory_space<vmem>>, vector<32x128xf32>
    %cst_403 = arith.constant dense<0.000000e+00> : vector<2x128xf32>
    %648 = tpu.matmul %646, %647, %cst_403 {dimension_numbers = #tpu.dot_dimension_numbers<[1], [0], [0], [1], [0, 0, 1, 1], [], []>} : vector<2x32xf32>, vector<32x128xf32>, vector<2x128xf32> -> vector<2x128xf32>
    %c0_404 = arith.constant 0 : index
    %c0_405 = arith.constant 0 : index
    %649 = vector.load %arg28[%c0_404, %c0_405] : memref<1x128xf32, #tpu.memory_space<vmem>>, vector<1x128xf32>
    %650 = vector.broadcast %649 : vector<1x128xf32> to vector<2x128xf32>
    %651 = arith.addf %648, %650 : vector<2x128xf32>
    %c1_406 = arith.constant 1 : index
    %c0_407 = arith.constant 0 : index
    %c0_408 = arith.constant 0 : index
    %652 = vector.load %arg30[%c1_406, %c0_407, %c0_408] : memref<6x2x128xf32, #tpu.memory_space<vmem>>, vector<1x2x128xf32>
    %653 = vector.shape_cast %652 : vector<1x2x128xf32> to vector<2x128xf32>
    %654 = vector.shape_cast %651 : vector<2x128xf32> to vector<1x2x128xf32>
    tpu.vector_store %arg30[%c1_406, %c0_407, %c0_408], %654 {strides = array<i32>} : memref<6x2x128xf32, #tpu.memory_space<vmem>>, vector<1x2x128xf32>,
    %655 = vector.extract_strided_slice %477 {offsets = [2, 0], sizes = [2, 32], strides = [1, 1]} : vector<10x32xf32> to vector<2x32xf32>
    %656 = vector.extract_strided_slice %484 {offsets = [2, 0], sizes = [2, 32], strides = [1, 1]} : vector<10x32xf32> to vector<2x32xf32>
    %657 = vector.extract_strided_slice %491 {offsets = [2, 0], sizes = [2, 32], strides = [1, 1]} : vector<10x32xf32> to vector<2x32xf32>
    %658 = vector.extract_strided_slice %498 {offsets = [2, 0], sizes = [2, 32], strides = [1, 1]} : vector<10x32xf32> to vector<2x32xf32>
    %c0_409 = arith.constant 0 : index
    %c0_410 = arith.constant 0 : index
    %c0_411 = arith.constant 0 : index
    %659 = vector.load %arg24[%c0_409, %c0_410, %c0_411] : memref<4x32x32xf32, #tpu.memory_space<vmem>>, vector<1x32x32xf32>
    %660 = vector.shape_cast %659 : vector<1x32x32xf32> to vector<32x32xf32>
    %cst_412 = arith.constant dense<0.000000e+00> : vector<2x32xf32>
    %661 = tpu.matmul %646, %660, %cst_412 {dimension_numbers = #tpu.dot_dimension_numbers<[1], [0], [0], [1], [0, 0, 1, 1], [], []>} : vector<2x32xf32>, vector<32x32xf32>, vector<2x32xf32> -> vector<2x32xf32>
    %c0_413 = arith.constant 0 : index
    %c0_414 = arith.constant 0 : index
    %c0_415 = arith.constant 0 : index
    %662 = vector.load %arg26[%c0_413, %c0_414, %c0_415] : memref<4x1x32xf32, #tpu.memory_space<vmem>>, vector<1x1x32xf32>
    %663 = vector.shape_cast %662 : vector<1x1x32xf32> to vector<1x32xf32>
    %664 = vector.broadcast %663 : vector<1x32xf32> to vector<2x32xf32>
    %665 = arith.addf %661, %664 : vector<2x32xf32>
    %c1_416 = arith.constant 1 : index
    %c0_417 = arith.constant 0 : index
    %c0_418 = arith.constant 0 : index
    %666 = vector.load %arg24[%c1_416, %c0_417, %c0_418] : memref<4x32x32xf32, #tpu.memory_space<vmem>>, vector<1x32x32xf32>
    %667 = vector.shape_cast %666 : vector<1x32x32xf32> to vector<32x32xf32>
    %cst_419 = arith.constant dense<0.000000e+00> : vector<2x32xf32>
    %668 = tpu.matmul %646, %667, %cst_419 {dimension_numbers = #tpu.dot_dimension_numbers<[1], [0], [0], [1], [0, 0, 1, 1], [], []>} : vector<2x32xf32>, vector<32x32xf32>, vector<2x32xf32> -> vector<2x32xf32>
    %c1_420 = arith.constant 1 : index
    %c0_421 = arith.constant 0 : index
    %c0_422 = arith.constant 0 : index
    %669 = vector.load %arg26[%c1_420, %c0_421, %c0_422] : memref<4x1x32xf32, #tpu.memory_space<vmem>>, vector<1x1x32xf32>
    %670 = vector.shape_cast %669 : vector<1x1x32xf32> to vector<1x32xf32>
    %671 = vector.broadcast %670 : vector<1x32xf32> to vector<2x32xf32>
    %672 = arith.addf %668, %671 : vector<2x32xf32>
    %c2_423 = arith.constant 2 : index
    %c0_424 = arith.constant 0 : index
    %c0_425 = arith.constant 0 : index
    %673 = vector.load %arg24[%c2_423, %c0_424, %c0_425] : memref<4x32x32xf32, #tpu.memory_space<vmem>>, vector<1x32x32xf32>
    %674 = vector.shape_cast %673 : vector<1x32x32xf32> to vector<32x32xf32>
    %cst_426 = arith.constant dense<0.000000e+00> : vector<2x32xf32>
    %675 = tpu.matmul %646, %674, %cst_426 {dimension_numbers = #tpu.dot_dimension_numbers<[1], [0], [0], [1], [0, 0, 1, 1], [], []>} : vector<2x32xf32>, vector<32x32xf32>, vector<2x32xf32> -> vector<2x32xf32>
    %c2_427 = arith.constant 2 : index
    %c0_428 = arith.constant 0 : index
    %c0_429 = arith.constant 0 : index
    %676 = vector.load %arg26[%c2_427, %c0_428, %c0_429] : memref<4x1x32xf32, #tpu.memory_space<vmem>>, vector<1x1x32xf32>
    %677 = vector.shape_cast %676 : vector<1x1x32xf32> to vector<1x32xf32>
    %678 = vector.broadcast %677 : vector<1x32xf32> to vector<2x32xf32>
    %679 = arith.addf %675, %678 : vector<2x32xf32>
    %c3_430 = arith.constant 3 : index
    %c0_431 = arith.constant 0 : index
    %c0_432 = arith.constant 0 : index
    %680 = vector.load %arg24[%c3_430, %c0_431, %c0_432] : memref<4x32x32xf32, #tpu.memory_space<vmem>>, vector<1x32x32xf32>
    %681 = vector.shape_cast %680 : vector<1x32x32xf32> to vector<32x32xf32>
    %cst_433 = arith.constant dense<0.000000e+00> : vector<2x32xf32>
    %682 = tpu.matmul %646, %681, %cst_433 {dimension_numbers = #tpu.dot_dimension_numbers<[1], [0], [0], [1], [0, 0, 1, 1], [], []>} : vector<2x32xf32>, vector<32x32xf32>, vector<2x32xf32> -> vector<2x32xf32>
    %c3_434 = arith.constant 3 : index
    %c0_435 = arith.constant 0 : index
    %c0_436 = arith.constant 0 : index
    %683 = vector.load %arg26[%c3_434, %c0_435, %c0_436] : memref<4x1x32xf32, #tpu.memory_space<vmem>>, vector<1x1x32xf32>
    %684 = vector.shape_cast %683 : vector<1x1x32xf32> to vector<1x32xf32>
    %685 = vector.broadcast %684 : vector<1x32xf32> to vector<2x32xf32>
    %686 = arith.addf %682, %685 : vector<2x32xf32>
    %687 = arith.addf %655, %665 : vector<2x32xf32>
    %688 = arith.negf %687 : vector<2x32xf32>
    %689 = math.exp %688 : vector<2x32xf32>
    %cst_437 = arith.constant 1.000000e+00 : f32
    %690 = vector.broadcast %cst_437 : f32 to vector<2x32xf32>
    %691 = arith.addf %690, %689 : vector<2x32xf32>
    %692 = arith.divf %690, %691 : vector<2x32xf32>
    %693 = arith.addf %656, %672 : vector<2x32xf32>
    %694 = arith.negf %693 : vector<2x32xf32>
    %695 = math.exp %694 : vector<2x32xf32>
    %cst_438 = arith.constant 1.000000e+00 : f32
    %696 = vector.broadcast %cst_438 : f32 to vector<2x32xf32>
    %697 = arith.addf %696, %695 : vector<2x32xf32>
    %698 = arith.divf %696, %697 : vector<2x32xf32>
    %699 = arith.addf %657, %679 : vector<2x32xf32>
    %700 = math.tanh %699 : vector<2x32xf32>
    %701 = arith.addf %658, %686 : vector<2x32xf32>
    %702 = arith.negf %701 : vector<2x32xf32>
    %703 = math.exp %702 : vector<2x32xf32>
    %cst_439 = arith.constant 1.000000e+00 : f32
    %704 = vector.broadcast %cst_439 : f32 to vector<2x32xf32>
    %705 = arith.addf %704, %703 : vector<2x32xf32>
    %706 = arith.divf %704, %705 : vector<2x32xf32>
    %707 = arith.mulf %698, %644 : vector<2x32xf32>
    %708 = arith.mulf %692, %700 : vector<2x32xf32>
    %709 = arith.addf %707, %708 : vector<2x32xf32>
    %710 = math.tanh %709 : vector<2x32xf32>
    %711 = arith.mulf %706, %710 : vector<2x32xf32>
    %c0_440 = arith.constant 0 : index
    %c0_441 = arith.constant 0 : index
    %712 = vector.load %arg27[%c0_440, %c0_441] : memref<32x128xf32, #tpu.memory_space<vmem>>, vector<32x128xf32>
    %cst_442 = arith.constant dense<0.000000e+00> : vector<2x128xf32>
    %713 = tpu.matmul %711, %712, %cst_442 {dimension_numbers = #tpu.dot_dimension_numbers<[1], [0], [0], [1], [0, 0, 1, 1], [], []>} : vector<2x32xf32>, vector<32x128xf32>, vector<2x128xf32> -> vector<2x128xf32>
    %c0_443 = arith.constant 0 : index
    %c0_444 = arith.constant 0 : index
    %714 = vector.load %arg28[%c0_443, %c0_444] : memref<1x128xf32, #tpu.memory_space<vmem>>, vector<1x128xf32>
    %715 = vector.broadcast %714 : vector<1x128xf32> to vector<2x128xf32>
    %716 = arith.addf %713, %715 : vector<2x128xf32>
    %c2_445 = arith.constant 2 : index
    %c0_446 = arith.constant 0 : index
    %c0_447 = arith.constant 0 : index
    %717 = vector.load %arg30[%c2_445, %c0_446, %c0_447] : memref<6x2x128xf32, #tpu.memory_space<vmem>>, vector<1x2x128xf32>
    %718 = vector.shape_cast %717 : vector<1x2x128xf32> to vector<2x128xf32>
    %719 = vector.shape_cast %716 : vector<2x128xf32> to vector<1x2x128xf32>
    tpu.vector_store %arg30[%c2_445, %c0_446, %c0_447], %719 {strides = array<i32>} : memref<6x2x128xf32, #tpu.memory_space<vmem>>, vector<1x2x128xf32>,
    %720 = vector.extract_strided_slice %477 {offsets = [4, 0], sizes = [2, 32], strides = [1, 1]} : vector<10x32xf32> to vector<2x32xf32>
    %721 = vector.extract_strided_slice %484 {offsets = [4, 0], sizes = [2, 32], strides = [1, 1]} : vector<10x32xf32> to vector<2x32xf32>
    %722 = vector.extract_strided_slice %491 {offsets = [4, 0], sizes = [2, 32], strides = [1, 1]} : vector<10x32xf32> to vector<2x32xf32>
    %723 = vector.extract_strided_slice %498 {offsets = [4, 0], sizes = [2, 32], strides = [1, 1]} : vector<10x32xf32> to vector<2x32xf32>
    %c0_448 = arith.constant 0 : index
    %c0_449 = arith.constant 0 : index
    %c0_450 = arith.constant 0 : index
    %724 = vector.load %arg24[%c0_448, %c0_449, %c0_450] : memref<4x32x32xf32, #tpu.memory_space<vmem>>, vector<1x32x32xf32>
    %725 = vector.shape_cast %724 : vector<1x32x32xf32> to vector<32x32xf32>
    %cst_451 = arith.constant dense<0.000000e+00> : vector<2x32xf32>
    %726 = tpu.matmul %711, %725, %cst_451 {dimension_numbers = #tpu.dot_dimension_numbers<[1], [0], [0], [1], [0, 0, 1, 1], [], []>} : vector<2x32xf32>, vector<32x32xf32>, vector<2x32xf32> -> vector<2x32xf32>
    %c0_452 = arith.constant 0 : index
    %c0_453 = arith.constant 0 : index
    %c0_454 = arith.constant 0 : index
    %727 = vector.load %arg26[%c0_452, %c0_453, %c0_454] : memref<4x1x32xf32, #tpu.memory_space<vmem>>, vector<1x1x32xf32>
    %728 = vector.shape_cast %727 : vector<1x1x32xf32> to vector<1x32xf32>
    %729 = vector.broadcast %728 : vector<1x32xf32> to vector<2x32xf32>
    %730 = arith.addf %726, %729 : vector<2x32xf32>
    %c1_455 = arith.constant 1 : index
    %c0_456 = arith.constant 0 : index
    %c0_457 = arith.constant 0 : index
    %731 = vector.load %arg24[%c1_455, %c0_456, %c0_457] : memref<4x32x32xf32, #tpu.memory_space<vmem>>, vector<1x32x32xf32>
    %732 = vector.shape_cast %731 : vector<1x32x32xf32> to vector<32x32xf32>
    %cst_458 = arith.constant dense<0.000000e+00> : vector<2x32xf32>
    %733 = tpu.matmul %711, %732, %cst_458 {dimension_numbers = #tpu.dot_dimension_numbers<[1], [0], [0], [1], [0, 0, 1, 1], [], []>} : vector<2x32xf32>, vector<32x32xf32>, vector<2x32xf32> -> vector<2x32xf32>
    %c1_459 = arith.constant 1 : index
    %c0_460 = arith.constant 0 : index
    %c0_461 = arith.constant 0 : index
    %734 = vector.load %arg26[%c1_459, %c0_460, %c0_461] : memref<4x1x32xf32, #tpu.memory_space<vmem>>, vector<1x1x32xf32>
    %735 = vector.shape_cast %734 : vector<1x1x32xf32> to vector<1x32xf32>
    %736 = vector.broadcast %735 : vector<1x32xf32> to vector<2x32xf32>
    %737 = arith.addf %733, %736 : vector<2x32xf32>
    %c2_462 = arith.constant 2 : index
    %c0_463 = arith.constant 0 : index
    %c0_464 = arith.constant 0 : index
    %738 = vector.load %arg24[%c2_462, %c0_463, %c0_464] : memref<4x32x32xf32, #tpu.memory_space<vmem>>, vector<1x32x32xf32>
    %739 = vector.shape_cast %738 : vector<1x32x32xf32> to vector<32x32xf32>
    %cst_465 = arith.constant dense<0.000000e+00> : vector<2x32xf32>
    %740 = tpu.matmul %711, %739, %cst_465 {dimension_numbers = #tpu.dot_dimension_numbers<[1], [0], [0], [1], [0, 0, 1, 1], [], []>} : vector<2x32xf32>, vector<32x32xf32>, vector<2x32xf32> -> vector<2x32xf32>
    %c2_466 = arith.constant 2 : index
    %c0_467 = arith.constant 0 : index
    %c0_468 = arith.constant 0 : index
    %741 = vector.load %arg26[%c2_466, %c0_467, %c0_468] : memref<4x1x32xf32, #tpu.memory_space<vmem>>, vector<1x1x32xf32>
    %742 = vector.shape_cast %741 : vector<1x1x32xf32> to vector<1x32xf32>
    %743 = vector.broadcast %742 : vector<1x32xf32> to vector<2x32xf32>
    %744 = arith.addf %740, %743 : vector<2x32xf32>
    %c3_469 = arith.constant 3 : index
    %c0_470 = arith.constant 0 : index
    %c0_471 = arith.constant 0 : index
    %745 = vector.load %arg24[%c3_469, %c0_470, %c0_471] : memref<4x32x32xf32, #tpu.memory_space<vmem>>, vector<1x32x32xf32>
    %746 = vector.shape_cast %745 : vector<1x32x32xf32> to vector<32x32xf32>
    %cst_472 = arith.constant dense<0.000000e+00> : vector<2x32xf32>
    %747 = tpu.matmul %711, %746, %cst_472 {dimension_numbers = #tpu.dot_dimension_numbers<[1], [0], [0], [1], [0, 0, 1, 1], [], []>} : vector<2x32xf32>, vector<32x32xf32>, vector<2x32xf32> -> vector<2x32xf32>
    %c3_473 = arith.constant 3 : index
    %c0_474 = arith.constant 0 : index
    %c0_475 = arith.constant 0 : index
    %748 = vector.load %arg26[%c3_473, %c0_474, %c0_475] : memref<4x1x32xf32, #tpu.memory_space<vmem>>, vector<1x1x32xf32>
    %749 = vector.shape_cast %748 : vector<1x1x32xf32> to vector<1x32xf32>
    %750 = vector.broadcast %749 : vector<1x32xf32> to vector<2x32xf32>
    %751 = arith.addf %747, %750 : vector<2x32xf32>
    %752 = arith.addf %720, %730 : vector<2x32xf32>
    %753 = arith.negf %752 : vector<2x32xf32>
    %754 = math.exp %753 : vector<2x32xf32>
    %cst_476 = arith.constant 1.000000e+00 : f32
    %755 = vector.broadcast %cst_476 : f32 to vector<2x32xf32>
    %756 = arith.addf %755, %754 : vector<2x32xf32>
    %757 = arith.divf %755, %756 : vector<2x32xf32>
    %758 = arith.addf %721, %737 : vector<2x32xf32>
    %759 = arith.negf %758 : vector<2x32xf32>
    %760 = math.exp %759 : vector<2x32xf32>
    %cst_477 = arith.constant 1.000000e+00 : f32
    %761 = vector.broadcast %cst_477 : f32 to vector<2x32xf32>
    %762 = arith.addf %761, %760 : vector<2x32xf32>
    %763 = arith.divf %761, %762 : vector<2x32xf32>
    %764 = arith.addf %722, %744 : vector<2x32xf32>
    %765 = math.tanh %764 : vector<2x32xf32>
    %766 = arith.addf %723, %751 : vector<2x32xf32>
    %767 = arith.negf %766 : vector<2x32xf32>
    %768 = math.exp %767 : vector<2x32xf32>
    %cst_478 = arith.constant 1.000000e+00 : f32
    %769 = vector.broadcast %cst_478 : f32 to vector<2x32xf32>
    %770 = arith.addf %769, %768 : vector<2x32xf32>
    %771 = arith.divf %769, %770 : vector<2x32xf32>
    %772 = arith.mulf %763, %709 : vector<2x32xf32>
    %773 = arith.mulf %757, %765 : vector<2x32xf32>
    %774 = arith.addf %772, %773 : vector<2x32xf32>
    %775 = math.tanh %774 : vector<2x32xf32>
    %776 = arith.mulf %771, %775 : vector<2x32xf32>
    %c0_479 = arith.constant 0 : index
    %c0_480 = arith.constant 0 : index
    %777 = vector.load %arg27[%c0_479, %c0_480] : memref<32x128xf32, #tpu.memory_space<vmem>>, vector<32x128xf32>
    %cst_481 = arith.constant dense<0.000000e+00> : vector<2x128xf32>
    %778 = tpu.matmul %776, %777, %cst_481 {dimension_numbers = #tpu.dot_dimension_numbers<[1], [0], [0], [1], [0, 0, 1, 1], [], []>} : vector<2x32xf32>, vector<32x128xf32>, vector<2x128xf32> -> vector<2x128xf32>
    %c0_482 = arith.constant 0 : index
    %c0_483 = arith.constant 0 : index
    %779 = vector.load %arg28[%c0_482, %c0_483] : memref<1x128xf32, #tpu.memory_space<vmem>>, vector<1x128xf32>
    %780 = vector.broadcast %779 : vector<1x128xf32> to vector<2x128xf32>
    %781 = arith.addf %778, %780 : vector<2x128xf32>
    %c3_484 = arith.constant 3 : index
    %c0_485 = arith.constant 0 : index
    %c0_486 = arith.constant 0 : index
    %782 = vector.load %arg30[%c3_484, %c0_485, %c0_486] : memref<6x2x128xf32, #tpu.memory_space<vmem>>, vector<1x2x128xf32>
    %783 = vector.shape_cast %782 : vector<1x2x128xf32> to vector<2x128xf32>
    %784 = vector.shape_cast %781 : vector<2x128xf32> to vector<1x2x128xf32>
    tpu.vector_store %arg30[%c3_484, %c0_485, %c0_486], %784 {strides = array<i32>} : memref<6x2x128xf32, #tpu.memory_space<vmem>>, vector<1x2x128xf32>,
    %785 = vector.extract_strided_slice %477 {offsets = [6, 0], sizes = [2, 32], strides = [1, 1]} : vector<10x32xf32> to vector<2x32xf32>
    %786 = vector.extract_strided_slice %484 {offsets = [6, 0], sizes = [2, 32], strides = [1, 1]} : vector<10x32xf32> to vector<2x32xf32>
    %787 = vector.extract_strided_slice %491 {offsets = [6, 0], sizes = [2, 32], strides = [1, 1]} : vector<10x32xf32> to vector<2x32xf32>
    %788 = vector.extract_strided_slice %498 {offsets = [6, 0], sizes = [2, 32], strides = [1, 1]} : vector<10x32xf32> to vector<2x32xf32>
    %c0_487 = arith.constant 0 : index
    %c0_488 = arith.constant 0 : index
    %c0_489 = arith.constant 0 : index
    %789 = vector.load %arg24[%c0_487, %c0_488, %c0_489] : memref<4x32x32xf32, #tpu.memory_space<vmem>>, vector<1x32x32xf32>
    %790 = vector.shape_cast %789 : vector<1x32x32xf32> to vector<32x32xf32>
    %cst_490 = arith.constant dense<0.000000e+00> : vector<2x32xf32>
    %791 = tpu.matmul %776, %790, %cst_490 {dimension_numbers = #tpu.dot_dimension_numbers<[1], [0], [0], [1], [0, 0, 1, 1], [], []>} : vector<2x32xf32>, vector<32x32xf32>, vector<2x32xf32> -> vector<2x32xf32>
    %c0_491 = arith.constant 0 : index
    %c0_492 = arith.constant 0 : index
    %c0_493 = arith.constant 0 : index
    %792 = vector.load %arg26[%c0_491, %c0_492, %c0_493] : memref<4x1x32xf32, #tpu.memory_space<vmem>>, vector<1x1x32xf32>
    %793 = vector.shape_cast %792 : vector<1x1x32xf32> to vector<1x32xf32>
    %794 = vector.broadcast %793 : vector<1x32xf32> to vector<2x32xf32>
    %795 = arith.addf %791, %794 : vector<2x32xf32>
    %c1_494 = arith.constant 1 : index
    %c0_495 = arith.constant 0 : index
    %c0_496 = arith.constant 0 : index
    %796 = vector.load %arg24[%c1_494, %c0_495, %c0_496] : memref<4x32x32xf32, #tpu.memory_space<vmem>>, vector<1x32x32xf32>
    %797 = vector.shape_cast %796 : vector<1x32x32xf32> to vector<32x32xf32>
    %cst_497 = arith.constant dense<0.000000e+00> : vector<2x32xf32>
    %798 = tpu.matmul %776, %797, %cst_497 {dimension_numbers = #tpu.dot_dimension_numbers<[1], [0], [0], [1], [0, 0, 1, 1], [], []>} : vector<2x32xf32>, vector<32x32xf32>, vector<2x32xf32> -> vector<2x32xf32>
    %c1_498 = arith.constant 1 : index
    %c0_499 = arith.constant 0 : index
    %c0_500 = arith.constant 0 : index
    %799 = vector.load %arg26[%c1_498, %c0_499, %c0_500] : memref<4x1x32xf32, #tpu.memory_space<vmem>>, vector<1x1x32xf32>
    %800 = vector.shape_cast %799 : vector<1x1x32xf32> to vector<1x32xf32>
    %801 = vector.broadcast %800 : vector<1x32xf32> to vector<2x32xf32>
    %802 = arith.addf %798, %801 : vector<2x32xf32>
    %c2_501 = arith.constant 2 : index
    %c0_502 = arith.constant 0 : index
    %c0_503 = arith.constant 0 : index
    %803 = vector.load %arg24[%c2_501, %c0_502, %c0_503] : memref<4x32x32xf32, #tpu.memory_space<vmem>>, vector<1x32x32xf32>
    %804 = vector.shape_cast %803 : vector<1x32x32xf32> to vector<32x32xf32>
    %cst_504 = arith.constant dense<0.000000e+00> : vector<2x32xf32>
    %805 = tpu.matmul %776, %804, %cst_504 {dimension_numbers = #tpu.dot_dimension_numbers<[1], [0], [0], [1], [0, 0, 1, 1], [], []>} : vector<2x32xf32>, vector<32x32xf32>, vector<2x32xf32> -> vector<2x32xf32>
    %c2_505 = arith.constant 2 : index
    %c0_506 = arith.constant 0 : index
    %c0_507 = arith.constant 0 : index
    %806 = vector.load %arg26[%c2_505, %c0_506, %c0_507] : memref<4x1x32xf32, #tpu.memory_space<vmem>>, vector<1x1x32xf32>
    %807 = vector.shape_cast %806 : vector<1x1x32xf32> to vector<1x32xf32>
    %808 = vector.broadcast %807 : vector<1x32xf32> to vector<2x32xf32>
    %809 = arith.addf %805, %808 : vector<2x32xf32>
    %c3_508 = arith.constant 3 : index
    %c0_509 = arith.constant 0 : index
    %c0_510 = arith.constant 0 : index
    %810 = vector.load %arg24[%c3_508, %c0_509, %c0_510] : memref<4x32x32xf32, #tpu.memory_space<vmem>>, vector<1x32x32xf32>
    %811 = vector.shape_cast %810 : vector<1x32x32xf32> to vector<32x32xf32>
    %cst_511 = arith.constant dense<0.000000e+00> : vector<2x32xf32>
    %812 = tpu.matmul %776, %811, %cst_511 {dimension_numbers = #tpu.dot_dimension_numbers<[1], [0], [0], [1], [0, 0, 1, 1], [], []>} : vector<2x32xf32>, vector<32x32xf32>, vector<2x32xf32> -> vector<2x32xf32>
    %c3_512 = arith.constant 3 : index
    %c0_513 = arith.constant 0 : index
    %c0_514 = arith.constant 0 : index
    %813 = vector.load %arg26[%c3_512, %c0_513, %c0_514] : memref<4x1x32xf32, #tpu.memory_space<vmem>>, vector<1x1x32xf32>
    %814 = vector.shape_cast %813 : vector<1x1x32xf32> to vector<1x32xf32>
    %815 = vector.broadcast %814 : vector<1x32xf32> to vector<2x32xf32>
    %816 = arith.addf %812, %815 : vector<2x32xf32>
    %817 = arith.addf %785, %795 : vector<2x32xf32>
    %818 = arith.negf %817 : vector<2x32xf32>
    %819 = math.exp %818 : vector<2x32xf32>
    %cst_515 = arith.constant 1.000000e+00 : f32
    %820 = vector.broadcast %cst_515 : f32 to vector<2x32xf32>
    %821 = arith.addf %820, %819 : vector<2x32xf32>
    %822 = arith.divf %820, %821 : vector<2x32xf32>
    %823 = arith.addf %786, %802 : vector<2x32xf32>
    %824 = arith.negf %823 : vector<2x32xf32>
    %825 = math.exp %824 : vector<2x32xf32>
    %cst_516 = arith.constant 1.000000e+00 : f32
    %826 = vector.broadcast %cst_516 : f32 to vector<2x32xf32>
    %827 = arith.addf %826, %825 : vector<2x32xf32>
    %828 = arith.divf %826, %827 : vector<2x32xf32>
    %829 = arith.addf %787, %809 : vector<2x32xf32>
    %830 = math.tanh %829 : vector<2x32xf32>
    %831 = arith.addf %788, %816 : vector<2x32xf32>
    %832 = arith.negf %831 : vector<2x32xf32>
    %833 = math.exp %832 : vector<2x32xf32>
    %cst_517 = arith.constant 1.000000e+00 : f32
    %834 = vector.broadcast %cst_517 : f32 to vector<2x32xf32>
    %835 = arith.addf %834, %833 : vector<2x32xf32>
    %836 = arith.divf %834, %835 : vector<2x32xf32>
    %837 = arith.mulf %828, %774 : vector<2x32xf32>
    %838 = arith.mulf %822, %830 : vector<2x32xf32>
    %839 = arith.addf %837, %838 : vector<2x32xf32>
    %840 = math.tanh %839 : vector<2x32xf32>
    %841 = arith.mulf %836, %840 : vector<2x32xf32>
    %c0_518 = arith.constant 0 : index
    %c0_519 = arith.constant 0 : index
    %842 = vector.load %arg27[%c0_518, %c0_519] : memref<32x128xf32, #tpu.memory_space<vmem>>, vector<32x128xf32>
    %cst_520 = arith.constant dense<0.000000e+00> : vector<2x128xf32>
    %843 = tpu.matmul %841, %842, %cst_520 {dimension_numbers = #tpu.dot_dimension_numbers<[1], [0], [0], [1], [0, 0, 1, 1], [], []>} : vector<2x32xf32>, vector<32x128xf32>, vector<2x128xf32> -> vector<2x128xf32>
    %c0_521 = arith.constant 0 : index
    %c0_522 = arith.constant 0 : index
    %844 = vector.load %arg28[%c0_521, %c0_522] : memref<1x128xf32, #tpu.memory_space<vmem>>, vector<1x128xf32>
    %845 = vector.broadcast %844 : vector<1x128xf32> to vector<2x128xf32>
    %846 = arith.addf %843, %845 : vector<2x128xf32>
    %c4 = arith.constant 4 : index
    %c0_523 = arith.constant 0 : index
    %c0_524 = arith.constant 0 : index
    %847 = vector.load %arg30[%c4, %c0_523, %c0_524] : memref<6x2x128xf32, #tpu.memory_space<vmem>>, vector<1x2x128xf32>
    %848 = vector.shape_cast %847 : vector<1x2x128xf32> to vector<2x128xf32>
    %849 = vector.shape_cast %846 : vector<2x128xf32> to vector<1x2x128xf32>
    tpu.vector_store %arg30[%c4, %c0_523, %c0_524], %849 {strides = array<i32>} : memref<6x2x128xf32, #tpu.memory_space<vmem>>, vector<1x2x128xf32>,
    %850 = vector.extract_strided_slice %477 {offsets = [8, 0], sizes = [2, 32], strides = [1, 1]} : vector<10x32xf32> to vector<2x32xf32>
    %851 = vector.extract_strided_slice %484 {offsets = [8, 0], sizes = [2, 32], strides = [1, 1]} : vector<10x32xf32> to vector<2x32xf32>
    %852 = vector.extract_strided_slice %491 {offsets = [8, 0], sizes = [2, 32], strides = [1, 1]} : vector<10x32xf32> to vector<2x32xf32>
    %853 = vector.extract_strided_slice %498 {offsets = [8, 0], sizes = [2, 32], strides = [1, 1]} : vector<10x32xf32> to vector<2x32xf32>
    %c0_525 = arith.constant 0 : index
    %c0_526 = arith.constant 0 : index
    %c0_527 = arith.constant 0 : index
    %854 = vector.load %arg24[%c0_525, %c0_526, %c0_527] : memref<4x32x32xf32, #tpu.memory_space<vmem>>, vector<1x32x32xf32>
    %855 = vector.shape_cast %854 : vector<1x32x32xf32> to vector<32x32xf32>
    %cst_528 = arith.constant dense<0.000000e+00> : vector<2x32xf32>
    %856 = tpu.matmul %841, %855, %cst_528 {dimension_numbers = #tpu.dot_dimension_numbers<[1], [0], [0], [1], [0, 0, 1, 1], [], []>} : vector<2x32xf32>, vector<32x32xf32>, vector<2x32xf32> -> vector<2x32xf32>
    %c0_529 = arith.constant 0 : index
    %c0_530 = arith.constant 0 : index
    %c0_531 = arith.constant 0 : index
    %857 = vector.load %arg26[%c0_529, %c0_530, %c0_531] : memref<4x1x32xf32, #tpu.memory_space<vmem>>, vector<1x1x32xf32>
    %858 = vector.shape_cast %857 : vector<1x1x32xf32> to vector<1x32xf32>
    %859 = vector.broadcast %858 : vector<1x32xf32> to vector<2x32xf32>
    %860 = arith.addf %856, %859 : vector<2x32xf32>
    %c1_532 = arith.constant 1 : index
    %c0_533 = arith.constant 0 : index
    %c0_534 = arith.constant 0 : index
    %861 = vector.load %arg24[%c1_532, %c0_533, %c0_534] : memref<4x32x32xf32, #tpu.memory_space<vmem>>, vector<1x32x32xf32>
    %862 = vector.shape_cast %861 : vector<1x32x32xf32> to vector<32x32xf32>
    %cst_535 = arith.constant dense<0.000000e+00> : vector<2x32xf32>
    %863 = tpu.matmul %841, %862, %cst_535 {dimension_numbers = #tpu.dot_dimension_numbers<[1], [0], [0], [1], [0, 0, 1, 1], [], []>} : vector<2x32xf32>, vector<32x32xf32>, vector<2x32xf32> -> vector<2x32xf32>
    %c1_536 = arith.constant 1 : index
    %c0_537 = arith.constant 0 : index
    %c0_538 = arith.constant 0 : index
    %864 = vector.load %arg26[%c1_536, %c0_537, %c0_538] : memref<4x1x32xf32, #tpu.memory_space<vmem>>, vector<1x1x32xf32>
    %865 = vector.shape_cast %864 : vector<1x1x32xf32> to vector<1x32xf32>
    %866 = vector.broadcast %865 : vector<1x32xf32> to vector<2x32xf32>
    %867 = arith.addf %863, %866 : vector<2x32xf32>
    %c2_539 = arith.constant 2 : index
    %c0_540 = arith.constant 0 : index
    %c0_541 = arith.constant 0 : index
    %868 = vector.load %arg24[%c2_539, %c0_540, %c0_541] : memref<4x32x32xf32, #tpu.memory_space<vmem>>, vector<1x32x32xf32>
    %869 = vector.shape_cast %868 : vector<1x32x32xf32> to vector<32x32xf32>
    %cst_542 = arith.constant dense<0.000000e+00> : vector<2x32xf32>
    %870 = tpu.matmul %841, %869, %cst_542 {dimension_numbers = #tpu.dot_dimension_numbers<[1], [0], [0], [1], [0, 0, 1, 1], [], []>} : vector<2x32xf32>, vector<32x32xf32>, vector<2x32xf32> -> vector<2x32xf32>
    %c2_543 = arith.constant 2 : index
    %c0_544 = arith.constant 0 : index
    %c0_545 = arith.constant 0 : index
    %871 = vector.load %arg26[%c2_543, %c0_544, %c0_545] : memref<4x1x32xf32, #tpu.memory_space<vmem>>, vector<1x1x32xf32>
    %872 = vector.shape_cast %871 : vector<1x1x32xf32> to vector<1x32xf32>
    %873 = vector.broadcast %872 : vector<1x32xf32> to vector<2x32xf32>
    %874 = arith.addf %870, %873 : vector<2x32xf32>
    %c3_546 = arith.constant 3 : index
    %c0_547 = arith.constant 0 : index
    %c0_548 = arith.constant 0 : index
    %875 = vector.load %arg24[%c3_546, %c0_547, %c0_548] : memref<4x32x32xf32, #tpu.memory_space<vmem>>, vector<1x32x32xf32>
    %876 = vector.shape_cast %875 : vector<1x32x32xf32> to vector<32x32xf32>
    %cst_549 = arith.constant dense<0.000000e+00> : vector<2x32xf32>
    %877 = tpu.matmul %841, %876, %cst_549 {dimension_numbers = #tpu.dot_dimension_numbers<[1], [0], [0], [1], [0, 0, 1, 1], [], []>} : vector<2x32xf32>, vector<32x32xf32>, vector<2x32xf32> -> vector<2x32xf32>
    %c3_550 = arith.constant 3 : index
    %c0_551 = arith.constant 0 : index
    %c0_552 = arith.constant 0 : index
    %878 = vector.load %arg26[%c3_550, %c0_551, %c0_552] : memref<4x1x32xf32, #tpu.memory_space<vmem>>, vector<1x1x32xf32>
    %879 = vector.shape_cast %878 : vector<1x1x32xf32> to vector<1x32xf32>
    %880 = vector.broadcast %879 : vector<1x32xf32> to vector<2x32xf32>
    %881 = arith.addf %877, %880 : vector<2x32xf32>
    %882 = arith.addf %850, %860 : vector<2x32xf32>
    %883 = arith.negf %882 : vector<2x32xf32>
    %884 = math.exp %883 : vector<2x32xf32>
    %cst_553 = arith.constant 1.000000e+00 : f32
    %885 = vector.broadcast %cst_553 : f32 to vector<2x32xf32>
    %886 = arith.addf %885, %884 : vector<2x32xf32>
    %887 = arith.divf %885, %886 : vector<2x32xf32>
    %888 = arith.addf %851, %867 : vector<2x32xf32>
    %889 = arith.negf %888 : vector<2x32xf32>
    %890 = math.exp %889 : vector<2x32xf32>
    %cst_554 = arith.constant 1.000000e+00 : f32
    %891 = vector.broadcast %cst_554 : f32 to vector<2x32xf32>
    %892 = arith.addf %891, %890 : vector<2x32xf32>
    %893 = arith.divf %891, %892 : vector<2x32xf32>
    %894 = arith.addf %852, %874 : vector<2x32xf32>
    %895 = math.tanh %894 : vector<2x32xf32>
    %896 = arith.addf %853, %881 : vector<2x32xf32>
    %897 = arith.negf %896 : vector<2x32xf32>
    %898 = math.exp %897 : vector<2x32xf32>
    %cst_555 = arith.constant 1.000000e+00 : f32
    %899 = vector.broadcast %cst_555 : f32 to vector<2x32xf32>
    %900 = arith.addf %899, %898 : vector<2x32xf32>
    %901 = arith.divf %899, %900 : vector<2x32xf32>
    %902 = arith.mulf %893, %839 : vector<2x32xf32>
    %903 = arith.mulf %887, %895 : vector<2x32xf32>
    %904 = arith.addf %902, %903 : vector<2x32xf32>
    %905 = math.tanh %904 : vector<2x32xf32>
    %906 = arith.mulf %901, %905 : vector<2x32xf32>
    %c0_556 = arith.constant 0 : index
    %c0_557 = arith.constant 0 : index
    %907 = vector.load %arg27[%c0_556, %c0_557] : memref<32x128xf32, #tpu.memory_space<vmem>>, vector<32x128xf32>
    %cst_558 = arith.constant dense<0.000000e+00> : vector<2x128xf32>
    %908 = tpu.matmul %906, %907, %cst_558 {dimension_numbers = #tpu.dot_dimension_numbers<[1], [0], [0], [1], [0, 0, 1, 1], [], []>} : vector<2x32xf32>, vector<32x128xf32>, vector<2x128xf32> -> vector<2x128xf32>
    %c0_559 = arith.constant 0 : index
    %c0_560 = arith.constant 0 : index
    %909 = vector.load %arg28[%c0_559, %c0_560] : memref<1x128xf32, #tpu.memory_space<vmem>>, vector<1x128xf32>
    %910 = vector.broadcast %909 : vector<1x128xf32> to vector<2x128xf32>
    %911 = arith.addf %908, %910 : vector<2x128xf32>
    %c5 = arith.constant 5 : index
    %c0_561 = arith.constant 0 : index
    %c0_562 = arith.constant 0 : index
    %912 = vector.load %arg30[%c5, %c0_561, %c0_562] : memref<6x2x128xf32, #tpu.memory_space<vmem>>, vector<1x2x128xf32>
    %913 = vector.shape_cast %912 : vector<1x2x128xf32> to vector<2x128xf32>
    %914 = vector.shape_cast %911 : vector<2x128xf32> to vector<1x2x128xf32>
    tpu.vector_store %arg30[%c5, %c0_561, %c0_562], %914 {strides = array<i32>} : memref<6x2x128xf32, #tpu.memory_space<vmem>>, vector<1x2x128xf32>,
    return
  }
}

</mosaic_0001>

<bundles_post_ra>
// kernel: vqae_forward.1
= control target key start
LH: loop header
LB: loop body
LE: loop exit
PB: predicated region body
PF: predicated region fallthrough
CT: control target
= control target key end

     0   :  { %s8716_s6 = smov 1   ;;  %s8717_s10 = smov 2   ;;  %s9722_s0 = inlined_call_operand.smem [shape: u32[31], index: -1, kind: input, shape index: {}] }
   0x1   :  { %s8762_s5 = sld [smem:[%s9722_s0]]   ;;  %s8718_s14 = smov 3  }
   0x2   :  { %s8767_s9 = sld [smem:[%s9722_s0 + %s8716_s6]]   ;;  %s8719_s18 = smov 4  }
   0x3   :  { %s8772_s13 = sld [smem:[%s9722_s0 + %s8717_s10]]   ;;  %s8720_s22 = smov 5  }
   0x4   :  { %s8777_s17 = sld [smem:[%s9722_s0 + %s8718_s14]]   ;;  %s8721_s26 = smov 6  }
   0x5   :  { %s8782_s21 = sld [smem:[%s9722_s0 + %s8719_s18]]   ;;  %s8722_s30 = smov 7  }
   0x6   :  { %s8787_s25 = sld [smem:[%s9722_s0 + %s8720_s22]]   ;;  %s8723_s4 = smov 8  }
   0x7   :  { %s8792_s29 = sld [smem:[%s9722_s0 + %s8721_s26]]   ;;  %s8724_s10 = smov 9  }
   0x8   :  { %s8797_s3 = sld [smem:[%s9722_s0 + %s8722_s30]]   ;;  %s8725_s15 = smov 10  }
   0x9   :  { %9730 = sst [smem:[#allocation9_spill]] %s8772_s13  ;;  %s8726_s20 = smov 11  }
   0xa   :  { %s8802_s8 = sld [smem:[%s9722_s0 + %s8723_s4]]   ;;  %s8727_s26 = smov 12  }
   0xb   :  { %s8807_s14 = sld [smem:[%s9722_s0 + %s8724_s10]]   ;;  %s8728_s1 = smov 13  }
   0xc   :  { %s8812_s19 = sld [smem:[%s9722_s0 + %s8725_s15]]   ;;  %s8729_s7 = smov 14  }
   0xd   :  { %s8817_s24 = sld [smem:[%s9722_s0 + %s8726_s20]]   ;;  %s8730_s15 = smov 15  }
   0xe   :  { %s6574_s30 = sld [smem:[%s9722_s0 + %s8727_s26]]   ;;  %s8731_s22 = smov 16  }
   0xf   :  { %s8825_s6 = sld [smem:[%s9722_s0 + %s8728_s1]]   ;;  %s8732_s28 = smov 17  }
  0x10   :  { %s8830_s12 = sld [smem:[%s9722_s0 + %s8729_s7]]   ;;  %s8733_s7 = smov 18  }
  0x11   :  { %s8835_s20 = sld [smem:[%s9722_s0 + %s8730_s15]]   ;;  %s8734_s15 = smov 19  }
  0x12   :  { %s8840_s27 = sld [smem:[%s9722_s0 + %s8731_s22]]   ;;  %s8735_s22 = smov 20  }
  0x13   :  { %s8845_s4 = sld [smem:[%s9722_s0 + %s8732_s28]]   ;;  %s8736_s1 = smov 21  }
  0x14   :  { %s8850_s13 = sld [smem:[%s9722_s0 + %s8733_s7]]   ;;  %v67_v0 = vstv %s6574_s30  ;;  %s8737_s30 = smov 22  }
  0x15   :  { %s8855_s23 = sld [smem:[%s9722_s0 + %s8734_s15]]   ;;  %68 = vst [vmem:[#allocation2] sm:$0x1] %v67_v0  ;;  %s8738_s15 = smov 23  }
  0x16   :  { %9731 = sst [smem:[#allocation10_spill]] %s8830_s12  ;;  %s8740_s12 = smov 25  }
  0x17   :  { %s8860_s28 = sld [smem:[%s9722_s0 + %s8735_s22]]  }
  0x18   :  { %9732 = sst [smem:[#allocation11_spill]] %s8840_s27  ;;  %s8739_s27 = smov 24  }
  0x19   :  { %s8865_s7 = sld [smem:[%s9722_s0 + %s8736_s1]]  }
  0x1a   :  { %9733 = sst [smem:[#allocation12_spill]] %s8850_s13  ;;  %s8742_s13 = smov 27  }
  0x1b   :  { %9734 = sst [smem:[#allocation13_spill]] %s8855_s23 }
  0x1c   :  { %s8870_s16 = sld [smem:[%s9722_s0 + %s8737_s30]]   ;;  %s8741_s30 = smov 26  }
  0x1d   :  { %9735 = sst [smem:[#allocation14_spill]] %s8860_s28 }
  0x1e   :  { %s8875_s23 = sld [smem:[%s9722_s0 + %s8738_s15]]  }
  0x1f   :  { %9736 = sst [smem:[#allocation15_spill]] %s8865_s7 }
  0x20   :  { %s8880_s28 = sld [smem:[%s9722_s0 + %s8739_s27]]   ;;  %s8743_s27 = smov 28  }
  0x21   :  { %s8885_s7 = sld [smem:[%s9722_s0 + %s8740_s12]]   ;;  %s8744_s12 = smov 29  }
  0x22   :  { %9737 = sst [smem:[#allocation16_spill]] %s8870_s16 }
  0x23   :  { %s8890_s16 = sld [smem:[%s9722_s0 + %s8741_s30]]   ;;  %s8745_s30 = smov 30  }
  0x24   :  { %9738 = sst [smem:[#allocation17_spill]] %s8875_s23 }
  0x25   :  { %s8895_s23 = sld [smem:[%s9722_s0 + %s8742_s13]]  }
  0x26   :  { %9739 = sst [smem:[#allocation18_spill]] %s8880_s28 }
  0x27   :  { %9740 = sst [smem:[#allocation19_spill]] %s8885_s7 }
  0x28   :  { %s8900_s28 = sld [smem:[%s9722_s0 + %s8743_s27]]  }
  0x29   :  { %9741 = sst [smem:[#allocation20_spill]] %s8890_s16 }
  0x2a   :  { %s8905_s7 = sld [smem:[%s9722_s0 + %s8744_s12]]  }
  0x2b   :  { %s8910_s16 = sld [smem:[%s9722_s0 + %s8745_s30]]  }
  0x2c   :  { %69 = vsyncpa [#allocation4], 0  ;;  %v131_v1 = vld [vmem:[%s8777_s17] sm:$0xff]  ;;  %v132_v2 = vld [vmem:[%s8777_s17 + $0x8] sm:$0xff]  ;;  %vm140_vm0 = vcmask 130048   ;;  %v8746_v17 = vmov 0.0|0.0  }
  0x2d   :  { %v6596_v3 = vld [vmem:[%s8777_s17 + $0x10] sm:$0xff]  ;;  %v8003_v4 = vpack.c.bf16 %v132_v2, %v131_v1  ;;  %v6597_v5 = vld [vmem:[%s8777_s17 + $0x18] sm:$0xff]  ;;  %v129_v6 = vld [vmem:[%s8762_s5] sm:$0xff] }
  0x2e   :  { %v8007_v7 = vpack.c.bf16 %v6597_v5, %v6596_v3  ;;  %7236 = vmatprep.mubr.msk.f32.mxu1 %vm140_vm0, %v129_v6  ;;  %7229 = vmatprep.mubr.msk.f32.mxu0 %vm140_vm0, %v129_v6  ;;  %v6602_v8 = vld [vmem:[%s8777_s17 + $0x20] sm:$0xff]  ;;  %v6603_v9 = vld [vmem:[%s8777_s17 + $0x28] sm:$0xff]  ;;  %v396_v18 = vld [vmem:[%s8782_s21 + $0x10] sm:$0xff] }
  0x2f   :  { %v394_v10 = vld [vmem:[%s8782_s21] sm:$0xff]  ;;  %8004 = vmatprep.subr.bf16.mxu0 %v8003_v4  ;;  %v8011_v11 = vpack.c.bf16 %v6603_v9, %v6602_v8  ;;  %v395_v12 = vld [vmem:[%s8782_s21 + $0x8] sm:$0xff]  ;;  %v397_v19 = vld [vmem:[%s8782_s21 + $0x18] sm:$0xff] }
  0x30   :  { %8008 = vmatprep.subr.bf16.mxu1 %v8007_v7  ;;  %8006 = vmatpush3.bf16.msra.mxu0 %v8003_v4  ;;  %v130_v13 = vld [vmem:[%s8762_s5 + $0x8] sm:$0xff]  ;;  %v8924_v14 = vpack.c.bf16 %v395_v12, %v394_v10  ;;  %v6609_v15 = vld [vmem:[%s8782_s21 + $0x20] sm:$0xff] }
  0x31   :  { %8010 = vmatpush3.bf16.msra.mxu1 %v8007_v7  ;;  %8012 = vmatprep.subr.bf16.mxu0 %v8011_v11  ;;  %v6610_v16 = vld [vmem:[%s8782_s21 + $0x28] sm:$0xff] }
  0x32   :  { %8015 = vmatprep.subr.bf16.mxu1 %v8746_v17 }
  0x33   :  { %70 = vsyncpa [#allocation6], 0  ;;  %7230 = vmatmul.mubr.msk.f32.vlgmr.msra.gmra.mrb[0].mxu0 %vm140_vm0, %v130_v13  ;;  %v8933_v20 = vpack.c.bf16 %v6610_v16, %v6609_v15  ;;  %v8937_v21 = vpack.c.bf16 %v397_v19, %v396_v18  ;;  %v6611_v22 = vld [vmem:[%s8782_s21 + $0x30] sm:$0xff]  ;;  %v6612_v23 = vld [vmem:[%s8782_s21 + $0x38] sm:$0xff]  ;;  %vm8747_vm1 = vmmov 0   ;;  %v8748_v26 = vmov 0.0  }
  0x34   :  { %7237 = vmatmul.mubr.msk.f32.vlgmr.msra.gmra.mrb[0].mxu1 %vm140_vm0, %v130_v13  ;;  %8014 = vmatpush3.bf16.msra.mxu0 %v8011_v11  ;;  %v6615_v24 = vld [vmem:[%s8782_s21 + $0x40] sm:$0xff]  ;;  %v6616_v25 = vld [vmem:[%s8782_s21 + $0x48] sm:$0xff]  ;;  %v8949_v27 = vpack.c.bf16 %v6612_v23, %v6611_v22  ;;  %v6617_v29 = vld [vmem:[%s8782_s21 + $0x50] sm:$0xff]  ;;  %vm405_vm2 = vcmask 261120   ;;  %vm2647_vm3 = vcmask 7168   ;;  %s9742_s0 = sld [smem:[#allocation13_spill]] }
  0x35   :  { %8017 = vmatpush3.bf16.msra.mxu1 %v8924_v14  ;;  %7243 = vmatprep.mubr.msk.f32.mxu0 %vm140_vm0, %v129_v6  ;;  %v8955_v28 = vpack.c.bf16 %v6616_v25, %v6615_v24  ;;  %v6618_v30 = vld [vmem:[%s8782_s21 + $0x58] sm:$0xff]  ;;  %v6593_v32 = vld [vmem:[%s8787_s25] ss:$0 sm:$0xff]  ;;  %v6599_v33 = vld [vmem:[%s8787_s25 + $0x1] ss:$0 sm:$0xff]  ;;  %vm2790_vm4 = vcmask 1040384  }
  0x36   :  { %8018 = vmatprep.subr.bf16.mxu1 %v8746_v17  ;;  %8021 = vmatprep.subr.bf16.mxu0 %v8746_v17  ;;  %v8963_v31 = vpack.c.bf16 %v6618_v30, %v6617_v29  ;;  %v6605_v40 = vld [vmem:[%s8787_s25 + $0x2] ss:$0 sm:$0xff]  ;;  %v8995_v44 = vld [vmem:[%s8792_s29] ss:$0 sm:$0xff]  ;;  %v9001_v49 = vld [vmem:[%s8792_s29 + $0x1] ss:$0 sm:$0xff] }
  0x37   :  { %7244 = vmatmul.mubr.msk.f32.vlgmr.msra.gmra.mrb[2].mxu0 %vm140_vm0, %v130_v13  ;;  %7254 = vmatprep.mubr.msk.f32.mxu1 %vm8747_vm1, %v8748_v26  ;;  %v9009_v63 = vld [vmem:[%s8792_s29 + $0x2] ss:$0 sm:$0xff]  ;;  %s9743_s5 = sld [smem:[#allocation10_spill]]  ;;  %s9745_s17 = sld [smem:[#allocation15_spill]]  ;;  %vm3060_vm5 = vcmask 523264  }
  0x38   :  { %8023 = vmatpush3.bf16.msra.mxu0 %v8933_v20  ;;  %7265 = vmatprep.mubr.msk.f32.mxu0 %vm8747_vm1, %v8748_v26  ;;  %s9746_s21 = sld [smem:[#allocation17_spill]]  ;;  %s9748_s29 = sld [smem:[#allocation12_spill]] }
  0x39   :  { %8020 = vmatpush3.bf16.msra.mxu1 %v8937_v21  ;;  %8024 = vmatprep.subr.bf16.mxu0 %v8746_v17  ;;  %s9747_s25 = sld [smem:[#allocation9_spill]] }
  0x3a   :  { %8027 = vmatprep.subr.bf16.mxu1 %v8746_v17 }
  0x3c   :  { %7255 = vmatmul.mubr.f32.vlgmr.msra.gmra.mrb[2].mxu1 %v8748_v26  ;;  %8026 = vmatpush3.bf16.msra.mxu0 %v8949_v27 }
  0x3d   :  { %8029 = vmatpush3.bf16.msra.mxu1 %v8955_v28  ;;  %7276 = vmatprep.mubr.msk.f32.mxu1 %vm8747_vm1, %v8748_v26 }
  0x3e   :  { %8030 = vmatprep.subr.bf16.mxu1 %v8746_v17  ;;  %8033 = vmatprep.subr.bf16.mxu0 %v8746_v17 }
  0x3f   :  { %7266 = vmatmul.mubr.f32.vlgmr.msra.gmra.mrb[4].mxu0 %v8748_v26 }
  0x40   :  { %8035 = vmatpush3.bf16.msra.mxu0 %v8924_v14  ;;  %7287 = vmatprep.mubr.msk.f32.mxu0 %vm8747_vm1, %v8748_v26 }
  0x41   :  { %8032 = vmatpush3.bf16.msra.mxu1 %v8963_v31  ;;  %8036 = vmatprep.subr.bf16.mxu0 %v8746_v17 }
  0x42   :  { %8039 = vmatprep.subr.bf16.mxu1 %v8746_v17 }
  0x44   :  { %7277 = vmatmul.mubr.f32.vlgmr.msra.gmra.mrb[4].mxu1 %v8748_v26  ;;  %8038 = vmatpush3.bf16.msra.mxu0 %v8937_v21 }
  0x45   :  { %8041 = vmatpush3.bf16.msra.mxu1 %v8933_v20  ;;  %7298 = vmatprep.mubr.msk.f32.mxu1 %vm8747_vm1, %v8748_v26 }
  0x46   :  { %8042 = vmatprep.subr.bf16.mxu1 %v8746_v17  ;;  %8045 = vmatprep.subr.bf16.mxu0 %v8746_v17 }
  0x49   :  { %8044 = vmatpush3.bf16.msra.mxu1 %v8949_v27 }
  0x4a   :  { %8051 = vmatprep.subr.bf16.mxu1 %v8746_v17 }
 0x106   :  { %v7231_v34 = vpop.f32.mrb[0].mxu0 }
 0x107   :  { %v7238_v35 = vpop.f32.mrb[0].mxu1  ;;  %v8987_v36 = vadd.f32 %v7231_v34, %v6593_v32  ;;  %v213_v37 = vpop.f32.mrb[1].mxu0 }
 0x108   :  { %v8989_v38 = vadd.f32 %v7238_v35, %v6599_v33  ;;  %v299_v39 = vpop.f32.mrb[1].mxu1  ;;  %v8997_v45 = vadd.f32 %v6593_v32, %v213_v37 }
 0x109   :  { %v9004_v52 = vadd.f32 %v6599_v33, %v299_v39 }
 0x10a   :  { %v7245_v41 = vpop.f32.mrb[2].mxu0 }
 0x10b   :  { %v8992_v42 = vadd.f32 %v7245_v41, %v6605_v40  ;;  %v385_v43 = vpop.f32.mrb[3].mxu0 }
 0x10c   :  { %v9012_v3 = vadd.f32 %v6605_v40, %v385_v43 }
 0x10f   :  { %v475_v46 = vpop.f32.mrb[2].mxu1 }
 0x110   :  { %v476_v47 = vadd.f32 %v8995_v44, %v475_v46  ;;  %v7256_v48 = vpop.f32.mrb[3].mxu1 }
 0x112   :  { %v645_v50 = vadd.f32 %v476_v47, %v8997_v45  ;;  %v558_v51 = vpop.f32.mrb[4].mxu0 }
 0x113   :  { %v559_v53 = vadd.f32 %v9001_v49, %v558_v51  ;;  %v7267_v54 = vpop.f32.mrb[5].mxu0 }
 0x114   :  { %v6621_v55 = vmul.f32 -1.442695, %v645_v50 }
 0x115   :  { %v652_v56 = vadd.f32 %v559_v53, %v9004_v52 }
 0x116   :  { %8484 = vpow2.f32 %v6621_v55 }
 0x117   :  { %v641_v57 = vpop.f32.mrb[4].mxu1  ;;  %v6622_v59 = vmul.f32 -1.442695, %v652_v56 }
 0x118   :  { %v7278_v58 = vpop.f32.mrb[5].mxu1  ;;  %v642_v1 = vadd.f32 %v9009_v63, %v641_v57 }
 0x119   :  { %8486 = vpow2.f32 %v6622_v59 }
 0x120   :  { %v8485_v60 = vpop.eup %8484 }
 0x121   :  { %v649_v61 = vadd.f32 1.0, %v8485_v60 }
 0x123   :  { %8488 = vrcp.f32 %v649_v61  ;;  %v8487_v62 = vpop.eup %8486 }
 0x124   :  { %v656_v0 = vadd.f32 1.0, %v8487_v62 }
 0x126   :  { %8490 = vrcp.f32 %v656_v0 }
 0x12d   :  { %v8489_v2 = vpop.eup %8488 }
 0x12e   :  { %v659_v4 = vmul.f32 %v8489_v2, %v642_v1 }
 0x130   :  { %v660_v5 = vadd.f32 %v659_v4, %v9012_v3  ;;  %v8491_v6 = vpop.eup %8490 }
 0x131   :  { %v662_v7 = vsub.f32 1.0, %v8491_v6  ;;  %v664_v10 = vmul.f32 0.0, %v8491_v6 }
 0x132   :  { %8492 = vtanh.f32 %v660_v5 }
 0x13c   :  { %v8493_v8 = vpop.eup %8492 }
 0x13d   :  { %v663_v9 = vmul.f32 %v8493_v8, %v662_v7 }
 0x13f   :  { %v665_v11 = vadd.f32 %v664_v10, %v663_v9 }
 0x141   :  { %7288 = vmatmul.mubr.msk.f32.vlgmr.msra.gmra.mrb[6].mxu0 %vm405_vm2, %v665_v11  ;;  %7299 = vmatmul.mubr.msk.f32.vlgmr.msra.gmra.mrb[6].mxu1 %vm405_vm2, %v665_v11  ;;  %v907_v46 = vrot.slane %v665_v11, 6 }
 0x142   :  { %8047 = vmatpush3.bf16.msra.mxu0 %v8955_v28  ;;  %7309 = vmatprep.mubr.msk.f32.mxu0 %vm8747_vm1, %v8748_v26 }
 0x143   :  { %8048 = vmatprep.subr.bf16.mxu0 %v8746_v17  ;;  %8053 = vmatpush3.bf16.msra.mxu1 %v8924_v14 }
 0x144   :  { %8054 = vmatprep.subr.bf16.mxu1 %v8746_v17  ;;  %7320 = vmatprep.mubr.msk.f32.mxu1 %vm8747_vm1, %v8748_v26 }
 0x146   :  { %8050 = vmatpush3.bf16.msra.mxu0 %v8963_v31 }
 0x147   :  { %8057 = vmatprep.subr.bf16.mxu0 %v8746_v17  ;;  %8056 = vmatpush3.bf16.msra.mxu1 %v8937_v21 }
 0x148   :  { %8063 = vmatprep.subr.bf16.mxu1 %v8746_v17 }
 0x149   :  { %7310 = vmatmul.mubr.msk.f32.vlgmr.msra.gmra.mrb[8].mxu0 %vm405_vm2, %v665_v11 }
 0x14a   :  { %8059 = vmatpush3.bf16.msra.mxu0 %v8933_v20  ;;  %7331 = vmatprep.mubr.msk.f32.mxu0 %vm8747_vm1, %v8748_v26 }
 0x14b   :  { %8060 = vmatprep.subr.bf16.mxu0 %v8746_v17 }
 0x14e   :  { %8062 = vmatpush3.bf16.msra.mxu0 %v8949_v27 }
 0x14f   :  { %8069 = vmatprep.subr.bf16.mxu0 %v8746_v17 }
 0x214   :  { %v735_v12 = vpop.f32.mrb[6].mxu0  ;;  %v805_v13 = vpop.f32.mrb[6].mxu1 }
 0x215   :  { %v736_v15 = vadd.f32 %v8995_v44, %v735_v12  ;;  %v806_v16 = vadd.f32 %v9001_v49, %v805_v13  ;;  %v7289_v18 = vpop.f32.mrb[7].mxu0  ;;  %v7300_v19 = vpop.f32.mrb[7].mxu1 }
 0x217   :  { %v880_v22 = vrot.slane %v736_v15, 6  ;;  %v890_v23 = vrot.slane %v806_v16, 6 }
 0x219   :  { %v882_v24 = vadd.f32 %v880_v22, %v8997_v45  ;;  %v892_v25 = vadd.f32 %v890_v23, %v9004_v52 }
 0x21b   :  { %v6626_v29 = vmul.f32 -1.442695, %v882_v24  ;;  %v6627_v30 = vmul.f32 -1.442695, %v892_v25 }
 0x21c   :  { %v875_v32 = vpop.f32.mrb[8].mxu0 }
 0x21d   :  { %8494 = vpow2.f32 %v6626_v29  ;;  %v7311_v33 = vpop.f32.mrb[9].mxu0  ;;  %v876_v40 = vadd.f32 %v9009_v63, %v875_v32 }
 0x21e   :  { %8496 = vpow2.f32 %v6627_v30 }
 0x21f   :  { %v900_v41 = vrot.slane %v876_v40, 6 }
 0x227   :  { %v8495_v34 = vpop.eup %8494 }
 0x228   :  { %v8497_v35 = vpop.eup %8496  ;;  %v886_v37 = vadd.f32 1.0, %v8495_v34 }
 0x229   :  { %v896_v39 = vadd.f32 1.0, %v8497_v35 }
 0x22a   :  { %8498 = vrcp.f32 %v886_v37 }
 0x22b   :  { %8500 = vrcp.f32 %v896_v39 }
 0x234   :  { %v8499_v43 = vpop.eup %8498 }
 0x235   :  { %v8501_v47 = vpop.eup %8500  ;;  %v902_v48 = vmul.f32 %v8499_v43, %v900_v41 }
 0x236   :  { %v909_v50 = vmul.f32 %v8501_v47, %v907_v46  ;;  %v905_v53 = vsub.f32 1.0, %v8501_v47 }
 0x237   :  { %v903_v51 = vadd.f32 %v902_v48, %v9012_v3 }
 0x239   :  { %8502 = vtanh.f32 %v903_v51 }
 0x243   :  { %v8503_v54 = vpop.eup %8502 }
 0x244   :  { %v906_v55 = vmul.f32 %v8503_v54, %v905_v53 }
 0x246   :  { %v910_v56 = vadd.f32 %v909_v50, %v906_v55 }
 0x248   :  { %v912_v57 = vrot.slane %v910_v56, 2  ;;  %v1153_v19 = vrot.slane %v910_v56, 6 }
 0x24a   :  { %7321 = vmatmul.mubr.msk.f32.vlgmr.msra.gmra.mrb[8].mxu1 %vm405_vm2, %v912_v57  ;;  %7332 = vmatmul.mubr.msk.f32.vlgmr.msra.gmra.mrb[10].mxu0 %vm405_vm2, %v912_v57 }
 0x24b   :  { %8065 = vmatpush3.bf16.msra.mxu1 %v8955_v28  ;;  %7342 = vmatprep.mubr.msk.f32.mxu1 %vm8747_vm1, %v8748_v26 }
 0x24c   :  { %8066 = vmatprep.subr.bf16.mxu1 %v8746_v17  ;;  %8071 = vmatpush3.bf16.msra.mxu0 %v8924_v14 }
 0x24d   :  { %8072 = vmatprep.subr.bf16.mxu0 %v8746_v17  ;;  %7353 = vmatprep.mubr.msk.f32.mxu0 %vm8747_vm1, %v8748_v26 }
 0x24f   :  { %8068 = vmatpush3.bf16.msra.mxu1 %v8963_v31 }
 0x250   :  { %8075 = vmatprep.subr.bf16.mxu1 %v8746_v17  ;;  %8074 = vmatpush3.bf16.msra.mxu0 %v8937_v21 }
 0x251   :  { %8081 = vmatprep.subr.bf16.mxu0 %v8746_v17 }
 0x252   :  { %7343 = vmatmul.mubr.msk.f32.vlgmr.msra.gmra.mrb[10].mxu1 %vm405_vm2, %v912_v57 }
 0x253   :  { %8077 = vmatpush3.bf16.msra.mxu1 %v8933_v20  ;;  %7364 = vmatprep.mubr.msk.f32.mxu1 %vm8747_vm1, %v8748_v26 }
 0x254   :  { %8078 = vmatprep.subr.bf16.mxu1 %v8746_v17 }
 0x257   :  { %8080 = vmatpush3.bf16.msra.mxu1 %v8949_v27 }
 0x258   :  { %8087 = vmatprep.subr.bf16.mxu1 %v8746_v17 }
 0x31d   :  { %v981_v58 = vpop.f32.mrb[8].mxu1  ;;  %v1051_v59 = vpop.f32.mrb[10].mxu0 }
 0x31e   :  { %v982_v60 = vadd.f32 %v8995_v44, %v981_v58  ;;  %v1052_v61 = vadd.f32 %v9001_v49, %v1051_v59  ;;  %v7322_v62 = vpop.f32.mrb[9].mxu1  ;;  %v7333_v0 = vpop.f32.mrb[11].mxu0 }
 0x320   :  { %v1126_v1 = vrot.slane %v982_v60, 4  ;;  %v1136_v2 = vrot.slane %v1052_v61, 4 }
 0x322   :  { %v1128_v4 = vadd.f32 %v1126_v1, %v8997_v45  ;;  %v1138_v5 = vadd.f32 %v1136_v2, %v9004_v52 }
 0x324   :  { %v6631_v6 = vmul.f32 -1.442695, %v1128_v4  ;;  %v6632_v7 = vmul.f32 -1.442695, %v1138_v5 }
 0x325   :  { %v1121_v8 = vpop.f32.mrb[10].mxu1 }
 0x326   :  { %8504 = vpow2.f32 %v6631_v6  ;;  %v7344_v9 = vpop.f32.mrb[11].mxu1  ;;  %v1122_v15 = vadd.f32 %v9009_v63, %v1121_v8 }
 0x327   :  { %8506 = vpow2.f32 %v6632_v7 }
 0x328   :  { %v1146_v16 = vrot.slane %v1122_v15, 4 }
 0x330   :  { %v8505_v10 = vpop.eup %8504 }
 0x331   :  { %v8507_v11 = vpop.eup %8506  ;;  %v1132_v12 = vadd.f32 1.0, %v8505_v10 }
 0x332   :  { %v1142_v13 = vadd.f32 1.0, %v8507_v11 }
 0x333   :  { %8508 = vrcp.f32 %v1132_v12 }
 0x334   :  { %8510 = vrcp.f32 %v1142_v13 }
 0x33d   :  { %v8509_v18 = vpop.eup %8508 }
 0x33e   :  { %v8511_v22 = vpop.eup %8510  ;;  %v1148_v23 = vmul.f32 %v8509_v18, %v1146_v16 }
 0x33f   :  { %v1155_v24 = vmul.f32 %v8511_v22, %v1153_v19  ;;  %v1151_v29 = vsub.f32 1.0, %v8511_v22 }
 0x340   :  { %v1149_v25 = vadd.f32 %v1148_v23, %v9012_v3 }
 0x342   :  { %8512 = vtanh.f32 %v1149_v25 }
 0x34c   :  { %v8513_v30 = vpop.eup %8512 }
 0x34d   :  { %v1152_v32 = vmul.f32 %v8513_v30, %v1151_v29 }
 0x34f   :  { %v1156_v33 = vadd.f32 %v1155_v24, %v1152_v32 }
 0x351   :  { %v1158_v34 = vrot.slane %v1156_v33, 4  ;;  %v1399_v0 = vrot.slane %v1156_v33, 6 }
 0x353   :  { %7354 = vmatmul.mubr.msk.f32.vlgmr.msra.gmra.mrb[12].mxu0 %vm405_vm2, %v1158_v34  ;;  %7365 = vmatmul.mubr.msk.f32.vlgmr.msra.gmra.mrb[12].mxu1 %vm405_vm2, %v1158_v34 }
 0x354   :  { %8083 = vmatpush3.bf16.msra.mxu0 %v8955_v28  ;;  %7375 = vmatprep.mubr.msk.f32.mxu0 %vm8747_vm1, %v8748_v26 }
 0x355   :  { %8084 = vmatprep.subr.bf16.mxu0 %v8746_v17  ;;  %8089 = vmatpush3.bf16.msra.mxu1 %v8924_v14 }
 0x356   :  { %8090 = vmatprep.subr.bf16.mxu1 %v8746_v17  ;;  %7386 = vmatprep.mubr.msk.f32.mxu1 %vm8747_vm1, %v8748_v26 }
 0x358   :  { %8086 = vmatpush3.bf16.msra.mxu0 %v8963_v31 }
 0x359   :  { %8093 = vmatprep.subr.bf16.mxu0 %v8746_v17  ;;  %8092 = vmatpush3.bf16.msra.mxu1 %v8937_v21 }
 0x35a   :  { %8099 = vmatprep.subr.bf16.mxu1 %v8746_v17 }
 0x35b   :  { %7376 = vmatmul.mubr.msk.f32.vlgmr.msra.gmra.mrb[14].mxu0 %vm405_vm2, %v1158_v34 }
 0x35c   :  { %8095 = vmatpush3.bf16.msra.mxu0 %v8933_v20  ;;  %7397 = vmatprep.mubr.msk.f32.mxu0 %vm8747_vm1, %v8748_v26 }
 0x35d   :  { %8096 = vmatprep.subr.bf16.mxu0 %v8746_v17 }
 0x360   :  { %8098 = vmatpush3.bf16.msra.mxu0 %v8949_v27 }
 0x361   :  { %8105 = vmatprep.subr.bf16.mxu0 %v8746_v17 }
 0x426   :  { %v1227_v35 = vpop.f32.mrb[12].mxu0  ;;  %v1297_v37 = vpop.f32.mrb[12].mxu1 }
 0x427   :  { %v1228_v39 = vadd.f32 %v8995_v44, %v1227_v35  ;;  %v1298_v40 = vadd.f32 %v9001_v49, %v1297_v37  ;;  %v7355_v41 = vpop.f32.mrb[13].mxu0  ;;  %v7366_v43 = vpop.f32.mrb[13].mxu1 }
 0x429   :  { %v1372_v46 = vrot.slane %v1228_v39, 2  ;;  %v1382_v47 = vrot.slane %v1298_v40, 2 }
 0x42b   :  { %v1374_v48 = vadd.f32 %v1372_v46, %v8997_v45  ;;  %v1384_v50 = vadd.f32 %v1382_v47, %v9004_v52 }
 0x42d   :  { %v6636_v51 = vmul.f32 -1.442695, %v1374_v48  ;;  %v6637_v53 = vmul.f32 -1.442695, %v1384_v50 }
 0x42e   :  { %v1367_v54 = vpop.f32.mrb[14].mxu0 }
 0x42f   :  { %8514 = vpow2.f32 %v6636_v51  ;;  %v7377_v55 = vpop.f32.mrb[15].mxu0  ;;  %v1368_v60 = vadd.f32 %v9009_v63, %v1367_v54 }
 0x430   :  { %8516 = vpow2.f32 %v6637_v53 }
 0x431   :  { %v1392_v61 = vrot.slane %v1368_v60, 2 }
 0x439   :  { %v8515_v56 = vpop.eup %8514 }
 0x43a   :  { %v8517_v57 = vpop.eup %8516  ;;  %v1378_v58 = vadd.f32 1.0, %v8515_v56 }
 0x43b   :  { %v1388_v59 = vadd.f32 1.0, %v8517_v57 }
 0x43c   :  { %8518 = vrcp.f32 %v1378_v58 }
 0x43d   :  { %8520 = vrcp.f32 %v1388_v59 }
 0x446   :  { %v8519_v62 = vpop.eup %8518 }
 0x447   :  { %v8521_v45 = vpop.eup %8520  ;;  %v1394_v1 = vmul.f32 %v8519_v62, %v1392_v61 }
 0x448   :  { %v1401_v52 = vmul.f32 %v8521_v45, %v1399_v0  ;;  %v1397_v4 = vsub.f32 1.0, %v8521_v45 }
 0x449   :  { %v1395_v2 = vadd.f32 %v1394_v1, %v9012_v3 }
 0x44b   :  { %8522 = vtanh.f32 %v1395_v2 }
 0x455   :  { %v8523_v5 = vpop.eup %8522 }
 0x456   :  { %v1398_v6 = vmul.f32 %v8523_v5, %v1397_v4 }
 0x458   :  { %v1402_v7 = vadd.f32 %v1401_v52, %v1398_v6 }
 0x45a   :  { %v1404_v8 = vrot.slane %v1402_v7, 6 }
 0x45c   :  { %7387 = vmatmul.mubr.msk.f32.vlgmr.msra.gmra.mrb[14].mxu1 %vm405_vm2, %v1404_v8  ;;  %7398 = vmatmul.mubr.msk.f32.vlgmr.msra.gmra.mrb[16].mxu0 %vm405_vm2, %v1404_v8 }
 0x45d   :  { %8101 = vmatpush3.bf16.msra.mxu1 %v8955_v28  ;;  %7408 = vmatprep.mubr.msk.f32.mxu1 %vm8747_vm1, %v8748_v26 }
 0x45e   :  { %8102 = vmatprep.subr.bf16.mxu1 %v8746_v17  ;;  %8107 = vmatpush3.bf16.msra.mxu0 %v8924_v14 }
 0x45f   :  { %8108 = vmatprep.subr.bf16.mxu0 %v8746_v17  ;;  %7419 = vmatprep.mubr.msk.f32.mxu0 %vm8747_vm1, %v8748_v26 }
 0x461   :  { %8104 = vmatpush3.bf16.msra.mxu1 %v8963_v31 }
 0x462   :  { %8111 = vmatprep.subr.bf16.mxu1 %v8746_v17  ;;  %8110 = vmatpush3.bf16.msra.mxu0 %v8937_v21 }
 0x463   :  { %8117 = vmatprep.subr.bf16.mxu0 %v8746_v17 }
 0x464   :  { %7409 = vmatmul.mubr.msk.f32.vlgmr.msra.gmra.mrb[16].mxu1 %vm405_vm2, %v1404_v8 }
 0x465   :  { %8113 = vmatpush3.bf16.msra.mxu1 %v8933_v20  ;;  %7430 = vmatprep.mubr.msk.f32.mxu1 %vm8747_vm1, %v8748_v26 }
 0x466   :  { %8114 = vmatprep.subr.bf16.mxu1 %v8746_v17 }
 0x469   :  { %8116 = vmatpush3.bf16.msra.mxu1 %v8949_v27 }
 0x46a   :  { %8123 = vmatprep.subr.bf16.mxu1 %v8746_v17 }
 0x52f   :  { %v1473_v3 = vpop.f32.mrb[14].mxu1  ;;  %v1543_v9 = vpop.f32.mrb[16].mxu0 }
 0x530   :  { %v1474_v10 = vadd.f32 %v8995_v44, %v1473_v3  ;;  %v7388_v11 = vpop.f32.mrb[15].mxu1  ;;  %v7399_v12 = vpop.f32.mrb[17].mxu0  ;;  %v1544_v13 = vadd.f32 %v9001_v49, %v1543_v9 }
 0x532   :  { %v1617_v15 = vadd.f32 %v1474_v10, %v8987_v36  ;;  %v1624_v18 = vadd.f32 %v1544_v13, %v8989_v38 }
 0x534   :  { %v6641_v16 = vmul.f32 -1.442695, %v1617_v15  ;;  %v6642_v23 = vmul.f32 -1.442695, %v1624_v18 }
 0x536   :  { %8524 = vpow2.f32 %v6641_v16 }
 0x537   :  { %v1613_v19 = vpop.f32.mrb[16].mxu1  ;;  %8526 = vpow2.f32 %v6642_v23 }
 0x538   :  { %v7410_v22 = vpop.f32.mrb[17].mxu1  ;;  %v1614_v32 = vadd.f32 %v9009_v63, %v1613_v19 }
 0x540   :  { %v8525_v24 = vpop.eup %8524 }
 0x541   :  { %v1621_v25 = vadd.f32 1.0, %v8525_v24  ;;  %v8527_v29 = vpop.eup %8526 }
 0x542   :  { %v1628_v30 = vadd.f32 1.0, %v8527_v29 }
 0x543   :  { %8528 = vrcp.f32 %v1621_v25 }
 0x544   :  { %8530 = vrcp.f32 %v1628_v30 }
 0x54d   :  { %v8529_v33 = vpop.eup %8528 }
 0x54e   :  { %v1631_v34 = vmul.f32 %v8529_v33, %v1614_v32  ;;  %v8531_v37 = vpop.eup %8530 }
 0x54f   :  { %v1634_v39 = vsub.f32 1.0, %v8531_v37  ;;  %v1637_v43 = vmul.f32 %v8531_v37, %v1404_v8 }
 0x550   :  { %v1632_v35 = vadd.f32 %v1631_v34, %v8992_v42 }
 0x552   :  { %8532 = vtanh.f32 %v1632_v35 }
 0x55c   :  { %v8533_v40 = vpop.eup %8532 }
 0x55d   :  { %v1635_v41 = vmul.f32 %v8533_v40, %v1634_v39 }
 0x55f   :  { %v1638_v46 = vadd.f32 %v1637_v43, %v1635_v41 }
 0x561   :  { %7420 = vmatmul.mubr.msk.f32.vlgmr.msra.gmra.mrb[18].mxu0 %vm405_vm2, %v1638_v46  ;;  %7431 = vmatmul.mubr.msk.f32.vlgmr.msra.gmra.mrb[18].mxu1 %vm405_vm2, %v1638_v46  ;;  %v1880_v6 = vrot.slane %v1638_v46, 6 }
 0x562   :  { %8119 = vmatpush3.bf16.msra.mxu0 %v8955_v28  ;;  %7441 = vmatprep.mubr.msk.f32.mxu0 %vm8747_vm1, %v8748_v26 }
 0x563   :  { %8120 = vmatprep.subr.bf16.mxu0 %v8746_v17  ;;  %8125 = vmatpush3.bf16.msra.mxu1 %v8924_v14 }
 0x564   :  { %8126 = vmatprep.subr.bf16.mxu1 %v8746_v17  ;;  %7452 = vmatprep.mubr.msk.f32.mxu1 %vm8747_vm1, %v8748_v26 }
 0x566   :  { %8122 = vmatpush3.bf16.msra.mxu0 %v8963_v31 }
 0x567   :  { %8129 = vmatprep.subr.bf16.mxu0 %v8746_v17  ;;  %8128 = vmatpush3.bf16.msra.mxu1 %v8937_v21 }
 0x568   :  { %8135 = vmatprep.subr.bf16.mxu1 %v8746_v17 }
 0x569   :  { %7442 = vmatmul.mubr.msk.f32.vlgmr.msra.gmra.mrb[20].mxu0 %vm405_vm2, %v1638_v46 }
 0x56a   :  { %8131 = vmatpush3.bf16.msra.mxu0 %v8933_v20  ;;  %7463 = vmatprep.mubr.msk.f32.mxu0 %vm8747_vm1, %v8748_v26 }
 0x56b   :  { %8132 = vmatprep.subr.bf16.mxu0 %v8746_v17 }
 0x56e   :  { %8134 = vmatpush3.bf16.msra.mxu0 %v8949_v27 }
 0x56f   :  { %8141 = vmatprep.subr.bf16.mxu0 %v8746_v17 }
 0x634   :  { %v1708_v47 = vpop.f32.mrb[18].mxu0  ;;  %v1778_v48 = vpop.f32.mrb[18].mxu1 }
 0x635   :  { %v1709_v50 = vadd.f32 %v8995_v44, %v1708_v47  ;;  %v1779_v51 = vadd.f32 %v9001_v49, %v1778_v48  ;;  %v7421_v53 = vpop.f32.mrb[19].mxu0  ;;  %v7432_v54 = vpop.f32.mrb[19].mxu1 }
 0x637   :  { %v1853_v55 = vrot.slane %v1709_v50, 6  ;;  %v1863_v56 = vrot.slane %v1779_v51, 6 }
 0x639   :  { %v1855_v57 = vadd.f32 %v1853_v55, %v8987_v36  ;;  %v1865_v58 = vadd.f32 %v1863_v56, %v8989_v38 }
 0x63b   :  { %v6646_v59 = vmul.f32 -1.442695, %v1855_v57  ;;  %v6647_v60 = vmul.f32 -1.442695, %v1865_v58  ;;  %v2378_v57 = vld [vmem:[%s8797_s3] sm:$0xff]  ;;  %v2379_v58 = vld [vmem:[%s8797_s3 + $0x8] sm:$0xff] }
 0x63c   :  { %v1848_v61 = vpop.f32.mrb[20].mxu0 }
 0x63d   :  { %8534 = vpow2.f32 %v6646_v59  ;;  %v7443_v62 = vpop.f32.mrb[21].mxu0  ;;  %v1849_v2 = vadd.f32 %v9009_v63, %v1848_v61  ;;  %v8159_v59 = vpack.c.bf16 %v2379_v58, %v2378_v57  ;;  %v2380_v61 = vld [vmem:[%s8797_s3 + $0x10] sm:$0xff] }
 0x63e   :  { %8536 = vpow2.f32 %v6647_v60  ;;  %v2473_v60 = vld [vmem:[%s8807_s14 + $0x8] sm:$0xff]  ;;  %v2381_v62 = vld [vmem:[%s8797_s3 + $0x18] sm:$0xff]  ;;  %s9749_s3 = sld [smem:[#allocation16_spill]] }
 0x63f   :  { %v1873_v4 = vrot.slane %v1849_v2, 6 }
 0x647   :  { %v8535_v0 = vpop.eup %8534 }
 0x648   :  { %v8537_v45 = vpop.eup %8536  ;;  %v1859_v1 = vadd.f32 1.0, %v8535_v0 }
 0x649   :  { %v1869_v52 = vadd.f32 1.0, %v8537_v45  ;;  %v8163_v45 = vpack.c.bf16 %v2381_v62, %v2380_v61  ;;  %v2792_v61 = vld [vmem:[%s8825_s6] sm:$0xff]  ;;  %v2793_v62 = vld [vmem:[%s8825_s6 + $0x8] sm:$0xff] }
 0x64a   :  { %8538 = vrcp.f32 %v1859_v1  ;;  %v2474_v1 = vld [vmem:[%s8807_s14 + $0x10] sm:$0xff] }
 0x64b   :  { %8540 = vrcp.f32 %v1869_v52  ;;  %v2475_v52 = vld [vmem:[%s8807_s14 + $0x18] sm:$0xff] }
 0x64c   :  { %v8171_v2 = vpack.c.bf16 %v2475_v52, %v2474_v1  ;;  %v8186_v1 = vpack.c.bf16 %v2793_v62, %v2792_v61  ;;  %v2876_v62 = vld [vmem:[%s8835_s20 + $0x10] sm:$0xff] }
 0x654   :  { %v8539_v5 = vpop.eup %8538 }
 0x655   :  { %v8541_v7 = vpop.eup %8540  ;;  %v1875_v8 = vmul.f32 %v8539_v5, %v1873_v4  ;;  %v9205_v4 = vld [vmem:[%s8767_s9 + $0x8] sm:$0xff] }
 0x656   :  { %v1882_v3 = vmul.f32 %v8541_v7, %v1880_v6  ;;  %v1878_v10 = vsub.f32 1.0, %v8541_v7 }
 0x657   :  { %v1876_v9 = vadd.f32 %v1875_v8, %v8992_v42 }
 0x659   :  { %8542 = vtanh.f32 %v1876_v9 }
 0x663   :  { %v8543_v11 = vpop.eup %8542 }
 0x664   :  { %v1879_v12 = vmul.f32 %v8543_v11, %v1878_v10 }
 0x666   :  { %v1883_v13 = vadd.f32 %v1882_v3, %v1879_v12 }
 0x668   :  { %v1885_v15 = vrot.slane %v1883_v13, 2  ;;  %v2126_v43 = vrot.slane %v1883_v13, 6 }
 0x66a   :  { %7453 = vmatmul.mubr.msk.f32.vlgmr.msra.gmra.mrb[20].mxu1 %vm405_vm2, %v1885_v15  ;;  %7464 = vmatmul.mubr.msk.f32.vlgmr.msra.gmra.mrb[22].mxu0 %vm405_vm2, %v1885_v15 }
 0x66b   :  { %8137 = vmatpush3.bf16.msra.mxu1 %v8955_v28  ;;  %7474 = vmatprep.mubr.msk.f32.mxu1 %vm8747_vm1, %v8748_v26 }
 0x66c   :  { %8138 = vmatprep.subr.bf16.mxu1 %v8746_v17  ;;  %8143 = vmatpush3.bf16.msra.mxu0 %v8924_v14 }
 0x66d   :  { %8144 = vmatprep.subr.bf16.mxu0 %v8746_v17  ;;  %7485 = vmatprep.mubr.msk.f32.mxu0 %vm8747_vm1, %v8748_v26 }
 0x66f   :  { %8140 = vmatpush3.bf16.msra.mxu1 %v8963_v31 }
 0x670   :  { %8147 = vmatprep.subr.bf16.mxu1 %v8746_v17  ;;  %8146 = vmatpush3.bf16.msra.mxu0 %v8937_v21 }
 0x671   :  { %8153 = vmatprep.subr.bf16.mxu0 %v8746_v17 }
 0x672   :  { %7475 = vmatmul.mubr.msk.f32.vlgmr.msra.gmra.mrb[22].mxu1 %vm405_vm2, %v1885_v15 }
 0x673   :  { %8149 = vmatpush3.bf16.msra.mxu1 %v8933_v20  ;;  %7496 = vmatprep.mubr.msk.f32.mxu1 %vm8747_vm1, %v8748_v26 }
 0x674   :  { %8150 = vmatprep.subr.bf16.mxu1 %v8746_v17 }
 0x677   :  { %8152 = vmatpush3.bf16.msra.mxu1 %v8949_v27 }
 0x678   :  { %8160 = vmatprep.subr.bf16.mxu1 %v8159_v59 }
 0x73d   :  { %v1954_v14 = vpop.f32.mrb[20].mxu1  ;;  %v2024_v16 = vpop.f32.mrb[22].mxu0 }
 0x73e   :  { %v1955_v18 = vadd.f32 %v8995_v44, %v1954_v14  ;;  %v2025_v19 = vadd.f32 %v9001_v49, %v2024_v16  ;;  %v7454_v21 = vpop.f32.mrb[21].mxu1  ;;  %v7465_v22 = vpop.f32.mrb[23].mxu0 }
 0x740   :  { %v2099_v23 = vrot.slane %v1955_v18, 4  ;;  %v2109_v24 = vrot.slane %v2025_v19, 4 }
 0x742   :  { %v2101_v25 = vadd.f32 %v2099_v23, %v8987_v36  ;;  %v2111_v20 = vadd.f32 %v2109_v24, %v8989_v38 }
 0x744   :  { %v6651_v29 = vmul.f32 -1.442695, %v2101_v25  ;;  %v6652_v30 = vmul.f32 -1.442695, %v2111_v20 }
 0x745   :  { %v2094_v32 = vpop.f32.mrb[22].mxu1 }
 0x746   :  { %8544 = vpow2.f32 %v6651_v29  ;;  %v7476_v33 = vpop.f32.mrb[23].mxu1  ;;  %v2095_v39 = vadd.f32 %v9009_v63, %v2094_v32 }
 0x747   :  { %8546 = vpow2.f32 %v6652_v30 }
 0x748   :  { %v2119_v40 = vrot.slane %v2095_v39, 4 }
 0x750   :  { %v8545_v27 = vpop.eup %8544 }
 0x751   :  { %v8547_v34 = vpop.eup %8546  ;;  %v2105_v35 = vadd.f32 1.0, %v8545_v27 }
 0x752   :  { %v2115_v37 = vadd.f32 1.0, %v8547_v34 }
 0x753   :  { %8548 = vrcp.f32 %v2105_v35  ;;  %v2563_v35 = vld [vmem:[%s8817_s24] sm:$0xff] }
 0x754   :  { %8550 = vrcp.f32 %v2115_v37  ;;  %v2564_v37 = vld [vmem:[%s8817_s24 + $0x8] sm:$0xff] }
 0x755   :  { %v8174_v39 = vpack.c.bf16 %v2564_v37, %v2563_v35 }
 0x75d   :  { %v8549_v41 = vpop.eup %8548 }
 0x75e   :  { %v8551_v46 = vpop.eup %8550  ;;  %v2121_v47 = vmul.f32 %v8549_v41, %v2119_v40  ;;  %v2565_v40 = vld [vmem:[%s8817_s24 + $0x10] sm:$0xff]  ;;  %v2566_v41 = vld [vmem:[%s8817_s24 + $0x18] sm:$0xff]  ;;  %s9753_s24 = sld [smem:[#allocation20_spill]] }
 0x75f   :  { %v2128_v48 = vmul.f32 %v8551_v46, %v2126_v43  ;;  %v2124_v51 = vsub.f32 1.0, %v8551_v46  ;;  %v8177_v43 = vpack.c.bf16 %v2566_v41, %v2565_v40  ;;  %v2558_v46 = vlaneseq }
 0x760   :  { %v2122_v50 = vadd.f32 %v2121_v47, %v8992_v42  ;;  %v6658_v47 = vld [vmem:[%s8802_s8] ss:$0 sm:$0xff]  ;;  %s9750_s8 = sld [smem:[#allocation18_spill]] }
 0x762   :  { %8552 = vtanh.f32 %v2122_v50  ;;  %v6661_v50 = vld [vmem:[%s8812_s19] ss:$0 sm:$0xff]  ;;  %s9752_s19 = sld [smem:[#allocation14_spill]] }
 0x76c   :  { %v8553_v53 = vpop.eup %8552 }
 0x76d   :  { %v2125_v54 = vmul.f32 %v8553_v53, %v2124_v51 }
 0x76f   :  { %v9176_v55 = vadd.f32 %v2128_v48, %v2125_v54  ;;  %v2559_v48 = vshrl.u32 %v2558_v46, 7 }
 0x771   :  { %v2131_v56 = vrot.slane %v9176_v55, 4  ;;  %v2682_v57 = vsub.s32 1, %v2559_v48 }
 0x773   :  { %7486 = vmatmul.mubr.msk.f32.vlgmr.msra.gmra.mrb[24].mxu0 %vm405_vm2, %v2131_v56  ;;  %7497 = vmatmul.mubr.msk.f32.vlgmr.msra.gmra.mrb[24].mxu1 %vm405_vm2, %v2131_v56 }
 0x774   :  { %8155 = vmatpush3.bf16.msra.mxu0 %v8955_v28  ;;  %7507 = vmatprep.mubr.msk.f32.mxu0 %vm8747_vm1, %v8748_v26  ;;  %v2472_v28 = vld [vmem:[%s8807_s14] sm:$0xff]  ;;  %s9751_s14 = sld [smem:[#allocation19_spill]] }
 0x775   :  { %8156 = vmatprep.subr.bf16.mxu0 %v8746_v17  ;;  %v8168_v0 = vpack.c.bf16 %v2473_v60, %v2472_v28  ;;  %8162 = vmatpush3.bf16.msra.mxu1 %v8159_v59 }
 0x776   :  { %8164 = vmatprep.subr.bf16.mxu1 %v8163_v45 }
 0x778   :  { %8158 = vmatpush3.bf16.msra.mxu0 %v8963_v31  ;;  %v9199_v31 = vld [vmem:[%s8767_s9] sm:$0xff]  ;;  %s9744_s9 = sld [smem:[#allocation11_spill]] }
 0x779   :  { %8167 = vmatprep.subr.bf16.mxu0 %v8746_v17  ;;  %7518 = vmatprep.mubr.msk.f32.mxu1 %vm405_vm2, %v9199_v31 }
 0x77a   :  { %8166 = vmatpush3.bf16.msra.mxu1 %v8163_v45 }
 0x77b   :  { %7508 = vmatmul.mubr.msk.f32.vlgmr.msra.gmra.mrb[26].mxu0 %vm405_vm2, %v2131_v56  ;;  %8173 = vmatprep.subr.bf16.mxu1 %v8746_v17  ;;  %v2560_v56 = vsub.s32 0, %v2559_v48 }
 0x77c   :  { %7529 = vmatprep.mubr.msk.f32.mxu0 %vm8747_vm1, %v8748_v26  ;;  %8169 = vmatpush3.bf16.msra.mxu0 %v8168_v0 }
 0x77d   :  { %8170 = vmatprep.subr.bf16.mxu0 %v8746_v17  ;;  %7519 = vmatmul.mubr.msk.f32.vlgmr.msra.gmra.mrb[26].mxu1 %vm405_vm2, %v9205_v4 }
 0x77e   :  { %7540 = vmatprep.mubr.msk.f32.mxu1 %vm8747_vm1, %v8748_v26  ;;  %8175 = vmatpush3.bf16.msra.mxu1 %v8174_v39 }
 0x77f   :  { %8176 = vmatprep.subr.bf16.mxu1 %v8746_v17 }
 0x780   :  { %8172 = vmatpush3.bf16.msra.mxu0 %v8171_v2 }
 0x781   :  { %8179 = vmatprep.subr.bf16.mxu0 %v8746_v17 }
 0x782   :  { %8178 = vmatpush3.bf16.msra.mxu1 %v8177_v43 }
 0x783   :  { %8185 = vmatprep.subr.bf16.mxu1 %v8746_v17 }
 0x846   :  { %v2200_v5 = vpop.f32.mrb[24].mxu0  ;;  %v2270_v6 = vpop.f32.mrb[24].mxu1 }
 0x847   :  { %v2201_v7 = vadd.f32 %v8995_v44, %v2200_v5  ;;  %v2271_v8 = vadd.f32 %v9001_v49, %v2270_v6  ;;  %v7487_v3 = vpop.f32.mrb[25].mxu0  ;;  %v7498_v9 = vpop.f32.mrb[25].mxu1  ;;  %v2794_v5 = vld [vmem:[%s8825_s6 + $0x10] sm:$0xff]  ;;  %v2795_v6 = vld [vmem:[%s8825_s6 + $0x18] sm:$0xff]  ;;  %s8750_s6 = smov [#allocation3]  }
 0x848   :  { %v6663_v3 = vld [vmem:[#allocation2] ss:$0 sm:$0xff] }
 0x849   :  { %v2345_v10 = vrot.slane %v2201_v7, 2  ;;  %v2355_v11 = vrot.slane %v2271_v8, 2  ;;  %v8189_v7 = vpack.c.bf16 %v2795_v6, %v2794_v5  ;;  %v8749_v8 = vmov 0  }
 0x84a   :  { %8483 = vset.pattern.permute.xlu0 %v8749_v8 }
 0x84b   :  { %v2347_v12 = vadd.f32 %v2345_v10, %v8987_v36  ;;  %v2357_v13 = vadd.f32 %v2355_v11, %v8989_v38  ;;  %v2372_v36 = vrot.slane %v9176_v55, 6 }
 0x84d   :  { %v6656_v15 = vmul.f32 -1.442695, %v2347_v12  ;;  %v6657_v14 = vmul.f32 -1.442695, %v2357_v13 }
 0x84e   :  { %v2340_v16 = vpop.f32.mrb[26].mxu0 }
 0x84f   :  { %8554 = vpow2.f32 %v6656_v15  ;;  %v7509_v18 = vpop.f32.mrb[27].mxu0  ;;  %v2341_v49 = vadd.f32 %v9009_v63, %v2340_v16 }
 0x850   :  { %8556 = vpow2.f32 %v6657_v14  ;;  %v7520_v63 = vpop.f32.mrb[26].mxu1 }
 0x851   :  { %v2365_v23 = vrot.slane %v2341_v49, 2  ;;  %v2467_v51 = vadd.f32 %v7520_v63, %v6658_v47 }
 0x853   :  { %v2471_v28 = vmax.f32 %v2467_v51, 0.0 }
 0x859   :  { %v8555_v19 = vpop.eup %8554 }
 0x85a   :  { %v8557_v21 = vpop.eup %8556  ;;  %v2351_v22 = vadd.f32 1.0, %v8555_v19 }
 0x85b   :  { %v2361_v44 = vadd.f32 1.0, %v8557_v21 }
 0x85c   :  { %8558 = vrcp.f32 %v2351_v22 }
 0x85d   :  { %8560 = vrcp.f32 %v2361_v44 }
 0x866   :  { %v8559_v24 = vpop.eup %8558 }
 0x867   :  { %v8561_v38 = vpop.eup %8560  ;;  %v2367_v25 = vmul.f32 %v8559_v24, %v2365_v23 }
 0x868   :  { %v2374_v20 = vmul.f32 %v8561_v38, %v2372_v36  ;;  %v2370_v30 = vsub.f32 1.0, %v8561_v38 }
 0x869   :  { %v2368_v29 = vadd.f32 %v2367_v25, %v8992_v42  ;;  %v2461_v42 = vpop.f32.mrb[27].mxu1 }
 0x86a   :  { %v2462_v53 = vadd.f32 %v6658_v47, %v2461_v42 }
 0x86b   :  { %8562 = vtanh.f32 %v2368_v29 }
 0x86c   :  { %v2470_v60 = vmax.f32 %v2462_v53, 0.0 }
 0x875   :  { %v8563_v32 = vpop.eup %8562 }
 0x876   :  { %v2371_v33 = vmul.f32 %v8563_v32, %v2370_v30 }
 0x878   :  { %v2375_v27 = vadd.f32 %v2374_v20, %v2371_v33 }
 0x87a   :  { %v2484_v34 = vrot.slane %v2375_v27, 6 }
 0x87c   :  { %7530 = vmatmul.mubr.msk.f32.vlgmr.msra.gmra.mrb[28].mxu0 %vm405_vm2, %v2484_v34 }
 0x87d   :  { %7551 = vmatprep.mubr.msk.f32.mxu0 %vm8747_vm1, %v8748_v26  ;;  %8181 = vmatpush3.bf16.msra.mxu0 %v8174_v39 }
 0x87e   :  { %8182 = vmatprep.subr.bf16.mxu0 %v8746_v17 }
 0x881   :  { %8184 = vmatpush3.bf16.msra.mxu0 %v8177_v43 }
 0x882   :  { %8191 = vmatprep.subr.bf16.mxu0 %v8746_v17 }
 0x94f   :  { %v2553_v54 = vpop.f32.mrb[28].mxu0 }
 0x950   :  { %v2554_v55 = vadd.f32 %v6661_v50, %v2553_v54  ;;  %v7531_v58 = vpop.f32.mrb[29].mxu0 }
 0x952   :  { %v2557_v59 = vmax.f32 %v2554_v55, 0.0 }
 0x954   :  { %v2561_v0 = vrot.slane %v2557_v59, %v2560_v56  ;;  %v2683_v45 = vrot.slane %v2557_v59, %v2682_v57  ;;  %v2874_v59 = vld [vmem:[%s8835_s20] sm:$0xff] }
 0x956   :  { %v2684_v52 = vmul.f32 %v2683_v45, %v2471_v28  ;;  %v2562_v2 = vmul.f32 %v2561_v0, %v2470_v60  ;;  %v2875_v60 = vld [vmem:[%s8835_s20 + $0x8] sm:$0xff]  ;;  %v2877_v0 = vld [vmem:[%s8835_s20 + $0x18] sm:$0xff]  ;;  %s6539_s20 = sshll.u32 %s8750_s6, 4  ;;  %s6540_s20 = int_to_ptr.vmem [resolvable:$true] %s6539_s20 }
 0x957   :  { %v8192_v61 = vpack.c.bf16 %v2875_v60, %v2874_v59  ;;  %v8195_v45 = vpack.c.bf16 %v2877_v0, %v2876_v62  ;;  %v6686_v59 = vld [vmem:[%s9746_s21 + $0x28] sm:$0xff]  ;;  %v3216_v60 = vld [vmem:[%s9747_s25] sm:$0xff]  ;;  %v6679_v0 = vld [vmem:[%s9746_s21 + $0x10] sm:$0xff]  ;;  %p8673_p1 = scmp.lt.s32.totalorder %s6540_s20, %s6540_s20 }
 0x958   :  { %7541 = vmatmul.mubr.msk.f32.vlgmr.msra.gmra.mrb[28].mxu1 %vm405_vm2, %v2562_v2  ;;  %7552 = vmatmul.mubr.msk.f32.vlgmr.msra.gmra.mrb[30].mxu0 %vm405_vm2, %v2684_v52  ;;  %v2961_v52 = vld [vmem:[%s8845_s4 + $0x8] sm:$0xff] }
 0x959   :  { %8187 = vmatpush3.bf16.msra.mxu1 %v8186_v1  ;;  %7562 = vmatprep.mubr.msk.f32.mxu1 %vm8747_vm1, %v8748_v26  ;;  %v2960_v1 = vld [vmem:[%s8845_s4] sm:$0xff]  ;;  %v3217_v62 = vld [vmem:[%s9747_s25 + $0x8] sm:$0x3] }
 0x95a   :  { %8188 = vmatprep.subr.bf16.mxu1 %v8746_v17  ;;  %7573 = vmatprep.mubr.msk.f32.mxu0 %vm8747_vm1, %v8748_v26  ;;  %v8198_v2 = vpack.c.bf16 %v2961_v52, %v2960_v1  ;;  %v6670_v52 = vld [vmem:[%s9748_s29] ss:$0 sm:$0xff] }
 0x95b   :  { %8193 = vmatpush3.bf16.msra.mxu0 %v8192_v61 }
 0x95c   :  { %8194 = vmatprep.subr.bf16.mxu0 %v8746_v17 }
 0x95d   :  { %8190 = vmatpush3.bf16.msra.mxu1 %v8189_v7 }
 0x95e   :  { %8197 = vmatprep.subr.bf16.mxu1 %v8746_v17 }
 0x95f   :  { %8196 = vmatpush3.bf16.msra.mxu0 %v8195_v45  ;;  %v6680_v45 = vld [vmem:[%s9746_s21 + $0x18] sm:$0xff] }
 0x960   :  { %7563 = vmatmul.mubr.msk.f32.vlgmr.msra.gmra.mrb[30].mxu1 %vm405_vm2, %v2484_v34  ;;  %8203 = vmatprep.subr.bf16.mxu0 %v8746_v17  ;;  %v8225_v1 = vpack.c.bf16 %v6680_v45, %v6679_v0  ;;  %v9434_v45 = vld [vmem:[%s9753_s24] ss:$0 sm:$0xff] }
 0x961   :  { %7584 = vmatprep.mubr.msk.f32.mxu1 %vm8747_vm1, %v8748_v26  ;;  %8199 = vmatpush3.bf16.msra.mxu1 %v8198_v2 }
 0x962   :  { %8200 = vmatprep.subr.bf16.mxu1 %v8746_v17 }
 0xa2b   :  { %v2643_v9 = vpop.f32.mrb[28].mxu1  ;;  %v2754_v10 = vpop.f32.mrb[30].mxu0 }
 0xa2c   :  { %v2644_v11 = vadd.f32 %v6663_v3, %v2643_v9  ;;  %v2755_v12 = vadd.f32 %v6663_v3, %v2754_v10  ;;  %v7542_v13 = vpop.f32.mrb[29].mxu1  ;;  %v7553_v15 = vpop.f32.mrb[31].mxu0 }
 0xa2e   :  { %v2648_v14 = vsel %vm2647_vm3, %v2644_v11, -inf  ;;  %v2758_v16 = vsel %vm2647_vm3, %v2755_v12, -inf }
 0xa2f   :  { %v2649_v18 = vrot.slane %v2648_v14, 4  ;;  %v2759_v19 = vrot.slane %v2758_v16, 4 }
 0xa31   :  { %v2650_v21 = vmax.f32 %v2648_v14, %v2649_v18  ;;  %v2760_v22 = vmax.f32 %v2758_v16, %v2759_v19 }
 0xa33   :  { %v2651_v44 = vrot.slane %v2650_v21, 2  ;;  %v2761_v49 = vrot.slane %v2760_v22, 2  ;;  %v9250_v23 = vpop.f32.mrb[30].mxu1 }
 0xa34   :  { %v7564_v24 = vpop.f32.mrb[31].mxu1 }
 0xa35   :  { %v2652_v36 = vmax.f32 %v2650_v21, %v2651_v44  ;;  %v2762_v38 = vmax.f32 %v2760_v22, %v2761_v49  ;;  %v2962_v44 = vld [vmem:[%s8845_s4 + $0x10] sm:$0xff]  ;;  %v2963_v49 = vld [vmem:[%s8845_s4 + $0x18] sm:$0xff]  ;;  %s8668_s4 = scalar_lea.vmem %s6540_s20, 32 }
 0xa36   :  { %v8201_v24 = vpack.c.bf16 %v2963_v49, %v2962_v44  ;;  %v6709_v44 = vld [vmem:[%s9750_s8 + $0x48] sm:$0xff]  ;;  %p8669_p0 = scmp.ne.s32.totalorder %s6540_s20, %s8668_s4  ;;  %p8674_p2 = scmp.lt.s32.totalorder %s8668_s4, %s8668_s4 }
 0xa37   :  { %v2653_v25 = vrot.slane %v2652_v36, 1  ;;  %v2763_v20 = vrot.slane %v2762_v38, 1 }
 0xa38   :  { %8202 = vmatpush3.bf16.msra.mxu1 %v8201_v24  ;;  %v6704_v24 = vld [vmem:[%s9750_s8 + $0x30] sm:$0xff]  ;;  %p8675_p3 = por %p8674_p2, %p8673_p1 }
 0xa39   :  { %v2654_v29 = vmax.f32 %v2652_v36, %v2653_v25  ;;  %v2764_v30 = vmax.f32 %v2762_v38, %v2763_v20  ;;  %8215 = vmatprep.subr.bf16.mxu1 %v8746_v17  ;;  %v3045_v36 = vld [vmem:[%s9742_s0] sm:$0xff]  ;;  %v3046_v38 = vld [vmem:[%s9742_s0 + $0x8] sm:$0xff]  ;;  %v3047_v25 = vld [vmem:[%s9742_s0 + $0x10] sm:$0xff] }
 0xa3a   :  { %v8204_v20 = vpack.c.bf16 %v3046_v38, %v3045_v36  ;;  %v6705_v36 = vld [vmem:[%s9750_s8 + $0x38] sm:$0xff]  ;;  %p8676_p4 = pnand %p8675_p3, %p8669_p0 }
 0xa3b   :  { %v2655_v32 = vsub.f32 %v2644_v11, %v2654_v29  ;;  %v2765_v33 = vsub.f32 %v2755_v12, %v2764_v30  ;;  %v3048_v29 = vld [vmem:[%s9742_s0 + $0x18] sm:$0xff] }
 0xa3c   :  { %v8207_v30 = vpack.c.bf16 %v3048_v29, %v3047_v25  ;;  %v6710_v25 = vld [vmem:[%s9750_s8 + $0x50] sm:$0xff]  ;;  %v9361_v29 = vpack.c.bf16 %v6705_v36, %v6704_v24 }
 0xa3d   :  { %v2656_v27 = vmul.f32 1.442695, %v2655_v32  ;;  %v2766_v34 = vmul.f32 1.442695, %v2765_v33  ;;  %v3049_v32 = vld [vmem:[%s9742_s0 + $0x20] sm:$0xff]  ;;  %v3050_v33 = vld [vmem:[%s9742_s0 + $0x28] sm:$0xff] }
 0xa3f   :  { %8564 = vpow2.f32 %v2656_v27  ;;  %v8210_v27 = vpack.c.bf16 %v3050_v33, %v3049_v32  ;;  %v6715_v32 = vld [vmem:[%s9750_s8 + $0x68] sm:$0xff] }
 0xa40   :  { %8566 = vpow2.f32 %v2766_v34  ;;  %v6666_v34 = vld [vmem:[%s9743_s5] ss:$0 sm:$0xff] }
 0xa49   :  { %v8565_v63 = vpop.eup %8564 }
 0xa4a   :  { %v8567_v35 = vpop.eup %8566  ;;  %v2658_v37 = vsel %vm2647_vm3, %v8565_v63, 0.0 }
 0xa4b   :  { %v2659_v39 = vrot.slane %v2658_v37, 4  ;;  %v2768_v42 = vsel %vm2647_vm3, %v8567_v35, 0.0 }
 0xa4c   :  { %v2769_v40 = vrot.slane %v2768_v42, 4 }
 0xa4d   :  { %v2660_v41 = vadd.f32 %v2659_v39, %v2658_v37 }
 0xa4e   :  { %v2770_v43 = vadd.f32 %v2769_v40, %v2768_v42  ;;  %v3135_v40 = vld [vmem:[%s9745_s17] sm:$0xff] }
 0xa4f   :  { %v2661_v46 = vrot.slane %v2660_v41, 2 }
 0xa50   :  { %v2771_v47 = vrot.slane %v2770_v43, 2 }
 0xa51   :  { %v2662_v48 = vadd.f32 %v2661_v46, %v2660_v41  ;;  %v3136_v41 = vld [vmem:[%s9745_s17 + $0x8] sm:$0xff] }
 0xa52   :  { %v2772_v50 = vadd.f32 %v2771_v47, %v2770_v43  ;;  %v8216_v47 = vpack.c.bf16 %v3136_v41, %v3135_v40 }
 0xa53   :  { %v2663_v51 = vrot.slane %v2662_v48, 1 }
 0xa54   :  { %v2773_v53 = vrot.slane %v2772_v50, 1 }
 0xa55   :  { %v2664_v54 = vadd.f32 %v2663_v51, %v2662_v48  ;;  %v3138_v51 = vld [vmem:[%s9745_s17 + $0x18] sm:$0xff] }
 0xa56   :  { %v2774_v55 = vadd.f32 %v2773_v53, %v2772_v50  ;;  %v3137_v50 = vld [vmem:[%s9745_s17 + $0x10] sm:$0xff]  ;;  %v3218_v53 = vld [vmem:[%s9746_s21] sm:$0xff] }
 0xa57   :  { %8568 = vrcp.f32 %v2664_v54  ;;  %v3219_v54 = vld [vmem:[%s9746_s21 + $0x8] sm:$0xff] }
 0xa58   :  { %8570 = vrcp.f32 %v2774_v55  ;;  %v8221_v55 = vpack.c.bf16 %v3219_v54, %v3218_v53  ;;  %v4208_v53 = vld [vmem:[%s8895_s23 + $0x8] sm:$0xff]  ;;  %v4209_v54 = vld [vmem:[%s8895_s23 + $0x10] sm:$0xff] }
 0xa61   :  { %v8569_v56 = vpop.eup %8568 }
 0xa62   :  { %v2666_v57 = vmul.f32 %v8569_v56, %v8565_v63  ;;  %v8571_v58 = vpop.eup %8570  ;;  %v6668_v63 = vld [vmem:[%s9744_s9] ss:$0 sm:$0xff]  ;;  %v3051_v56 = vld [vmem:[%s9742_s0 + $0x30] sm:$0xff] }
 0xa63   :  { %v2776_v28 = vmul.f32 %v8571_v58, %v8567_v35  ;;  %v2870_v35 = vadd.f32 %v6666_v34, %v9250_v23  ;;  %v8219_v23 = vpack.c.bf16 %v3138_v51, %v3137_v50  ;;  %v6685_v58 = vld [vmem:[%s9746_s21 + $0x20] sm:$0xff]  ;;  %v6716_v34 = vld [vmem:[%s9750_s8 + $0x70] sm:$0xff] }
 0xa64   :  { %2669 = vperm.xlu0 %8483, %v2666_v57   ;;  %v3052_v57 = vld [vmem:[%s9742_s0 + $0x38] sm:$0xff]  ;;  %v8229_v61 = vpack.c.bf16 %v6686_v59, %v6685_v58  ;;  %v4207_v51 = vld [vmem:[%s8895_s23] sm:$0xff] }
 0xa65   :  { %v2873_v43 = vmax.f32 %v2870_v35, 0.0 }
 0xa68   :  { %2779 = vperm.xlu0 %8483, %v2776_v28   ;;  %v8213_v28 = vpack.c.bf16 %v3052_v57, %v3051_v56  ;;  %v6672_v57 = vld [vmem:[%s9752_s19] ss:$0 sm:$0xff] }
 0xae3   :  { %v2670_v5 = vpop.permute.xlu0 %2669 }
 0xae4   :  { %v2672_v6 = vmul.f32 %v2670_v5, %v9199_v31  ;;  %v6691_v5 = vld [vmem:[%s9746_s21 + $0x30] sm:$0xff] }
 0xae6   :  { %v2673_v7 = vsel %vm405_vm2, %v2672_v6, 0.0  ;;  %v6692_v6 = vld [vmem:[%s9746_s21 + $0x38] sm:$0xff] }
 0xae7   :  { %v2674_v8 = vrot.slane %v2673_v7, 4  ;;  %v2780_v3 = vpop.permute.xlu0 %2779 }
 0xae8   :  { %v2782_v9 = vmul.f32 %v2780_v3, %v9205_v4 }
 0xae9   :  { %v2675_v10 = vadd.f32 %v2674_v8, %v2673_v7 }
 0xaea   :  { %v2783_v11 = vsel %vm405_vm2, %v2782_v9, 0.0  ;;  %v8233_v9 = vpack.c.bf16 %v6692_v6, %v6691_v5 }
 0xaeb   :  { %v2676_v12 = vrot.slane %v2675_v10, 2  ;;  %v2784_v13 = vrot.slane %v2783_v11, 4 }
 0xaed   :  { %v2677_v15 = vadd.f32 %v2676_v12, %v2675_v10  ;;  %v2785_v14 = vadd.f32 %v2784_v13, %v2783_v11  ;;  %v6674_v10 = vld [vmem:[%s9749_s3] ss:$0 sm:$0xff] }
 0xaef   :  { %v2786_v16 = vrot.slane %v2785_v14, 2  ;;  %v2678_v18 = vrot.slane %v2677_v15, 1 }
 0xaf1   :  { %v2787_v31 = vadd.f32 %v2786_v16, %v2785_v14  ;;  %v2679_v21 = vadd.f32 %v2678_v18, %v2677_v15  ;;  %v3849_v15 = vld [vmem:[%s9750_s8] sm:$0xff]  ;;  %v3850_v14 = vld [vmem:[%s9750_s8 + $0x8] sm:$0xff]  ;;  %v3851_v18 = vld [vmem:[%s9750_s8 + $0x10] sm:$0xff] }
 0xaf2   :  { %v9325_v16 = vpack.c.bf16 %v3850_v14, %v3849_v15  ;;  %v9449_v15 = vld [vmem:[%s9753_s24 + $0x3] ss:$0 sm:$0xff] }
 0xaf3   :  { %v2788_v19 = vrot.slane %v2787_v31, 1 }
 0xaf5   :  { %v2789_v4 = vadd.f32 %v2788_v19, %v2787_v31  ;;  %v3852_v31 = vld [vmem:[%s9750_s8 + $0x18] sm:$0xff]  ;;  %v6702_v19 = vld [vmem:[%s9750_s8 + $0x20] sm:$0xff] }
 0xaf7   :  { %v2791_v22 = vsel %vm2790_vm4, %v2679_v21, %v2789_v4  ;;  %v6703_v21 = vld [vmem:[%s9750_s8 + $0x28] sm:$0xff]  ;;  %v9338_v4 = vpack.c.bf16 %v3852_v31, %v3851_v18 }
 0xaf8   :  { %7574 = vmatmul.mubr.msk.f32.vlgmr.msra.gmra.mrb[32].mxu0 %vm405_vm2, %v2791_v22  ;;  %v6708_v22 = vld [vmem:[%s9750_s8 + $0x40] sm:$0xff]  ;;  %v9348_v49 = vpack.c.bf16 %v6703_v21, %v6702_v19 }
 0xaf9   :  { %7603 = vmatprep.mubr.msk.f32.mxu0 %vm8747_vm1, %v8748_v26  ;;  %8205 = vmatpush3.bf16.msra.mxu0 %v8204_v20  ;;  %v9354_v38 = vpack.c.bf16 %v6709_v44, %v6708_v22  ;;  %v6711_v20 = vld [vmem:[%s9750_s8 + $0x58] sm:$0xff]  ;;  %v9453_v19 = vld [vmem:[%s9751_s14 + $0x3] ss:$0 sm:$0xff] }
 0xafa   :  { %8206 = vmatprep.subr.bf16.mxu0 %v8746_v17  ;;  %v9370_v33 = vpack.c.bf16 %v6711_v20, %v6710_v25  ;;  %v8435_v21 = vadd.f32 %v9449_v15, %v9453_v19 }
 0xafd   :  { %8208 = vmatpush3.bf16.msra.mxu0 %v8207_v30  ;;  %v6714_v30 = vld [vmem:[%s9750_s8 + $0x60] sm:$0xff] }
 0xafe   :  { %8209 = vmatprep.subr.bf16.mxu0 %v8746_v17 }
 0xb01   :  { %8211 = vmatpush3.bf16.msra.mxu0 %v8210_v27  ;;  %v9376_v27 = vpack.c.bf16 %v6715_v32, %v6714_v30 }
 0xb02   :  { %8212 = vmatprep.subr.bf16.mxu0 %v8746_v17 }
 0xb05   :  { %8214 = vmatpush3.bf16.msra.mxu0 %v8213_v28 }
 0xb06   :  { %8226 = vmatprep.subr.bf16.mxu0 %v8225_v1 }
 0xbcb   :  { %v2954_v37 = vpop.f32.mrb[32].mxu0 }
 0xbcc   :  { %v2955_v39 = vadd.f32 %v6668_v63, %v2954_v37  ;;  %v7575_v42 = vpop.f32.mrb[33].mxu0  ;;  %v6717_v63 = vld [vmem:[%s9750_s8 + $0x78] sm:$0xff] }
 0xbcd   :  { %v9385_v35 = vpack.c.bf16 %v6717_v63, %v6716_v34 }
 0xbce   :  { %v2958_v46 = vmax.f32 %v2955_v39, 0.0  ;;  %v6676_v39 = vld [vmem:[%s9751_s14] ss:$0 sm:$0xff] }
 0xbd0   :  { %v2959_v48 = vmul.f32 %v2958_v46, %v2873_v43  ;;  %v6688_v46 = vld [vmem:[%s9751_s14 + $0x2] ss:$0 sm:$0xff] }
 0xbd2   :  { %7585 = vmatmul.mubr.msk.f32.vlgmr.msra.gmra.mrb[32].mxu1 %vm405_vm2, %v2959_v48 }
 0xbd3   :  { %8217 = vmatpush3.bf16.msra.mxu1 %v8216_v47  ;;  %7614 = vmatprep.mubr.msk.f32.mxu1 %vm8747_vm1, %v8748_v26 }
 0xbd4   :  { %8218 = vmatprep.subr.bf16.mxu1 %v8746_v17 }
 0xbd7   :  { %8220 = vmatpush3.bf16.msra.mxu1 %v8219_v23  ;;  %v9415_v23 = vpack.c.bf16 %v4208_v53, %v4207_v51 }
 0xbd8   :  { %8222 = vmatprep.subr.bf16.mxu1 %v8221_v55 }
 0xbda   :  { %7615 = vmatmul.mubr.msk.f32.vlgmr.msra.gmra.mrb[34].mxu1 %vm405_vm2, %v2959_v48 }
 0xbdb   :  { %8224 = vmatpush3.bf16.msra.mxu1 %v8221_v55  ;;  %7621 = vmatprep.mubr.msk.f32.mxu1 %vm140_vm0, %v3216_v60 }
 0xbdc   :  { %8230 = vmatprep.subr.bf16.mxu1 %v8229_v61 }
 0xbde   :  { %7622 = vmatmul.mubr.msk.f32.vlgmr.msra.gmra.mrb[36].mxu1 %vm140_vm0, %v3217_v62 }
 0xbdf   :  { %8232 = vmatpush3.bf16.msra.mxu1 %v8229_v61  ;;  %7635 = vmatprep.mubr.msk.f32.mxu1 %vm140_vm0, %v3216_v60 }
 0xbe0   :  { %8237 = vmatprep.subr.bf16.mxu1 %v8746_v17 }
 0xbe2   :  { %7636 = vmatmul.mubr.msk.f32.vlgmr.msra.gmra.mrb[38].mxu1 %vm140_vm0, %v3217_v62 }
 0xbe3   :  { %8239 = vmatpush3.bf16.msra.mxu1 %v8221_v55  ;;  %7649 = vmatprep.mubr.msk.f32.mxu1 %vm8747_vm1, %v8748_v26  ;;  %v4210_v55 = vld [vmem:[%s8895_s23 + $0x18] sm:$0xff] }
 0xbe4   :  { %8243 = vmatprep.subr.bf16.mxu1 %v8746_v17  ;;  %v9419_v56 = vpack.c.bf16 %v4210_v55, %v4209_v54 }
 0xca5   :  { %v3040_v2 = vpop.f32.mrb[32].mxu1 }
 0xca6   :  { %v3041_v7 = vadd.f32 %v6670_v52, %v3040_v2  ;;  %v7586_v8 = vpop.f32.mrb[33].mxu1  ;;  %v9438_v2 = vld [vmem:[%s9753_s24 + $0x1] ss:$0 sm:$0xff] }
 0xca8   :  { %v3044_v3 = vmax.f32 %v3041_v7, 0.0  ;;  %v9441_v7 = vld [vmem:[%s9751_s14 + $0x1] ss:$0 sm:$0xff] }
 0xcaa   :  { %7604 = vmatmul.mubr.msk.f32.vlgmr.msra.gmra.mrb[34].mxu0 %vm3060_vm5, %v3044_v3  ;;  %v8431_v3 = vadd.f32 %v9438_v2, %v9441_v7 }
 0xcab   :  { %8228 = vmatpush3.bf16.msra.mxu0 %v8225_v1  ;;  %7628 = vmatprep.mubr.msk.f32.mxu0 %vm140_vm0, %v3216_v60 }
 0xcac   :  { %8234 = vmatprep.subr.bf16.mxu0 %v8233_v9 }
 0xcad   :  { %v3212_v11 = vpop.f32.mrb[34].mxu1 }
 0xcae   :  { %v3213_v12 = vadd.f32 %v6674_v10, %v3212_v11  ;;  %v7616_v13 = vpop.f32.mrb[35].mxu1  ;;  %7629 = vmatmul.mubr.msk.f32.vlgmr.msra.gmra.mrb[36].mxu0 %vm140_vm0, %v3217_v62  ;;  %v9446_v10 = vld [vmem:[%s9753_s24 + $0x2] ss:$0 sm:$0xff] }
 0xcaf   :  { %8236 = vmatpush3.bf16.msra.mxu0 %v8233_v9  ;;  %7642 = vmatprep.mubr.msk.f32.mxu0 %vm140_vm0, %v3216_v60  ;;  %v8433_v18 = vadd.f32 %v9446_v10, %v6688_v46 }
 0xcb0   :  { %7650 = vmatmul.mubr.msk.f32.vlgmr.msra.gmra.mrb[40].mxu1 %vm140_vm0, %v3213_v12  ;;  %8240 = vmatprep.subr.bf16.mxu0 %v8746_v17 }
 0xcb1   :  { %8245 = vmatpush3.bf16.msra.mxu1 %v8229_v61  ;;  %7663 = vmatprep.mubr.msk.f32.mxu1 %vm8747_vm1, %v8748_v26  ;;  %v7623_v37 = vpop.f32.mrb[36].mxu1 }
 0xcb2   :  { %7643 = vmatmul.mubr.msk.f32.vlgmr.msra.gmra.mrb[38].mxu0 %vm140_vm0, %v3217_v62  ;;  %8249 = vmatprep.subr.bf16.mxu1 %v8746_v17  ;;  %v9403_v42 = vadd.f32 %v7623_v37, %v6676_v39  ;;  %v3299_v40 = vpop.f32.mrb[37].mxu1 }
 0xcb3   :  { %8242 = vmatpush3.bf16.msra.mxu0 %v8225_v1  ;;  %7656 = vmatprep.mubr.msk.f32.mxu0 %vm8747_vm1, %v8748_v26  ;;  %v9405_v41 = vadd.f32 %v6676_v39, %v3299_v40  ;;  %v8429_v1 = vadd.f32 %v9434_v45, %v6676_v39 }
 0xcb4   :  { %7664 = vmatmul.mubr.msk.f32.vlgmr.msra.gmra.mrb[42].mxu1 %vm140_vm0, %v3213_v12  ;;  %8246 = vmatprep.subr.bf16.mxu0 %v8746_v17 }
 0xcb5   :  { %8251 = vmatpush3.bf16.msra.mxu1 %v9325_v16  ;;  %7681 = vmatprep.mubr.msk.f32.mxu1 %vm8747_vm1, %v8748_v26  ;;  %v7637_v43 = vpop.f32.mrb[38].mxu1 }
 0xcb6   :  { %7657 = vmatmul.mubr.msk.f32.vlgmr.msra.gmra.mrb[40].mxu0 %vm140_vm0, %v3213_v12  ;;  %8252 = vmatprep.subr.bf16.mxu1 %v8746_v17  ;;  %v9408_v47 = vadd.f32 %v7637_v43, %v6688_v46  ;;  %v3471_v48 = vpop.f32.mrb[39].mxu1 }
 0xcb7   :  { %8248 = vmatpush3.bf16.msra.mxu0 %v8233_v9  ;;  %7670 = vmatprep.mubr.msk.f32.mxu0 %vm8747_vm1, %v8748_v26  ;;  %v9410_v50 = vadd.f32 %v6688_v46, %v3471_v48 }
 0xcb8   :  { %8255 = vmatprep.subr.bf16.mxu0 %v8746_v17 }
 0xcb9   :  { %8254 = vmatpush3.bf16.msra.mxu1 %v9338_v4 }
 0xcba   :  { %7671 = vmatmul.mubr.msk.f32.vlgmr.msra.gmra.mrb[42].mxu0 %vm140_vm0, %v3213_v12  ;;  %8261 = vmatprep.subr.bf16.mxu1 %v8746_v17 }
 0xcbb   :  { %8257 = vmatpush3.bf16.msra.mxu0 %v9348_v49  ;;  %7692 = vmatprep.mubr.msk.f32.mxu0 %vm8747_vm1, %v8748_v26 }
 0xcbc   :  { %7682 = vmatmul.mubr.f32.vlgmr.msra.gmra.mrb[40].mxu1 %v8748_v26  ;;  %8258 = vmatprep.subr.bf16.mxu0 %v8746_v17 }
 0xcbd   :  { %8263 = vmatpush3.bf16.msra.mxu1 %v9354_v38  ;;  %7703 = vmatprep.mubr.msk.f32.mxu1 %vm8747_vm1, %v8748_v26 }
 0xcbe   :  { %8264 = vmatprep.subr.bf16.mxu1 %v8746_v17 }
 0xcbf   :  { %8260 = vmatpush3.bf16.msra.mxu0 %v9361_v29 }
 0xcc0   :  { %8267 = vmatprep.subr.bf16.mxu0 %v8746_v17 }
 0xcc1   :  { %8266 = vmatpush3.bf16.msra.mxu1 %v9370_v33 }
 0xcc2   :  { %7693 = vmatmul.mubr.f32.vlgmr.msra.gmra.mrb[40].mxu0 %v8748_v26  ;;  %8273 = vmatprep.subr.bf16.mxu1 %v8746_v17 }
 0xcc3   :  { %8269 = vmatpush3.bf16.msra.mxu0 %v9376_v27  ;;  %7714 = vmatprep.mubr.msk.f32.mxu0 %vm8747_vm1, %v8748_v26 }
 0xcc4   :  { %7704 = vmatmul.mubr.f32.vlgmr.msra.gmra.mrb[42].mxu1 %v8748_v26  ;;  %8270 = vmatprep.subr.bf16.mxu0 %v8746_v17 }
 0xcc5   :  { %7725 = vmatprep.mubr.msk.f32.mxu1 %vm8747_vm1, %v8748_v26  ;;  %8275 = vmatpush3.bf16.msra.mxu1 %v9415_v23 }
 0xcc6   :  { %8276 = vmatprep.subr.bf16.mxu1 %v8746_v17 }
 0xcc7   :  { %8272 = vmatpush3.bf16.msra.mxu0 %v9385_v35 }
 0xcc8   :  { %8279 = vmatprep.subr.bf16.mxu0 %v8746_v17 }
 0xcc9   :  { %8278 = vmatpush3.bf16.msra.mxu1 %v9419_v56 }
 0xcca   :  { %7715 = vmatmul.mubr.f32.vlgmr.msra.gmra.mrb[42].mxu0 %v8748_v26  ;;  %8285 = vmatprep.subr.bf16.mxu1 %v8746_v17 }
 0xccb   :  { %8281 = vmatpush3.bf16.msra.mxu0 %v9325_v16  ;;  %7736 = vmatprep.mubr.msk.f32.mxu0 %vm8747_vm1, %v8748_v26 }
 0xccc   :  { %8282 = vmatprep.subr.bf16.mxu0 %v8746_v17 }
 0xccf   :  { %8284 = vmatpush3.bf16.msra.mxu0 %v9338_v4 }
 0xcd0   :  { %8291 = vmatprep.subr.bf16.mxu0 %v8746_v17 }
 0xd7d   :  { %v3130_v58 = vpop.f32.mrb[34].mxu0 }
 0xd7e   :  { %v3131_v28 = vadd.f32 %v6672_v57, %v3130_v58  ;;  %v7605_v59 = vpop.f32.mrb[35].mxu0  ;;  %v9496_v57 = vld [vmem:[%s8900_s28] ss:$0 sm:$0xff] }
 0xd80   :  { %3134 = vst [vmem:[#allocation3] sm:$0x3] %v3131_v28 }
 0xd81   :  { %v9425_v60 = vpop.f32.mrb[36].mxu0 }
 0xd82   :  { %v9427_v61 = vpop.f32.mrb[37].mxu0 }
 0xd85   :  { %v9429_v62 = vpop.f32.mrb[38].mxu0 }
 0xd86   :  { %v9431_v0 = vpop.f32.mrb[39].mxu0 }
 0xd8f   :  { %v3926_v52 = vpop.f32.mrb[40].mxu1 }
 0xd90   :  { %v8430_v5 = vadd.f32 %v8429_v1, %v3926_v52  ;;  %v7683_v6 = vpop.f32.mrb[41].mxu1 }
 0xd92   :  { %v6720_v8 = vmul.f32 -1.442695, %v8430_v5 }
 0xd94   :  { %8572 = vpow2.f32 %v6720_v8 }
 0xd95   :  { %v4009_v9 = vpop.f32.mrb[40].mxu0 }
 0xd96   :  { %v8432_v11 = vadd.f32 %v8431_v3, %v4009_v9  ;;  %v7694_v12 = vpop.f32.mrb[41].mxu0 }
 0xd97   :  { %v4092_v13 = vpop.f32.mrb[42].mxu1 }
 0xd98   :  { %v6721_v14 = vmul.f32 -1.442695, %v8432_v11  ;;  %v7705_v31 = vpop.f32.mrb[43].mxu1  ;;  %v8434_v22 = vadd.f32 %v8433_v18, %v4092_v13  ;;  %v9503_v11 = vadd.f32 %v9441_v7, %v9427_v61 }
 0xd9a   :  { %8574 = vpow2.f32 %v6721_v14 }
 0xd9b   :  { %8576 = vtanh.f32 %v8434_v22 }
 0xd9d   :  { %v4175_v44 = vpop.f32.mrb[42].mxu0 }
 0xd9e   :  { %v8573_v24 = vpop.eup %8572  ;;  %v8436_v36 = vadd.f32 %v8435_v21, %v4175_v44  ;;  %v7716_v25 = vpop.f32.mrb[43].mxu0 }
 0xd9f   :  { %v4183_v20 = vadd.f32 1.0, %v8573_v24 }
 0xda0   :  { %v6722_v30 = vmul.f32 -1.442695, %v8436_v36  ;;  %v9511_v36 = vadd.f32 %v9453_v19, %v9431_v0 }
 0xda1   :  { %8578 = vrcp.f32 %v4183_v20 }
 0xda2   :  { %8580 = vpow2.f32 %v6722_v30 }
 0xda4   :  { %v8575_v32 = vpop.eup %8574 }
 0xda5   :  { %v4190_v34 = vadd.f32 1.0, %v8575_v32  ;;  %v8577_v63 = vpop.eup %8576 }
 0xda7   :  { %8582 = vrcp.f32 %v4190_v34 }
 0xdab   :  { %v8579_v37 = vpop.eup %8578 }
 0xdac   :  { %v4203_v39 = vmul.f32 %v8579_v37, %v8577_v63  ;;  %v8581_v40 = vpop.eup %8580 }
 0xdad   :  { %v4199_v46 = vadd.f32 1.0, %v8581_v40 }
 0xdaf   :  { %8584 = vrcp.f32 %v4199_v46 }
 0xdb1   :  { %v8583_v43 = vpop.eup %8582 }
 0xdb2   :  { %v4202_v48 = vmul.f32 0.0, %v8583_v43 }
 0xdb4   :  { %v9457_v51 = vadd.f32 %v4203_v39, %v4202_v48 }
 0xdb6   :  { %8586 = vtanh.f32 %v9457_v51 }
 0xdb9   :  { %v8585_v53 = vpop.eup %8584 }
 0xdc0   :  { %v8587_v54 = vpop.eup %8586 }
 0xdc1   :  { %v4206_v55 = vmul.f32 %v8587_v54, %v8585_v53 }
 0xdc3   :  { %7726 = vmatmul.mubr.msk.f32.vlgmr.msra.gmra.mrb[44].mxu1 %vm405_vm2, %v4206_v55  ;;  %7737 = vmatmul.mubr.msk.f32.vlgmr.msra.gmra.mrb[44].mxu0 %vm405_vm2, %v4206_v55 }
 0xdc4   :  { %8287 = vmatpush3.bf16.msra.mxu1 %v9348_v49  ;;  %8293 = vmatpush3.bf16.msra.mxu0 %v9354_v38 }
 0xdc5   :  { %8288 = vmatprep.subr.bf16.mxu1 %v8746_v17  ;;  %8294 = vmatprep.subr.bf16.mxu0 %v8746_v17 }
 0xdc6   :  { %7747 = vmatprep.mubr.msk.f32.mxu1 %vm8747_vm1, %v8748_v26  ;;  %7758 = vmatprep.mubr.msk.f32.mxu0 %vm8747_vm1, %v8748_v26 }
 0xdc8   :  { %8290 = vmatpush3.bf16.msra.mxu1 %v9361_v29  ;;  %8296 = vmatpush3.bf16.msra.mxu0 %v9370_v33 }
 0xdc9   :  { %8297 = vmatprep.subr.bf16.mxu1 %v8746_v17  ;;  %8303 = vmatprep.subr.bf16.mxu0 %v8746_v17 }
 0xdcb   :  { %7748 = vmatmul.mubr.msk.f32.vlgmr.msra.gmra.mrb[46].mxu1 %vm405_vm2, %v4206_v55  ;;  %7759 = vmatmul.mubr.msk.f32.vlgmr.msra.gmra.mrb[46].mxu0 %vm405_vm2, %v4206_v55 }
 0xdcc   :  { %8299 = vmatpush3.bf16.msra.mxu1 %v9376_v27  ;;  %7769 = vmatprep.mubr.msk.f32.mxu1 %vm8747_vm1, %v8748_v26 }
 0xdcd   :  { %8300 = vmatprep.subr.bf16.mxu1 %v8746_v17  ;;  %8305 = vmatpush3.bf16.msra.mxu0 %v9415_v23 }
 0xdce   :  { %8306 = vmatprep.subr.bf16.mxu0 %v8746_v17  ;;  %7780 = vmatprep.mubr.msk.f32.mxu0 %vm8747_vm1, %v8748_v26 }
 0xdd0   :  { %8302 = vmatpush3.bf16.msra.mxu1 %v9385_v35 }
 0xdd1   :  { %8309 = vmatprep.subr.bf16.mxu1 %v8746_v17  ;;  %8308 = vmatpush3.bf16.msra.mxu0 %v9419_v56 }
 0xdd2   :  { %8315 = vmatprep.subr.bf16.mxu0 %v8746_v17 }
 0xdd3   :  { %7770 = vmatmul.mubr.msk.f32.vlgmr.msra.gmra.mrb[48].mxu1 %vm405_vm2, %v4206_v55 }
 0xdd4   :  { %8311 = vmatpush3.bf16.msra.mxu1 %v9325_v16  ;;  %7791 = vmatprep.mubr.msk.f32.mxu1 %vm8747_vm1, %v8748_v26 }
 0xdd5   :  { %8312 = vmatprep.subr.bf16.mxu1 %v8746_v17 }
 0xdd8   :  { %8314 = vmatpush3.bf16.msra.mxu1 %v9338_v4 }
 0xdd9   :  { %8321 = vmatprep.subr.bf16.mxu1 %v8746_v17 }
 0xe96   :  { %v4287_v58 = vpop.f32.mrb[44].mxu1  ;;  %v4369_v28 = vpop.f32.mrb[44].mxu0 }
 0xe97   :  { %v4288_v59 = vadd.f32 %v9496_v57, %v4287_v58  ;;  %v4370_v1 = vadd.f32 %v9434_v45, %v4369_v28  ;;  %v7727_v52 = vpop.f32.mrb[45].mxu1  ;;  %v7738_v5 = vpop.f32.mrb[45].mxu0 }
 0xe99   :  { %4291 = vst [vmem:[#allocation5] sm:$0x3] %v4288_v59  ;;  %v4616_v6 = vadd.f32 %v4370_v1, %v9405_v41 }
 0xe9b   :  { %v6748_v8 = vmul.f32 -1.442695, %v4616_v6 }
 0xe9d   :  { %8588 = vpow2.f32 %v6748_v8 }
 0xe9e   :  { %v4450_v3 = vpop.f32.mrb[46].mxu1  ;;  %v4531_v9 = vpop.f32.mrb[46].mxu0 }
 0xe9f   :  { %v4451_v12 = vadd.f32 %v9438_v2, %v4450_v3  ;;  %v7749_v13 = vpop.f32.mrb[47].mxu1  ;;  %v7760_v14 = vpop.f32.mrb[47].mxu0  ;;  %v4532_v31 = vadd.f32 %v9446_v10, %v4531_v9 }
 0xea1   :  { %v4623_v18 = vadd.f32 %v4451_v12, %v9503_v11  ;;  %v4630_v22 = vadd.f32 %v4532_v31, %v9410_v50 }
 0xea3   :  { %v6749_v21 = vmul.f32 -1.442695, %v4623_v18 }
 0xea5   :  { %8590 = vpow2.f32 %v6749_v21 }
 0xea6   :  { %v4612_v44 = vpop.f32.mrb[48].mxu1  ;;  %8592 = vtanh.f32 %v4630_v22 }
 0xea7   :  { %v8589_v24 = vpop.eup %8588  ;;  %v4613_v61 = vadd.f32 %v9449_v15, %v4612_v44  ;;  %v7771_v25 = vpop.f32.mrb[49].mxu1 }
 0xea8   :  { %v4620_v20 = vadd.f32 1.0, %v8589_v24 }
 0xea9   :  { %v4632_v30 = vadd.f32 %v4613_v61, %v9511_v36 }
 0xeaa   :  { %8594 = vrcp.f32 %v4620_v20 }
 0xeab   :  { %v6750_v32 = vmul.f32 -1.442695, %v4632_v30 }
 0xead   :  { %8596 = vpow2.f32 %v6750_v32 }
 0xeaf   :  { %v8591_v34 = vpop.eup %8590 }
 0xeb0   :  { %v4627_v63 = vadd.f32 1.0, %v8591_v34  ;;  %v8593_v37 = vpop.eup %8592 }
 0xeb2   :  { %8598 = vrcp.f32 %v4627_v63 }
 0xeb4   :  { %v8595_v39 = vpop.eup %8594 }
 0xeb5   :  { %v4640_v40 = vmul.f32 %v8595_v39, %v8593_v37 }
 0xeb7   :  { %v8597_v43 = vpop.eup %8596 }
 0xeb8   :  { %v4636_v0 = vadd.f32 1.0, %v8597_v43 }
 0xeba   :  { %8600 = vrcp.f32 %v4636_v0 }
 0xebc   :  { %v8599_v46 = vpop.eup %8598 }
 0xebd   :  { %v4639_v48 = vmul.f32 %v8599_v46, %v9457_v51 }
 0xebf   :  { %v9516_v53 = vadd.f32 %v4640_v40, %v4639_v48 }
 0xec1   :  { %8602 = vtanh.f32 %v9516_v53 }
 0xec4   :  { %v8601_v54 = vpop.eup %8600 }
 0xecb   :  { %v8603_v55 = vpop.eup %8602 }
 0xecc   :  { %v4643_v58 = vmul.f32 %v8603_v55, %v8601_v54  ;;  %v5090_v55 = vrot.slane %v9516_v53, 6 }
 0xece   :  { %7781 = vmatmul.mubr.msk.f32.vlgmr.msra.gmra.mrb[48].mxu0 %vm405_vm2, %v4643_v58  ;;  %7792 = vmatmul.mubr.msk.f32.vlgmr.msra.gmra.mrb[50].mxu1 %vm405_vm2, %v4643_v58 }
 0xecf   :  { %8317 = vmatpush3.bf16.msra.mxu0 %v9348_v49  ;;  %8323 = vmatpush3.bf16.msra.mxu1 %v9354_v38 }
 0xed0   :  { %8318 = vmatprep.subr.bf16.mxu0 %v8746_v17  ;;  %8324 = vmatprep.subr.bf16.mxu1 %v8746_v17 }
 0xed1   :  { %7802 = vmatprep.mubr.msk.f32.mxu0 %vm8747_vm1, %v8748_v26  ;;  %7813 = vmatprep.mubr.msk.f32.mxu1 %vm8747_vm1, %v8748_v26 }
 0xed3   :  { %8320 = vmatpush3.bf16.msra.mxu0 %v9361_v29  ;;  %8326 = vmatpush3.bf16.msra.mxu1 %v9370_v33 }
 0xed4   :  { %8327 = vmatprep.subr.bf16.mxu0 %v8746_v17  ;;  %8333 = vmatprep.subr.bf16.mxu1 %v8746_v17 }
 0xed6   :  { %7803 = vmatmul.mubr.msk.f32.vlgmr.msra.gmra.mrb[50].mxu0 %vm405_vm2, %v4643_v58  ;;  %7814 = vmatmul.mubr.msk.f32.vlgmr.msra.gmra.mrb[52].mxu1 %vm405_vm2, %v4643_v58 }
 0xed7   :  { %8329 = vmatpush3.bf16.msra.mxu0 %v9376_v27  ;;  %7824 = vmatprep.mubr.msk.f32.mxu0 %vm8747_vm1, %v8748_v26 }
 0xed8   :  { %8330 = vmatprep.subr.bf16.mxu0 %v8746_v17  ;;  %8335 = vmatpush3.bf16.msra.mxu1 %v9415_v23 }
 0xed9   :  { %8336 = vmatprep.subr.bf16.mxu1 %v8746_v17  ;;  %7835 = vmatprep.mubr.msk.f32.mxu1 %vm8747_vm1, %v8748_v26 }
 0xedb   :  { %8332 = vmatpush3.bf16.msra.mxu0 %v9385_v35 }
 0xedc   :  { %8339 = vmatprep.subr.bf16.mxu0 %v8746_v17  ;;  %8338 = vmatpush3.bf16.msra.mxu1 %v9419_v56 }
 0xedd   :  { %8345 = vmatprep.subr.bf16.mxu1 %v8746_v17 }
 0xede   :  { %7825 = vmatmul.mubr.msk.f32.vlgmr.msra.gmra.mrb[52].mxu0 %vm405_vm2, %v4643_v58 }
 0xedf   :  { %8341 = vmatpush3.bf16.msra.mxu0 %v9325_v16  ;;  %7846 = vmatprep.mubr.msk.f32.mxu0 %vm8747_vm1, %v8748_v26 }
 0xee0   :  { %8342 = vmatprep.subr.bf16.mxu0 %v8746_v17 }
 0xee3   :  { %8344 = vmatpush3.bf16.msra.mxu0 %v9338_v4 }
 0xee4   :  { %8351 = vmatprep.subr.bf16.mxu0 %v8746_v17 }
 0xfa1   :  { %v4724_v51 = vpop.f32.mrb[48].mxu0  ;;  %v4807_v28 = vpop.f32.mrb[50].mxu1 }
 0xfa2   :  { %v4725_v59 = vadd.f32 %v9496_v57, %v4724_v51  ;;  %v4808_v1 = vadd.f32 %v9434_v45, %v4807_v28  ;;  %v7782_v52 = vpop.f32.mrb[49].mxu0  ;;  %v7793_v5 = vpop.f32.mrb[51].mxu1 }
 0xfa4   :  { %4729 = vst [vmem:[#allocation5 + $0x2] sm:$0x3] %v4725_v59  ;;  %v5055_v6 = vrot.slane %v4808_v1, 6 }
 0xfa6   :  { %v5057_v8 = vadd.f32 %v5055_v6, %v9405_v41 }
 0xfa8   :  { %v6776_v3 = vmul.f32 -1.442695, %v5057_v8 }
 0xfa9   :  { %v4888_v9 = vpop.f32.mrb[50].mxu0  ;;  %v4969_v12 = vpop.f32.mrb[52].mxu1 }
 0xfaa   :  { %8604 = vpow2.f32 %v6776_v3  ;;  %v4889_v13 = vadd.f32 %v9438_v2, %v4888_v9  ;;  %v4970_v14 = vadd.f32 %v9446_v10, %v4969_v12  ;;  %v7804_v18 = vpop.f32.mrb[51].mxu0  ;;  %v7815_v31 = vpop.f32.mrb[53].mxu1 }
 0xfac   :  { %v5065_v21 = vrot.slane %v4889_v13, 6  ;;  %v5075_v44 = vrot.slane %v4970_v14, 6 }
 0xfae   :  { %v5067_v22 = vadd.f32 %v5065_v21, %v9503_v11  ;;  %v5077_v25 = vadd.f32 %v5075_v44, %v9410_v50 }
 0xfb0   :  { %v6777_v24 = vmul.f32 -1.442695, %v5067_v22 }
 0xfb1   :  { %v5050_v61 = vpop.f32.mrb[52].mxu0 }
 0xfb2   :  { %8606 = vpow2.f32 %v6777_v24  ;;  %v5051_v20 = vadd.f32 %v9449_v15, %v5050_v61  ;;  %v7826_v30 = vpop.f32.mrb[53].mxu0 }
 0xfb3   :  { %8608 = vtanh.f32 %v5077_v25 }
 0xfb4   :  { %v8605_v32 = vpop.eup %8604  ;;  %v5080_v34 = vrot.slane %v5051_v20, 6 }
 0xfb5   :  { %v5061_v63 = vadd.f32 1.0, %v8605_v32 }
 0xfb6   :  { %v5082_v37 = vadd.f32 %v5080_v34, %v9511_v36 }
 0xfb7   :  { %8610 = vrcp.f32 %v5061_v63 }
 0xfb8   :  { %v6778_v39 = vmul.f32 -1.442695, %v5082_v37 }
 0xfba   :  { %8612 = vpow2.f32 %v6778_v39 }
 0xfbc   :  { %v8607_v40 = vpop.eup %8606 }
 0xfbd   :  { %v5071_v43 = vadd.f32 1.0, %v8607_v40  ;;  %v8609_v46 = vpop.eup %8608 }
 0xfbf   :  { %8614 = vrcp.f32 %v5071_v43 }
 0xfc1   :  { %v8611_v0 = vpop.eup %8610 }
 0xfc2   :  { %v5093_v48 = vmul.f32 %v8611_v0, %v8609_v46 }
 0xfc4   :  { %v8613_v54 = vpop.eup %8612 }
 0xfc5   :  { %v5086_v51 = vadd.f32 1.0, %v8613_v54 }
 0xfc7   :  { %8616 = vrcp.f32 %v5086_v51 }
 0xfc9   :  { %v8615_v58 = vpop.eup %8614 }
 0xfca   :  { %v5092_v28 = vmul.f32 %v8615_v58, %v5090_v55 }
 0xfcc   :  { %v9564_v59 = vadd.f32 %v5093_v48, %v5092_v28 }
 0xfce   :  { %8618 = vtanh.f32 %v9564_v59 }
 0xfd1   :  { %v8617_v1 = vpop.eup %8616 }
 0xfd8   :  { %v8619_v52 = vpop.eup %8618 }
 0xfd9   :  { %v5096_v5 = vmul.f32 %v8619_v52, %v8617_v1  ;;  %v5544_v1 = vrot.slane %v9564_v59, 6 }
 0xfdb   :  { %v5109_v6 = vrot.slane %v5096_v5, 2 }
 0xfdd   :  { %7836 = vmatmul.mubr.msk.f32.vlgmr.msra.gmra.mrb[54].mxu1 %vm405_vm2, %v5109_v6  ;;  %7847 = vmatmul.mubr.msk.f32.vlgmr.msra.gmra.mrb[54].mxu0 %vm405_vm2, %v5109_v6 }
 0xfde   :  { %8347 = vmatpush3.bf16.msra.mxu1 %v9348_v49  ;;  %8353 = vmatpush3.bf16.msra.mxu0 %v9354_v38 }
 0xfdf   :  { %8348 = vmatprep.subr.bf16.mxu1 %v8746_v17  ;;  %8354 = vmatprep.subr.bf16.mxu0 %v8746_v17 }
 0xfe0   :  { %7857 = vmatprep.mubr.msk.f32.mxu1 %vm8747_vm1, %v8748_v26  ;;  %7868 = vmatprep.mubr.msk.f32.mxu0 %vm8747_vm1, %v8748_v26 }
 0xfe2   :  { %8350 = vmatpush3.bf16.msra.mxu1 %v9361_v29  ;;  %8356 = vmatpush3.bf16.msra.mxu0 %v9370_v33 }
 0xfe3   :  { %8357 = vmatprep.subr.bf16.mxu1 %v8746_v17  ;;  %8363 = vmatprep.subr.bf16.mxu0 %v8746_v17 }
 0xfe5   :  { %7858 = vmatmul.mubr.msk.f32.vlgmr.msra.gmra.mrb[56].mxu1 %vm405_vm2, %v5109_v6  ;;  %7869 = vmatmul.mubr.msk.f32.vlgmr.msra.gmra.mrb[56].mxu0 %vm405_vm2, %v5109_v6 }
 0xfe6   :  { %8359 = vmatpush3.bf16.msra.mxu1 %v9376_v27  ;;  %7879 = vmatprep.mubr.msk.f32.mxu1 %vm8747_vm1, %v8748_v26 }
 0xfe7   :  { %8360 = vmatprep.subr.bf16.mxu1 %v8746_v17  ;;  %8365 = vmatpush3.bf16.msra.mxu0 %v9415_v23 }
 0xfe8   :  { %8366 = vmatprep.subr.bf16.mxu0 %v8746_v17  ;;  %7890 = vmatprep.mubr.msk.f32.mxu0 %vm8747_vm1, %v8748_v26 }
 0xfea   :  { %8362 = vmatpush3.bf16.msra.mxu1 %v9385_v35 }
 0xfeb   :  { %8369 = vmatprep.subr.bf16.mxu1 %v8746_v17  ;;  %8368 = vmatpush3.bf16.msra.mxu0 %v9419_v56 }
 0xfec   :  { %8375 = vmatprep.subr.bf16.mxu0 %v8746_v17 }
 0xfed   :  { %7880 = vmatmul.mubr.msk.f32.vlgmr.msra.gmra.mrb[58].mxu1 %vm405_vm2, %v5109_v6 }
 0xfee   :  { %8371 = vmatpush3.bf16.msra.mxu1 %v9325_v16  ;;  %7901 = vmatprep.mubr.msk.f32.mxu1 %vm8747_vm1, %v8748_v26 }
 0xfef   :  { %8372 = vmatprep.subr.bf16.mxu1 %v8746_v17 }
 0xff2   :  { %8374 = vmatpush3.bf16.msra.mxu1 %v9338_v4 }
 0xff3   :  { %8381 = vmatprep.subr.bf16.mxu1 %v8746_v17 }
0x10b0   :  { %v5178_v53 = vpop.f32.mrb[54].mxu1  ;;  %v5261_v8 = vpop.f32.mrb[54].mxu0 }
0x10b1   :  { %v5179_v3 = vadd.f32 %v9496_v57, %v5178_v53  ;;  %v5262_v9 = vadd.f32 %v9434_v45, %v5261_v8  ;;  %v7837_v12 = vpop.f32.mrb[55].mxu1  ;;  %v7848_v13 = vpop.f32.mrb[55].mxu0 }
0x10b3   :  { %5183 = vst [vmem:[#allocation5 + $0x4] sm:$0x3] %v5179_v3  ;;  %v5509_v14 = vrot.slane %v5262_v9, 4 }
0x10b5   :  { %v5511_v16 = vadd.f32 %v5509_v14, %v9405_v41 }
0x10b7   :  { %v6804_v18 = vmul.f32 -1.442695, %v5511_v16 }
0x10b8   :  { %v5342_v31 = vpop.f32.mrb[56].mxu1  ;;  %v5423_v21 = vpop.f32.mrb[56].mxu0 }
0x10b9   :  { %8620 = vpow2.f32 %v6804_v18  ;;  %v5343_v4 = vadd.f32 %v9438_v2, %v5342_v31  ;;  %v5424_v22 = vadd.f32 %v9446_v10, %v5423_v21  ;;  %v7859_v44 = vpop.f32.mrb[57].mxu1  ;;  %v7870_v24 = vpop.f32.mrb[57].mxu0 }
0x10bb   :  { %v5519_v61 = vrot.slane %v5343_v4, 4  ;;  %v5529_v20 = vrot.slane %v5424_v22, 4 }
0x10bd   :  { %v5521_v25 = vadd.f32 %v5519_v61, %v9503_v11  ;;  %v5531_v34 = vadd.f32 %v5529_v20, %v9410_v50 }
0x10bf   :  { %v6805_v30 = vmul.f32 -1.442695, %v5521_v25 }
0x10c0   :  { %v5504_v32 = vpop.f32.mrb[58].mxu1 }
0x10c1   :  { %8622 = vpow2.f32 %v6805_v30  ;;  %v5505_v63 = vadd.f32 %v9449_v15, %v5504_v32  ;;  %v7881_v37 = vpop.f32.mrb[59].mxu1 }
0x10c2   :  { %8624 = vtanh.f32 %v5531_v34 }
0x10c3   :  { %v8621_v39 = vpop.eup %8620  ;;  %v5534_v40 = vrot.slane %v5505_v63, 4 }
0x10c4   :  { %v5515_v43 = vadd.f32 1.0, %v8621_v39 }
0x10c5   :  { %v5536_v46 = vadd.f32 %v5534_v40, %v9511_v36 }
0x10c6   :  { %8626 = vrcp.f32 %v5515_v43 }
0x10c7   :  { %v6806_v0 = vmul.f32 -1.442695, %v5536_v46 }
0x10c9   :  { %8628 = vpow2.f32 %v6806_v0 }
0x10cb   :  { %v8623_v48 = vpop.eup %8622 }
0x10cc   :  { %v5525_v54 = vadd.f32 1.0, %v8623_v48  ;;  %v8625_v55 = vpop.eup %8624 }
0x10ce   :  { %8630 = vrcp.f32 %v5525_v54 }
0x10d0   :  { %v8627_v58 = vpop.eup %8626 }
0x10d1   :  { %v5547_v51 = vmul.f32 %v8627_v58, %v8625_v55 }
0x10d3   :  { %v8629_v28 = vpop.eup %8628 }
0x10d4   :  { %v5540_v5 = vadd.f32 1.0, %v8629_v28  ;;  %v6839_v28 = vld [vmem:[%s9750_s8 + $0x20] sm:$0xff] }
0x10d6   :  { %8632 = vrcp.f32 %v5540_v5  ;;  %v6846_v5 = vld [vmem:[%s9750_s8 + $0x40] sm:$0xff] }
0x10d8   :  { %v8631_v52 = vpop.eup %8630 }
0x10d9   :  { %v5546_v6 = vmul.f32 %v8631_v52, %v5544_v1  ;;  %v6840_v52 = vld [vmem:[%s9750_s8 + $0x28] sm:$0xff] }
0x10db   :  { %v9612_v53 = vadd.f32 %v5547_v51, %v5546_v6  ;;  %v6847_v6 = vld [vmem:[%s9750_s8 + $0x48] sm:$0xff] }
0x10dd   :  { %8634 = vtanh.f32 %v9612_v53  ;;  %v5998_v54 = vrot.slane %v9612_v53, 6  ;;  %v8406_v53 = vpack.c.bf16 %v6840_v52, %v6839_v28 }
0x10e0   :  { %v8633_v8 = vpop.eup %8632 }
0x10e7   :  { %v8635_v3 = vpop.eup %8634 }
0x10e8   :  { %v5550_v9 = vmul.f32 %v8635_v3, %v8633_v8 }
0x10ea   :  { %v5563_v12 = vrot.slane %v5550_v9, 4  ;;  %v8412_v9 = vpack.c.bf16 %v6847_v6, %v6846_v5 }
0x10ec   :  { %7891 = vmatmul.mubr.msk.f32.vlgmr.msra.gmra.mrb[58].mxu0 %vm405_vm2, %v5563_v12  ;;  %7902 = vmatmul.mubr.msk.f32.vlgmr.msra.gmra.mrb[60].mxu1 %vm405_vm2, %v5563_v12 }
0x10ed   :  { %8377 = vmatpush3.bf16.msra.mxu0 %v9348_v49  ;;  %8383 = vmatpush3.bf16.msra.mxu1 %v9354_v38  ;;  %v6092_v49 = vld [vmem:[%s9750_s8] sm:$0xff]  ;;  %v6093_v38 = vld [vmem:[%s9750_s8 + $0x8] sm:$0xff] }
0x10ee   :  { %8378 = vmatprep.subr.bf16.mxu0 %v8746_v17  ;;  %8384 = vmatprep.subr.bf16.mxu1 %v8746_v17 }
0x10ef   :  { %7912 = vmatprep.mubr.msk.f32.mxu0 %vm8747_vm1, %v8748_v26  ;;  %7923 = vmatprep.mubr.msk.f32.mxu1 %vm8747_vm1, %v8748_v26 }
0x10f1   :  { %8380 = vmatpush3.bf16.msra.mxu0 %v9361_v29  ;;  %8386 = vmatpush3.bf16.msra.mxu1 %v9370_v33  ;;  %v6094_v29 = vld [vmem:[%s9750_s8 + $0x10] sm:$0xff]  ;;  %v8400_v33 = vpack.c.bf16 %v6093_v38, %v6092_v49  ;;  %v6842_v38 = vld [vmem:[%s9750_s8 + $0x38] sm:$0xff] }
0x10f2   :  { %8387 = vmatprep.subr.bf16.mxu0 %v8746_v17  ;;  %8393 = vmatprep.subr.bf16.mxu1 %v8746_v17 }
0x10f4   :  { %7913 = vmatmul.mubr.msk.f32.vlgmr.msra.gmra.mrb[60].mxu0 %vm405_vm2, %v5563_v12  ;;  %7924 = vmatmul.mubr.msk.f32.vlgmr.msra.gmra.mrb[62].mxu1 %vm405_vm2, %v5563_v12 }
0x10f5   :  { %8389 = vmatpush3.bf16.msra.mxu0 %v9376_v27  ;;  %7934 = vmatprep.mubr.msk.f32.mxu0 %vm8747_vm1, %v8748_v26  ;;  %v6095_v27 = vld [vmem:[%s9750_s8 + $0x18] sm:$0xff] }
0x10f6   :  { %8390 = vmatprep.subr.bf16.mxu0 %v8746_v17  ;;  %8395 = vmatpush3.bf16.msra.mxu1 %v9415_v23  ;;  %v8403_v23 = vpack.c.bf16 %v6095_v27, %v6094_v29  ;;  %v6848_v29 = vld [vmem:[%s9750_s8 + $0x50] sm:$0xff] }
0x10f7   :  { %8396 = vmatprep.subr.bf16.mxu1 %v8746_v17  ;;  %7945 = vmatprep.mubr.msk.f32.mxu1 %vm8747_vm1, %v8748_v26 }
0x10f9   :  { %8392 = vmatpush3.bf16.msra.mxu0 %v9385_v35 }
0x10fa   :  { %8399 = vmatprep.subr.bf16.mxu0 %v8746_v17  ;;  %8398 = vmatpush3.bf16.msra.mxu1 %v9419_v56 }
0x10fb   :  { %8405 = vmatprep.subr.bf16.mxu1 %v8746_v17 }
0x10fc   :  { %7935 = vmatmul.mubr.msk.f32.vlgmr.msra.gmra.mrb[62].mxu0 %vm405_vm2, %v5563_v12  ;;  %v6841_v12 = vld [vmem:[%s9750_s8 + $0x30] sm:$0xff] }
0x10fd   :  { %7956 = vmatprep.mubr.msk.f32.mxu0 %vm8747_vm1, %v8748_v26  ;;  %8401 = vmatpush3.bf16.msra.mxu0 %v8400_v33  ;;  %v6849_v33 = vld [vmem:[%s9750_s8 + $0x58] sm:$0xff]  ;;  %v8409_v27 = vpack.c.bf16 %v6842_v38, %v6841_v12 }
0x10fe   :  { %8402 = vmatprep.subr.bf16.mxu0 %v8746_v17 }
0x1101   :  { %8404 = vmatpush3.bf16.msra.mxu0 %v8403_v23  ;;  %v8415_v23 = vpack.c.bf16 %v6849_v33, %v6848_v29 }
0x1102   :  { %8411 = vmatprep.subr.bf16.mxu0 %v8746_v17 }
0x11bf   :  { %v5632_v35 = vpop.f32.mrb[58].mxu0  ;;  %v5715_v56 = vpop.f32.mrb[60].mxu1 }
0x11c0   :  { %v5633_v59 = vadd.f32 %v9496_v57, %v5632_v35  ;;  %v5716_v13 = vadd.f32 %v9434_v45, %v5715_v56  ;;  %v7892_v14 = vpop.f32.mrb[59].mxu0  ;;  %v7903_v16 = vpop.f32.mrb[61].mxu1  ;;  %v6853_v35 = vld [vmem:[%s9750_s8 + $0x60] sm:$0xff]  ;;  %v6854_v56 = vld [vmem:[%s9750_s8 + $0x68] sm:$0xff] }
0x11c1   :  { %v6856_v14 = vld [vmem:[%s9750_s8 + $0x78] sm:$0xff] }
0x11c2   :  { %5637 = vst [vmem:[#allocation5 + $0x6] sm:$0x3] %v5633_v59  ;;  %v5963_v18 = vrot.slane %v5716_v13, 2  ;;  %v8418_v59 = vpack.c.bf16 %v6854_v56, %v6853_v35  ;;  %v6855_v13 = vld [vmem:[%s9750_s8 + $0x70] sm:$0xff] }
0x11c3   :  { %v8421_v16 = vpack.c.bf16 %v6856_v14, %v6855_v13 }
0x11c4   :  { %v5965_v31 = vadd.f32 %v5963_v18, %v9405_v41  ;;  %v6447_v18 = vld [vmem:[%s8895_s23] sm:$0xff] }
0x11c6   :  { %v6832_v21 = vmul.f32 -1.442695, %v5965_v31  ;;  %v6448_v31 = vld [vmem:[%s8895_s23 + $0x8] sm:$0xff] }
0x11c7   :  { %v5796_v4 = vpop.f32.mrb[60].mxu0  ;;  %v5877_v22 = vpop.f32.mrb[62].mxu1 }
0x11c8   :  { %8636 = vpow2.f32 %v6832_v21  ;;  %v5797_v44 = vadd.f32 %v9438_v2, %v5796_v4  ;;  %v5878_v24 = vadd.f32 %v9446_v10, %v5877_v22  ;;  %v7914_v61 = vpop.f32.mrb[61].mxu0  ;;  %v7925_v25 = vpop.f32.mrb[63].mxu1  ;;  %v6449_v21 = vld [vmem:[%s8895_s23 + $0x10] sm:$0xff]  ;;  %v8424_v4 = vpack.c.bf16 %v6448_v31, %v6447_v18  ;;  %v6450_v22 = vld [vmem:[%s8895_s23 + $0x18] sm:$0xff] }
0x11ca   :  { %v5973_v20 = vrot.slane %v5797_v44, 2  ;;  %v5983_v45 = vrot.slane %v5878_v24, 2  ;;  %v8427_v44 = vpack.c.bf16 %v6450_v22, %v6449_v21  ;;  %v6837_v24 = vld [vmem:[%s9753_s24] ss:$0 sm:$0xff] }
0x11cc   :  { %v5975_v30 = vadd.f32 %v5973_v20, %v9503_v11  ;;  %v5985_v63 = vadd.f32 %v5983_v45, %v9410_v50 }
0x11ce   :  { %v6833_v32 = vmul.f32 -1.442695, %v5975_v30 }
0x11cf   :  { %v5958_v34 = vpop.f32.mrb[62].mxu0 }
0x11d0   :  { %8638 = vpow2.f32 %v6833_v32  ;;  %v5959_v41 = vadd.f32 %v9449_v15, %v5958_v34  ;;  %v7936_v37 = vpop.f32.mrb[63].mxu0 }
0x11d1   :  { %8640 = vtanh.f32 %v5985_v63  ;;  %v6844_v63 = vld [vmem:[%s9753_s24 + $0x1] ss:$0 sm:$0xff] }
0x11d2   :  { %v8637_v39 = vpop.eup %8636  ;;  %v5988_v40 = vrot.slane %v5959_v41, 2  ;;  %v6851_v41 = vld [vmem:[%s9753_s24 + $0x2] ss:$0 sm:$0xff] }
0x11d3   :  { %v5969_v43 = vadd.f32 1.0, %v8637_v39 }
0x11d4   :  { %v5990_v2 = vadd.f32 %v5988_v40, %v9511_v36 }
0x11d5   :  { %8642 = vrcp.f32 %v5969_v43 }
0x11d6   :  { %v6834_v10 = vmul.f32 -1.442695, %v5990_v2 }
0x11d8   :  { %8644 = vpow2.f32 %v6834_v10 }
0x11da   :  { %v8639_v46 = vpop.eup %8638 }
0x11db   :  { %v5979_v11 = vadd.f32 1.0, %v8639_v46  ;;  %v8641_v50 = vpop.eup %8640 }
0x11dd   :  { %8646 = vrcp.f32 %v5979_v11 }
0x11df   :  { %v8643_v0 = vpop.eup %8642 }
0x11e0   :  { %v6001_v15 = vmul.f32 %v8643_v0, %v8641_v50  ;;  %v6858_v0 = vld [vmem:[%s9753_s24 + $0x3] ss:$0 sm:$0xff] }
0x11e2   :  { %v8645_v48 = vpop.eup %8644 }
0x11e3   :  { %v5994_v58 = vadd.f32 1.0, %v8645_v48  ;;  %v3563_v48 = vadd.f32 %v9429_v62, %v9453_v19 }
0x11e5   :  { %8648 = vrcp.f32 %v5994_v58 }
0x11e7   :  { %v8647_v55 = vpop.eup %8646 }
0x11e8   :  { %v6000_v36 = vmul.f32 %v8647_v55, %v5998_v54 }
0x11ea   :  { %v9662_v51 = vadd.f32 %v6001_v15, %v6000_v36 }
0x11ec   :  { %8650 = vtanh.f32 %v9662_v51  ;;  %v6440_v6 = vrot.slane %v9662_v51, 6 }
0x11ef   :  { %v8649_v1 = vpop.eup %8648 }
0x11f6   :  { %v8651_v8 = vpop.eup %8650 }
0x11f7   :  { %v6004_v3 = vmul.f32 %v8651_v8, %v8649_v1 }
0x11f9   :  { %v6017_v49 = vrot.slane %v6004_v3, 6 }
0x11fb   :  { %7946 = vmatmul.mubr.msk.f32.vlgmr.msra.gmra.mrb[64].mxu1 %vm405_vm2, %v6017_v49  ;;  %7957 = vmatmul.mubr.msk.f32.vlgmr.msra.gmra.mrb[64].mxu0 %vm405_vm2, %v6017_v49 }
0x11fc   :  { %8407 = vmatpush3.bf16.msra.mxu1 %v8406_v53  ;;  %8413 = vmatpush3.bf16.msra.mxu0 %v8412_v9 }
0x11fd   :  { %8408 = vmatprep.subr.bf16.mxu1 %v8746_v17  ;;  %8414 = vmatprep.subr.bf16.mxu0 %v8746_v17 }
0x11fe   :  { %7967 = vmatprep.mubr.msk.f32.mxu1 %vm8747_vm1, %v8748_v26  ;;  %7978 = vmatprep.mubr.msk.f32.mxu0 %vm8747_vm1, %v8748_v26 }
0x1200   :  { %8410 = vmatpush3.bf16.msra.mxu1 %v8409_v27  ;;  %8416 = vmatpush3.bf16.msra.mxu0 %v8415_v23 }
0x1201   :  { %8417 = vmatprep.subr.bf16.mxu1 %v8746_v17  ;;  %8423 = vmatprep.subr.bf16.mxu0 %v8746_v17 }
0x1203   :  { %7968 = vmatmul.mubr.msk.f32.vlgmr.msra.gmra.mrb[66].mxu1 %vm405_vm2, %v6017_v49  ;;  %7979 = vmatmul.mubr.msk.f32.vlgmr.msra.gmra.mrb[66].mxu0 %vm405_vm2, %v6017_v49 }
0x1204   :  { %8419 = vmatpush3.bf16.msra.mxu1 %v8418_v59  ;;  %7989 = vmatprep.mubr.msk.f32.mxu1 %vm8747_vm1, %v8748_v26 }
0x1205   :  { %8420 = vmatprep.subr.bf16.mxu1 %v8746_v17  ;;  %8000 = vmatprep.mubr.msk.f32.mxu0 %vm8747_vm1, %v8748_v26 }
0x1206   :  { %8425 = vmatpush3.bf16.msra.mxu0 %v8424_v4 }
0x1207   :  { %8426 = vmatprep.subr.bf16.mxu0 %v8746_v17  ;;  %v3391_v17 = vadd.f32 %v9425_v60, %v9441_v7 }
0x1208   :  { %8422 = vmatpush3.bf16.msra.mxu1 %v8421_v16 }
0x120a   :  { %8428 = vmatpush3.bf16.msra.mxu0 %v8427_v44 }
0x120b   :  { %7990 = vmatmul.mubr.msk.f32.vlgmr.msra.gmra.mrb[68].mxu1 %vm405_vm2, %v6017_v49 }
0x12ce   :  { %v6086_v61 = vpop.f32.mrb[64].mxu1  ;;  %v6169_v25 = vpop.f32.mrb[64].mxu0 }
0x12cf   :  { %v6087_v26 = vadd.f32 %v9496_v57, %v6086_v61  ;;  %v6170_v20 = vadd.f32 %v6837_v24, %v6169_v25  ;;  %v7947_v30 = vpop.f32.mrb[65].mxu1  ;;  %v7958_v45 = vpop.f32.mrb[65].mxu0 }
0x12d1   :  { %6091 = vst [vmem:[#allocation5 + $0x8] sm:$0x3] %v6087_v26  ;;  %v6416_v32 = vadd.f32 %v6170_v20, %v9403_v42 }
0x12d3   :  { %v6860_v34 = vmul.f32 -1.442695, %v6416_v32 }
0x12d5   :  { %8652 = vpow2.f32 %v6860_v34 }
0x12d6   :  { %v6250_v37 = vpop.f32.mrb[66].mxu1  ;;  %v6331_v39 = vpop.f32.mrb[66].mxu0 }
0x12d7   :  { %v6251_v40 = vadd.f32 %v6844_v63, %v6250_v37  ;;  %v6332_v43 = vadd.f32 %v6851_v41, %v6331_v39  ;;  %v7969_v2 = vpop.f32.mrb[67].mxu1  ;;  %v7980_v10 = vpop.f32.mrb[67].mxu0 }
0x12d9   :  { %v6423_v46 = vadd.f32 %v6251_v40, %v3391_v17  ;;  %v6430_v11 = vadd.f32 %v6332_v43, %v9408_v47 }
0x12db   :  { %v6861_v50 = vmul.f32 -1.442695, %v6423_v46 }
0x12dd   :  { %8654 = vpow2.f32 %v6861_v50 }
0x12de   :  { %v6412_v42 = vpop.f32.mrb[68].mxu1  ;;  %8656 = vtanh.f32 %v6430_v11 }
0x12df   :  { %v8653_v15 = vpop.eup %8652  ;;  %v6413_v54 = vadd.f32 %v6858_v0, %v6412_v42  ;;  %v7991_v55 = vpop.f32.mrb[69].mxu1 }
0x12e0   :  { %v6420_v58 = vadd.f32 1.0, %v8653_v15 }
0x12e1   :  { %v6432_v60 = vadd.f32 %v6413_v54, %v3563_v48 }
0x12e2   :  { %8658 = vrcp.f32 %v6420_v58 }
0x12e3   :  { %v6862_v7 = vmul.f32 -1.442695, %v6432_v60 }
0x12e5   :  { %8660 = vpow2.f32 %v6862_v7 }
0x12e7   :  { %v8655_v36 = vpop.eup %8654 }
0x12e8   :  { %v6427_v28 = vadd.f32 1.0, %v8655_v36  ;;  %v8657_v47 = vpop.eup %8656 }
0x12ea   :  { %8662 = vrcp.f32 %v6427_v28 }
0x12ec   :  { %v8659_v1 = vpop.eup %8658 }
0x12ed   :  { %v6443_v52 = vmul.f32 %v8659_v1, %v8657_v47 }
0x12ef   :  { %v8661_v5 = vpop.eup %8660 }
0x12f0   :  { %v6436_v3 = vadd.f32 1.0, %v8661_v5 }
0x12f2   :  { %8664 = vrcp.f32 %v6436_v3 }
0x12f4   :  { %v8663_v8 = vpop.eup %8662 }
0x12f5   :  { %v6442_v62 = vmul.f32 %v8663_v8, %v6440_v6 }
0x12f7   :  { %v6444_v19 = vadd.f32 %v6443_v52, %v6442_v62 }
0x12f9   :  { %8666 = vtanh.f32 %v6444_v19 }
0x12fc   :  { %v8665_v53 = vpop.eup %8664 }
0x1303   :  { %v8667_v9 = vpop.eup %8666 }
0x1304   :  { %v6446_v12 = vmul.f32 %v8667_v9, %v8665_v53 }
0x1306   :  { %8001 = vmatmul.mubr.msk.f32.vlgmr.msra.gmra.mrb[68].mxu0 %vm405_vm2, %v6446_v12 }
0x1307   :  { %8679 = shalt.err (!%p8676_p4)
}
0x1308   :  { %s8680_s23 = scalar_lea.hbm %s8905_s7, 32 }
0x1309   :  { %p8681_p5 = scmp.ne.s32.totalorder %s8905_s7, %s8680_s23  ;;  %p8684_p6 = scmp.lt.u32.totalorder %s8680_s23, %s8905_s7 }
0x130b   :  { %p8686_p7 = pnand %p8684_p6, %p8681_p5 }
0x130d   :  { %8689 = shalt.err (!%p8686_p7)
}
0x130e   :  { %6542 = dma.vmem_to_hbm [thread:$0]  %s6540_s20, 32, %s8905_s7, [#allocation4]  }
0x130f   :  { %s8751_s28 = smov [#allocation5]  }
0x1310   :  { %s6548_s13 = sshll.u32 %s8751_s28, 4  ;;  %s6549_s13 = int_to_ptr.vmem [resolvable:$true] %s6548_s13 }
0x1311   :  { %s8690_s15 = scalar_lea.vmem %s6549_s13, 192  ;;  %p8695_p9 = scmp.lt.s32.totalorder %s6549_s13, %s6549_s13 }
0x1312   :  { %p8691_p8 = scmp.ne.s32.totalorder %s6549_s13, %s8690_s15  ;;  %p8696_p10 = scmp.lt.s32.totalorder %s8690_s15, %s8690_s15 }
0x1314   :  { %p8697_p11 = por %p8696_p10, %p8695_p9 }
0x1316   :  { %p8698_p12 = pnand %p8697_p11, %p8691_p8 }
0x13d9   :  { %v6527_v51 = vpop.f32.mrb[68].mxu0 }
0x13da   :  { %v6528_v49 = vadd.f32 %v9496_v57, %v6527_v51  ;;  %v8002_v38 = vpop.f32.mrb[69].mxu0 }
0x13dc   :  { %6532 = vst [vmem:[#allocation5 + $0xa] sm:$0x3] %v6528_v49 }
0x13dd   :  { %8701 = shalt.err (!%p8698_p12)
}
0x13de   :  { %s8702_s18 = scalar_lea.hbm %s8910_s16, 192 }
0x13df   :  { %p8703_p13 = scmp.ne.s32.totalorder %s8910_s16, %s8702_s18  ;;  %p8706_p0 = scmp.lt.u32.totalorder %s8702_s18, %s8910_s16 }
0x13e1   :  { %p8708_p1 = pnand %p8706_p0, %p8703_p13 }
0x13e3   :  { %8711 = shalt.err (!%p8708_p1)
}
0x13e4   :  { %s8752_s7 = smov 32   ;;  %s8753_s27 = smov 2  }
0x13e5   :  { %6554 = dma.vmem_to_hbm [thread:$0]  %s6549_s13, 192, %s8910_s16, [#allocation6], %s8752_s7, %s8752_s7, %s8753_s27  }
0x13e6   :  { %8712 = dma.done.wait [#allocation4], 32  }
0x13e7   :  { %8713 = vsyncadd [#allocation4], 4294967264 }
0x13e8   :  { %8714 = dma.done.wait [#allocation6], 192  }
0x13e9   :  { %8715 = vsyncadd [#allocation6], 4294967104 }
0x13ea   :  { %6561 = vsyncpa [#allocation4], 1 }
0x13eb   :  { %6562 = vsyncpa [#allocation6], 1 }

</bundles_post_ra>
